<compile_context>
chip_gen: v7x
topology: tpu7x:2x2x1
jax: 0.10.0
libtpu: 0.0.40
codegen_flags: <defaults>
</compile_context>

<pallas_src>
import functools

import jax
import jax.numpy as jnp
from jax.experimental import pallas as pl
from jax.experimental.pallas import tpu as pltpu

_EPS = 1e-5


# --------------------------------------------------------------------------- #
# Small helpers
# --------------------------------------------------------------------------- #
def _vmem_limit_bytes():
    """Generation-aware scoped-VMEM budget (headroom below the physical cap)."""
    try:
        phys = int(pltpu.get_tpu_info().vmem_capacity_bytes)
        return max(32 * 1024 * 1024, min(phys * 3 // 4, 96 * 1024 * 1024))
    except Exception:
        return 32 * 1024 * 1024  # conservative default that compiles everywhere


def _cparams(sem, vmem):
    return pltpu.CompilerParams(dimension_semantics=sem, vmem_limit_bytes=vmem)


def _cost(flops, bytes_accessed):
    return pl.CostEstimate(flops=int(flops), transcendentals=0,
                           bytes_accessed=int(bytes_accessed))


def _pick_tile_m(m, cap):
    """Largest multiple of 8 that divides m and is <= cap."""
    assert m % 8 == 0, "rows (N*H*W) must be a multiple of 8"
    t = min(cap, m)
    t -= t % 8
    while m % t != 0:
        t -= 8
    return t


def _pick_divisor(n, cap):
    t = min(cap, n)
    while n % t != 0:
        t -= 1
    return t


def _fold_bn(sums, sqs, rows_per_tile, gamma, beta):
    """Chan-style merge of per-tile (sum, sumsq) partials; fold BN to scale/bias."""
    c = sums.shape[-1]
    sums = sums.reshape(-1, c).astype(jnp.float32)
    sqs = sqs.reshape(-1, c).astype(jnp.float32)
    n = float(rows_per_tile)
    t = sums.shape[0]
    means = sums / n
    m2s = sqs - sums * means                      # per-tile centred sum of squares
    mean = jnp.mean(means, axis=0)                # equal per-tile row counts
    m2 = jnp.sum(m2s, axis=0) + n * jnp.sum((means - mean) ** 2, axis=0)
    var = jnp.maximum(m2 / (n * t), 0.0)          # biased variance (training mode)
    scale = gamma.reshape(-1) * jax.lax.rsqrt(var + _EPS)
    bias = beta.reshape(-1) - mean * scale
    return (scale[None, :].astype(jnp.float32),
            bias[None, :].astype(jnp.float32))


# --------------------------------------------------------------------------- #
# Kernels
# --------------------------------------------------------------------------- #
def _conv1_kernel(x_ref, w1_ref, z1_ref, s_ref, sq_ref):
    """conv1 (1x1) matmul; f32 BN partials, bf16 activation store."""
    z = jnp.dot(x_ref[...], w1_ref[...], preferred_element_type=jnp.float32)
    s_ref[...] = jnp.sum(z, axis=0, keepdims=True)[None]
    sq_ref[...] = jnp.sum(z * z, axis=0, keepdims=True)[None]
    z1_ref[...] = z.astype(jnp.bfloat16)


def _conv2_kernel(z1_ref, sc1_ref, bi1_ref, w2_ref,
                  a2_ref, s_ref, sq_ref,
                  slab_ref, cols_ref, *, H, W, SH):
    """bn1(folded)+relu and the 3x3 conv (stride 1, pad 1) for one row-strip.

    The full (H*W, P) bf16 image is resident in VMEM (block index depends only
    on the image axis, so consecutive strips reuse the buffer).  The strip plus
    a one-row halo is materialised in a small bf16 slab scratch (zero rows model
    the conv's zero padding); the 9 shifted taps are static slices of the slab,
    masked at the left/right image borders and written into a bf16 im2col
    scratch; the convolution is ONE fused (SL, 9P) x (9P, P) MXU matmul.
    """
    P = w2_ref.shape[1]
    SL = SH * W
    r0 = pl.program_id(1) * SH                    # first output row of this strip
    row0 = pl.multiple_of(r0 * W, 8)              # W % 8 == 0 (asserted outside)

    sc1 = sc1_ref[...]
    bi1 = bi1_ref[...]

    def bn1_relu(v):                              # bf16 -> bf16, math in f32
        return jnp.maximum(v.astype(jnp.float32) * sc1 + bi1,
                           0.0).astype(jnp.bfloat16)

    # ---- slab: rows [r0-1, r0+SH] with a 1-element flat pad on each end ----
    # slab[1 + j] = h1 at flat position (r0-1)*W + j  (zero outside the image)
    zpad = jnp.zeros((W + 1, P), jnp.bfloat16)
    slab_len = SL + 2 * W + 2
    slab_ref[0:W + 1, :] = zpad                               # pad + top halo
    slab_ref[1 + W + SL:slab_len, :] = zpad                   # bottom halo + pad
    slab_ref[1 + W:1 + W + SL, :] = bn1_relu(z1_ref[0, pl.ds(row0, SL), :])

    @pl.when(r0 > 0)
    def _():
        slab_ref[1:1 + W, :] = bn1_relu(z1_ref[0, pl.ds(row0 - W, W), :])

    @pl.when(r0 + SH < H)
    def _():
        slab_ref[1 + W + SL:1 + 2 * W + SL, :] = bn1_relu(
            z1_ref[0, pl.ds(row0 + SL, W), :])

    # ---- column-border masks: computed once per strip, shared across taps --
    ww = jax.lax.broadcasted_iota(jnp.int32, (SL, 1), 0) % W
    left_ok = ww >= 1                             # dx = -1 reads column w-1
    right_ok = ww <= W - 2                        # dx = +1 reads column w+1

    # ---- scatter the 9 shifted taps into the im2col scratch (bf16) ---------
    for k in range(9):
        dy, dx = k // 3 - 1, k % 3 - 1
        lo = 1 + (dy + 1) * W + dx                # static start in [0, 2W+2]
        tap = slab_ref[lo:lo + SL, :]
        if dx == -1:
            tap = jnp.where(left_ok, tap, 0)
        elif dx == 1:
            tap = jnp.where(right_ok, tap, 0)
        cols_ref[:, k * P:(k + 1) * P] = tap

    # ---- one fused (SL, 9P) x (9P, P) MXU matmul ----------------------------
    acc2 = jnp.dot(cols_ref[...], w2_ref[...], preferred_element_type=jnp.float32)
    s_ref[...] = jnp.sum(acc2, axis=0, keepdims=True)[None]
    sq_ref[...] = jnp.sum(acc2 * acc2, axis=0, keepdims=True)[None]
    a2_ref[0] = acc2.astype(jnp.bfloat16)


def _conv3_kernel(a2_ref, sc2_ref, bi2_ref, w3_ref, z3_ref, s_ref, sq_ref):
    """bn2(folded)+relu, conv3 (1x1) matmul; f32 partials, bf16 store."""
    h2 = jnp.maximum(a2_ref[...].astype(jnp.float32) * sc2_ref[...] + bi2_ref[...],
                     0.0)
    z3 = jnp.dot(h2.astype(jnp.bfloat16), w3_ref[...],
                 preferred_element_type=jnp.float32)
    s_ref[...] = jnp.sum(z3, axis=0, keepdims=True)[None]
    sq_ref[...] = jnp.sum(z3 * z3, axis=0, keepdims=True)[None]
    z3_ref[...] = z3.astype(jnp.bfloat16)


def _epilogue_kernel(z3_ref, x_ref, sc3_ref, bi3_ref, out_ref):
    """bn3 (folded) + identity residual (bf16 input up-cast) + relu."""
    out_ref[...] = jnp.maximum(
        z3_ref[...].astype(jnp.float32) * sc3_ref[...] + bi3_ref[...]
        + x_ref[...].astype(jnp.float32), 0.0)


# --------------------------------------------------------------------------- #
# Forward
# --------------------------------------------------------------------------- #
def bottleneck_forward(x_nchw, params, *, strip_h=16, tile_m=1024):
    N, Cin, H, W = x_nchw.shape
    P = params["w1"].shape[1]
    Cout = 4 * P
    assert Cin == Cout, ("identity residual (stride=1, downsample=None) "
                         "needs inplanes == 4*planes")
    assert W % 8 == 0, "W must be a multiple of 8 (sublane-aligned strips)"
    L = H * W
    M = N * L

    SH = _pick_divisor(H, strip_h)           # rows per pass-2 strip
    S = H // SH
    SL = SH * W

    # Single bf16 copy of the input (cast fused into the layout transpose);
    # the residual add re-reads this bf16 copy (documented numeric delta).
    x_bf = jnp.transpose(x_nchw, (0, 2, 3, 1)).astype(jnp.bfloat16).reshape(M, Cin)
    w1 = params["w1"].astype(jnp.bfloat16)                     # (Cin, P)
    w2f = params["w2"].reshape(9 * P, P).astype(jnp.bfloat16)  # (9P, P)
    w3 = params["w3"].astype(jnp.bfloat16)                     # (P, 4P)

    vmem = _vmem_limit_bytes()
    tm = _pick_tile_m(M, tile_m)
    nt = M // tm

    # ---- pass 1: conv1 + bn1 partial stats (grid over M row-tiles) ---------
    z1, s1, sq1 = pl.pallas_call(
        _conv1_kernel,
        grid=(nt,),
        in_specs=[
            pl.BlockSpec((tm, Cin), lambda i: (i, 0)),
            pl.BlockSpec((Cin, P), lambda i: (0, 0)),
        ],
        out_specs=(
            pl.BlockSpec((tm, P), lambda i: (i, 0)),
            pl.BlockSpec((1, 1, P), lambda i: (i, 0, 0)),
            pl.BlockSpec((1, 1, P), lambda i: (i, 0, 0)),
        ),
        out_shape=(
            jax.ShapeDtypeStruct((M, P), jnp.bfloat16),
            jax.ShapeDtypeStruct((nt, 1, P), jnp.float32),
            jax.ShapeDtypeStruct((nt, 1, P), jnp.float32),
        ),
        compiler_params=_cparams(("parallel",), vmem),
        cost_estimate=_cost(2 * M * Cin * P,
                            M * Cin * 2 + Cin * P * 2 + M * P * 2 + nt * P * 8),
    )(x_bf, w1)
    sc1, bi1 = _fold_bn(s1, sq1, tm, params["g1"], params["b1"])

    # ---- pass 2: bn1+relu, fused 3x3 conv, strip-tiled (grid = image x strip)
    z1_img = z1.reshape(N, L, P)
    acc2, s2, sq2 = pl.pallas_call(
        functools.partial(_conv2_kernel, H=H, W=W, SH=SH),
        grid=(N, S),
        in_specs=[
            pl.BlockSpec((1, L, P), lambda n, s: (n, 0, 0)),
            pl.BlockSpec((1, P), lambda n, s: (0, 0)),
            pl.BlockSpec((1, P), lambda n, s: (0, 0)),
            pl.BlockSpec((9 * P, P), lambda n, s: (0, 0)),
        ],
        out_specs=(
            pl.BlockSpec((1, SL, P), lambda n, s: (n, s, 0)),
            pl.BlockSpec((1, 1, P), lambda n, s: (n * S + s, 0, 0)),
            pl.BlockSpec((1, 1, P), lambda n, s: (n * S + s, 0, 0)),
        ),
        out_shape=(
            jax.ShapeDtypeStruct((N, L, P), jnp.bfloat16),
            jax.ShapeDtypeStruct((N * S, 1, P), jnp.float32),
            jax.ShapeDtypeStruct((N * S, 1, P), jnp.float32),
        ),
        scratch_shapes=[
            pltpu.VMEM((SL + 2 * W + 2, P), jnp.bfloat16),   # strip + halo slab
            pltpu.VMEM((SL, 9 * P), jnp.bfloat16),           # im2col columns
        ],
        compiler_params=_cparams(("parallel", "parallel"), vmem),
        cost_estimate=_cost(2 * M * (9 * P) * P + 10 * M * P,
                            2 * M * P * 2 + 9 * P * P * 2 + N * S * P * 8),
    )(z1_img, sc1, bi1, w2f)
    sc2, bi2 = _fold_bn(s2, sq2, SL, params["g2"], params["b2"])

    # ---- pass 3: bn2+relu, conv3 + bn3 partial stats (grid over M row-tiles)
    a2 = acc2.reshape(M, P)
    z3, s3, sq3 = pl.pallas_call(
        _conv3_kernel,
        grid=(nt,),
        in_specs=[
            pl.BlockSpec((tm, P), lambda i: (i, 0)),
            pl.BlockSpec((1, P), lambda i: (0, 0)),
            pl.BlockSpec((1, P), lambda i: (0, 0)),
            pl.BlockSpec((P, Cout), lambda i: (0, 0)),
        ],
        out_specs=(
            pl.BlockSpec((tm, Cout), lambda i: (i, 0)),
            pl.BlockSpec((1, 1, Cout), lambda i: (i, 0, 0)),
            pl.BlockSpec((1, 1, Cout), lambda i: (i, 0, 0)),
        ),
        out_shape=(
            jax.ShapeDtypeStruct((M, Cout), jnp.bfloat16),
            jax.ShapeDtypeStruct((nt, 1, Cout), jnp.float32),
            jax.ShapeDtypeStruct((nt, 1, Cout), jnp.float32),
        ),
        compiler_params=_cparams(("parallel",), vmem),
        cost_estimate=_cost(2 * M * P * Cout + 4 * M * P,
                            M * P * 2 + P * Cout * 2 + M * Cout * 2 + nt * Cout * 8),
    )(a2, sc2, bi2, w3)
    sc3, bi3 = _fold_bn(s3, sq3, tm, params["g3"], params["b3"])

    # ---- pass 4: bn3 + identity residual + relu (grid over M row-tiles) ----
    out2d = pl.pallas_call(
        _epilogue_kernel,
        grid=(nt,),
        in_specs=[
            pl.BlockSpec((tm, Cout), lambda i: (i, 0)),
            pl.BlockSpec((tm, Cout), lambda i: (i, 0)),
            pl.BlockSpec((1, Cout), lambda i: (0, 0)),
            pl.BlockSpec((1, Cout), lambda i: (0, 0)),
        ],
        out_specs=pl.BlockSpec((tm, Cout), lambda i: (i, 0)),
        out_shape=jax.ShapeDtypeStruct((M, Cout), jnp.float32),
        compiler_params=_cparams(("parallel",), vmem),
        cost_estimate=_cost(4 * M * Cout,
                            M * Cout * (2 + 2 + 4) + Cout * 8),
    )(z3, x_bf, sc3, bi3)

    return out2d.reshape(N, H, W, Cout).transpose(0, 3, 1, 2)  # back to NCHW


# --------------------------------------------------------------------------- #
# Pure-JAX reference (same math, f32 end-to-end)
# --------------------------------------------------------------------------- #
def bottleneck_reference(x_nchw, params):
    x = jnp.transpose(x_nchw, (0, 2, 3, 1)).astype(jnp.float32)
    N, H, W, _ = x.shape

    def bn(z, g, b):
        m = z.mean(axis=(0, 1, 2))
        v = ((z - m) ** 2).mean(axis=(0, 1, 2))
        return (z - m) * jax.lax.rsqrt(v + _EPS) * g + b

    h = jnp.einsum("nhwc,cp->nhwp", x, params["w1"])
    h = jax.nn.relu(bn(h, params["g1"][0], params["b1"][0]))
    hp = jnp.pad(h, ((0, 0), (1, 1), (1, 1), (0, 0)))
    P = params["w1"].shape[1]
    h2 = jnp.zeros((N, H, W, P), jnp.float32)
    for k in range(9):
        ky, kx = k // 3, k % 3
        h2 = h2 + jnp.einsum("nhwc,cp->nhwp",
                             hp[:, ky:ky + H, kx:kx + W, :], params["w2"][k])
    h2 = jax.nn.relu(bn(h2, params["g2"][0], params["b2"][0]))
    h3 = jnp.einsum("nhwc,cp->nhwp", h2, params["w3"])
    h3 = bn(h3, params["g3"][0], params["b3"][0])
    out = jax.nn.relu(h3 + x)
    return jnp.transpose(out, (0, 3, 1, 2))


def init_params(key, inplanes, planes):
    P = planes
    ks = jax.random.split(key, 9)

    def u(k, shape, scale):
        return (scale * jax.random.normal(k, shape)).astype(jnp.float32)

    return {
        "w1": u(ks[0], (inplanes, P), 0.2),            # conv1: 1x1, [Cin, P]
        "g1": 1.0 + u(ks[1], (1, P), 0.1),
        "b1": u(ks[2], (1, P), 0.1),
        "w2": u(ks[3], (9, P, P), 0.2),                # conv2: 3x3 taps, [9, P, P]
        "g2": 1.0 + u(ks[4], (1, P), 0.1),
        "b2": u(ks[5], (1, P), 0.1),
        "w3": u(ks[6], (P, 4 * P), 0.2),               # conv3: 1x1, [P, 4P]
        "g3": 1.0 + u(ks[7], (1, 4 * P), 0.1),
        "b3": u(ks[8], (1, 4 * P), 0.1),
    }


if __name__ == "__main__":
    key = jax.random.PRNGKey(0)
    kx, kp, kx2 = jax.random.split(key, 3)

    N, planes = 2, 4
    inplanes = 4 * planes                              # identity residual path
    params = init_params(kp, inplanes, planes)

    fwd = jax.jit(functools.partial(bottleneck_forward, strip_h=8, tile_m=128))

    # Config A: 16x16 images -> pass-2 grid (2 images x 2 strips), 4 row-tiles
    # in passes 1/3/4 (real grids + interior/boundary halo paths).
    x = jax.random.normal(kx, (N, inplanes, 16, 16), dtype=jnp.float32)
    out = jax.block_until_ready(fwd(x, params))
    ref = bottleneck_reference(x, params)
    assert out.shape == x.shape, out.shape
    err = float(jnp.max(jnp.abs(out - ref)))
    merr = float(jnp.mean(jnp.abs(out - ref)))
    # bf16 matmul operands + bf16 inter-pass activations vs the all-f32 reference.
    assert err < 1e-1 and merr < 1e-2, (err, merr)

    # Config B: H != W and a single strip per image (both halo rows take the
    # zero-padding path).
    x2 = jax.random.normal(kx2, (N, inplanes, 8, 16), dtype=jnp.float32)
    out2 = jax.block_until_ready(fwd(x2, params))
    ref2 = bottleneck_reference(x2, params)
    err2 = float(jnp.max(jnp.abs(out2 - ref2)))
    assert out2.shape == x2.shape and err2 < 1e-1, (out2.shape, err2)

    print("KERNEL_OK")
</pallas_src>

<mosaic_0001>
module attributes {stable_mosaic.version = 11 : i64} {
  func.func @_conv1_kernel(%arg0: i32, %arg1: memref<128x16xbf16, #tpu.memory_space<vmem>>, %arg2: memref<16x4xbf16, #tpu.memory_space<vmem>>, %arg3: memref<128x4xbf16, #tpu.memory_space<vmem>>, %arg4: memref<1x1x4xf32, #tpu.memory_space<vmem>>, %arg5: memref<1x1x4xf32, #tpu.memory_space<vmem>>) attributes {dimension_semantics = [#tpu.dimension_semantics<parallel>], iteration_bounds = array<i64: 4>, scalar_prefetch = 0 : i64, scratch_operands = 0 : i64, tpu.core_type = #tpu.core_type<tc>, window_params = [{transform_indices = @transform_0, window_bounds = array<i64: 128, 16>}, {pipeline_mode = #tpu.pipeline_mode<synchronous>, transform_indices = @transform_1, window_bounds = array<i64: 16, 4>}, {transform_indices = @transform_2, window_bounds = array<i64: 128, 4>}, {transform_indices = @transform_3, window_bounds = array<i64: 1, 1, 4>}, {transform_indices = @transform_4, window_bounds = array<i64: 1, 1, 4>}]} {
    %c0 = arith.constant 0 : index
    %c0_0 = arith.constant 0 : index
    %0 = vector.load %arg1[%c0, %c0_0] : memref<128x16xbf16, #tpu.memory_space<vmem>>, vector<128x16xbf16>
    %c0_1 = arith.constant 0 : index
    %c0_2 = arith.constant 0 : index
    %1 = vector.load %arg2[%c0_1, %c0_2] : memref<16x4xbf16, #tpu.memory_space<vmem>>, vector<16x4xbf16>
    %cst = arith.constant dense<0.000000e+00> : vector<128x4xf32>
    %2 = tpu.matmul %0, %1, %cst {dimension_numbers = #tpu.dot_dimension_numbers<[1], [0], [0], [1], [0, 0, 1, 1], [], []>} : vector<128x16xbf16>, vector<16x4xbf16>, vector<128x4xf32> -> vector<128x4xf32>
    %cst_3 = arith.constant dense<0.000000e+00> : vector<4xf32>
    %3 = vector.multi_reduction <add>, %2, %cst_3 [0] : vector<128x4xf32> to vector<4xf32>
    %4 = vector.shape_cast %3 : vector<4xf32> to vector<1x4xf32>
    %5 = vector.shape_cast %4 : vector<1x4xf32> to vector<1x1x4xf32>
    %c0_4 = arith.constant 0 : index
    %c0_5 = arith.constant 0 : index
    %c0_6 = arith.constant 0 : index
    %6 = vector.load %arg4[%c0_4, %c0_5, %c0_6] : memref<1x1x4xf32, #tpu.memory_space<vmem>>, vector<1x1x4xf32>
    tpu.vector_store %arg4[%c0_4, %c0_5, %c0_6], %5 {strides = array<i32>} : memref<1x1x4xf32, #tpu.memory_space<vmem>>, vector<1x1x4xf32>,
    %7 = arith.mulf %2, %2 : vector<128x4xf32>
    %cst_7 = arith.constant dense<0.000000e+00> : vector<4xf32>
    %8 = vector.multi_reduction <add>, %7, %cst_7 [0] : vector<128x4xf32> to vector<4xf32>
    %9 = vector.shape_cast %8 : vector<4xf32> to vector<1x4xf32>
    %10 = vector.shape_cast %9 : vector<1x4xf32> to vector<1x1x4xf32>
    %c0_8 = arith.constant 0 : index
    %c0_9 = arith.constant 0 : index
    %c0_10 = arith.constant 0 : index
    %11 = vector.load %arg5[%c0_8, %c0_9, %c0_10] : memref<1x1x4xf32, #tpu.memory_space<vmem>>, vector<1x1x4xf32>
    tpu.vector_store %arg5[%c0_8, %c0_9, %c0_10], %10 {strides = array<i32>} : memref<1x1x4xf32, #tpu.memory_space<vmem>>, vector<1x1x4xf32>,
    %12 = arith.truncf %2 : vector<128x4xf32> to vector<128x4xbf16>
    %c0_11 = arith.constant 0 : index
    %c0_12 = arith.constant 0 : index
    %13 = vector.load %arg3[%c0_11, %c0_12] : memref<128x4xbf16, #tpu.memory_space<vmem>>, vector<128x4xbf16>
    tpu.vector_store %arg3[%c0_11, %c0_12], %12 {strides = array<i32>} : memref<128x4xbf16, #tpu.memory_space<vmem>>, vector<128x4xbf16>,
    return
  }
  func.func @transform_0(%arg0: i32) -> (i32, i32) {
    %c0_i32 = arith.constant 0 : i32
    %c0_i32_0 = arith.constant 0 : i32
    return %arg0, %c0_i32 : i32, i32
  }
  func.func @transform_1(%arg0: i32) -> (i32, i32) {
    %c0_i32 = arith.constant 0 : i32
    %c0_i32_0 = arith.constant 0 : i32
    %c0_i32_1 = arith.constant 0 : i32
    return %c0_i32, %c0_i32_0 : i32, i32
  }
  func.func @transform_2(%arg0: i32) -> (i32, i32) {
    %c0_i32 = arith.constant 0 : i32
    %c0_i32_0 = arith.constant 0 : i32
    return %arg0, %c0_i32 : i32, i32
  }
  func.func @transform_3(%arg0: i32) -> (i32, i32, i32) {
    %c0_i32 = arith.constant 0 : i32
    %c0_i32_0 = arith.constant 0 : i32
    %c0_i32_1 = arith.constant 0 : i32
    return %arg0, %c0_i32, %c0_i32_0 : i32, i32, i32
  }
  func.func @transform_4(%arg0: i32) -> (i32, i32, i32) {
    %c0_i32 = arith.constant 0 : i32
    %c0_i32_0 = arith.constant 0 : i32
    %c0_i32_1 = arith.constant 0 : i32
    return %arg0, %c0_i32, %c0_i32_0 : i32, i32, i32
  }
}

module attributes {stable_mosaic.version = 11 : i64} {
  func.func @_conv3_kernel(%arg0: i32, %arg1: memref<128x4xbf16, #tpu.memory_space<vmem>>, %arg2: memref<1x4xf32, #tpu.memory_space<vmem>>, %arg3: memref<1x4xf32, #tpu.memory_space<vmem>>, %arg4: memref<4x16xbf16, #tpu.memory_space<vmem>>, %arg5: memref<128x16xbf16, #tpu.memory_space<vmem>>, %arg6: memref<1x1x16xf32, #tpu.memory_space<vmem>>, %arg7: memref<1x1x16xf32, #tpu.memory_space<vmem>>) attributes {dimension_semantics = [#tpu.dimension_semantics<parallel>], iteration_bounds = array<i64: 4>, scalar_prefetch = 0 : i64, scratch_operands = 0 : i64, tpu.core_type = #tpu.core_type<tc>, window_params = [{transform_indices = @transform_0, window_bounds = array<i64: 128, 4>}, {pipeline_mode = #tpu.pipeline_mode<synchronous>, transform_indices = @transform_1, window_bounds = array<i64: 1, 4>}, {pipeline_mode = #tpu.pipeline_mode<synchronous>, transform_indices = @transform_2, window_bounds = array<i64: 1, 4>}, {pipeline_mode = #tpu.pipeline_mode<synchronous>, transform_indices = @transform_3, window_bounds = array<i64: 4, 16>}, {transform_indices = @transform_4, window_bounds = array<i64: 128, 16>}, {transform_indices = @transform_5, window_bounds = array<i64: 1, 1, 16>}, {transform_indices = @transform_6, window_bounds = array<i64: 1, 1, 16>}]} {
    %c0 = arith.constant 0 : index
    %c0_0 = arith.constant 0 : index
    %0 = vector.load %arg1[%c0, %c0_0] : memref<128x4xbf16, #tpu.memory_space<vmem>>, vector<128x4xbf16>
    %1 = arith.extf %0 : vector<128x4xbf16> to vector<128x4xf32>
    %c0_1 = arith.constant 0 : index
    %c0_2 = arith.constant 0 : index
    %2 = vector.load %arg2[%c0_1, %c0_2] : memref<1x4xf32, #tpu.memory_space<vmem>>, vector<1x4xf32>
    %3 = vector.broadcast %2 : vector<1x4xf32> to vector<128x4xf32>
    %4 = arith.mulf %1, %3 : vector<128x4xf32>
    %c0_3 = arith.constant 0 : index
    %c0_4 = arith.constant 0 : index
    %5 = vector.load %arg3[%c0_3, %c0_4] : memref<1x4xf32, #tpu.memory_space<vmem>>, vector<1x4xf32>
    %6 = vector.broadcast %5 : vector<1x4xf32> to vector<128x4xf32>
    %7 = arith.addf %4, %6 : vector<128x4xf32>
    %cst = arith.constant 0.000000e+00 : f32
    %8 = vector.broadcast %cst : f32 to vector<128x4xf32>
    %9 = arith.maximumf %7, %8 : vector<128x4xf32>
    %10 = arith.truncf %9 : vector<128x4xf32> to vector<128x4xbf16>
    %c0_5 = arith.constant 0 : index
    %c0_6 = arith.constant 0 : index
    %11 = vector.load %arg4[%c0_5, %c0_6] : memref<4x16xbf16, #tpu.memory_space<vmem>>, vector<4x16xbf16>
    %cst_7 = arith.constant dense<0.000000e+00> : vector<128x16xf32>
    %12 = tpu.matmul %10, %11, %cst_7 {dimension_numbers = #tpu.dot_dimension_numbers<[1], [0], [0], [1], [0, 0, 1, 1], [], []>} : vector<128x4xbf16>, vector<4x16xbf16>, vector<128x16xf32> -> vector<128x16xf32>
    %cst_8 = arith.constant dense<0.000000e+00> : vector<16xf32>
    %13 = vector.multi_reduction <add>, %12, %cst_8 [0] : vector<128x16xf32> to vector<16xf32>
    %14 = vector.shape_cast %13 : vector<16xf32> to vector<1x16xf32>
    %15 = vector.shape_cast %14 : vector<1x16xf32> to vector<1x1x16xf32>
    %c0_9 = arith.constant 0 : index
    %c0_10 = arith.constant 0 : index
    %c0_11 = arith.constant 0 : index
    %16 = vector.load %arg6[%c0_9, %c0_10, %c0_11] : memref<1x1x16xf32, #tpu.memory_space<vmem>>, vector<1x1x16xf32>
    tpu.vector_store %arg6[%c0_9, %c0_10, %c0_11], %15 {strides = array<i32>} : memref<1x1x16xf32, #tpu.memory_space<vmem>>, vector<1x1x16xf32>,
    %17 = arith.mulf %12, %12 : vector<128x16xf32>
    %cst_12 = arith.constant dense<0.000000e+00> : vector<16xf32>
    %18 = vector.multi_reduction <add>, %17, %cst_12 [0] : vector<128x16xf32> to vector<16xf32>
    %19 = vector.shape_cast %18 : vector<16xf32> to vector<1x16xf32>
    %20 = vector.shape_cast %19 : vector<1x16xf32> to vector<1x1x16xf32>
    %c0_13 = arith.constant 0 : index
    %c0_14 = arith.constant 0 : index
    %c0_15 = arith.constant 0 : index
    %21 = vector.load %arg7[%c0_13, %c0_14, %c0_15] : memref<1x1x16xf32, #tpu.memory_space<vmem>>, vector<1x1x16xf32>
    tpu.vector_store %arg7[%c0_13, %c0_14, %c0_15], %20 {strides = array<i32>} : memref<1x1x16xf32, #tpu.memory_space<vmem>>, vector<1x1x16xf32>,
    %22 = arith.truncf %12 : vector<128x16xf32> to vector<128x16xbf16>
    %c0_16 = arith.constant 0 : index
    %c0_17 = arith.constant 0 : index
    %23 = vector.load %arg5[%c0_16, %c0_17] : memref<128x16xbf16, #tpu.memory_space<vmem>>, vector<128x16xbf16>
    tpu.vector_store %arg5[%c0_16, %c0_17], %22 {strides = array<i32>} : memref<128x16xbf16, #tpu.memory_space<vmem>>, vector<128x16xbf16>,
    return
  }
  func.func @transform_0(%arg0: i32) -> (i32, i32) {
    %c0_i32 = arith.constant 0 : i32
    %c0_i32_0 = arith.constant 0 : i32
    return %arg0, %c0_i32 : i32, i32
  }
  func.func @transform_1(%arg0: i32) -> (i32, i32) {
    %c0_i32 = arith.constant 0 : i32
    %c0_i32_0 = arith.constant 0 : i32
    %c0_i32_1 = arith.constant 0 : i32
    return %c0_i32, %c0_i32_0 : i32, i32
  }
  func.func @transform_2(%arg0: i32) -> (i32, i32) {
    %c0_i32 = arith.constant 0 : i32
    %c0_i32_0 = arith.constant 0 : i32
    %c0_i32_1 = arith.constant 0 : i32
    return %c0_i32, %c0_i32_0 : i32, i32
  }
  func.func @transform_3(%arg0: i32) -> (i32, i32) {
    %c0_i32 = arith.constant 0 : i32
    %c0_i32_0 = arith.constant 0 : i32
    %c0_i32_1 = arith.constant 0 : i32
    return %c0_i32, %c0_i32_0 : i32, i32
  }
  func.func @transform_4(%arg0: i32) -> (i32, i32) {
    %c0_i32 = arith.constant 0 : i32
    %c0_i32_0 = arith.constant 0 : i32
    return %arg0, %c0_i32 : i32, i32
  }
  func.func @transform_5(%arg0: i32) -> (i32, i32, i32) {
    %c0_i32 = arith.constant 0 : i32
    %c0_i32_0 = arith.constant 0 : i32
    %c0_i32_1 = arith.constant 0 : i32
    return %arg0, %c0_i32, %c0_i32_0 : i32, i32, i32
  }
  func.func @transform_6(%arg0: i32) -> (i32, i32, i32) {
    %c0_i32 = arith.constant 0 : i32
    %c0_i32_0 = arith.constant 0 : i32
    %c0_i32_1 = arith.constant 0 : i32
    return %arg0, %c0_i32, %c0_i32_0 : i32, i32, i32
  }
}

module attributes {stable_mosaic.version = 11 : i64} {
  func.func @_conv2_kernel(%arg0: i32, %arg1: i32, %arg2: memref<1x256x4xbf16, #tpu.memory_space<vmem>>, %arg3: memref<1x4xf32, #tpu.memory_space<vmem>>, %arg4: memref<1x4xf32, #tpu.memory_space<vmem>>, %arg5: memref<36x4xbf16, #tpu.memory_space<vmem>>, %arg6: memref<1x128x4xbf16, #tpu.memory_space<vmem>>, %arg7: memref<1x1x4xf32, #tpu.memory_space<vmem>>, %arg8: memref<1x1x4xf32, #tpu.memory_space<vmem>>, %arg9: memref<162x4xbf16, #tpu.memory_space<vmem>>, %arg10: memref<128x36xbf16, #tpu.memory_space<vmem>>) attributes {dimension_semantics = [#tpu.dimension_semantics<parallel>, #tpu.dimension_semantics<parallel>], iteration_bounds = array<i64: 2, 2>, scalar_prefetch = 0 : i64, scratch_operands = 2 : i64, tpu.core_type = #tpu.core_type<tc>, window_params = [{transform_indices = @transform_0, window_bounds = array<i64: 1, 256, 4>}, {pipeline_mode = #tpu.pipeline_mode<synchronous>, transform_indices = @transform_1, window_bounds = array<i64: 1, 4>}, {pipeline_mode = #tpu.pipeline_mode<synchronous>, transform_indices = @transform_2, window_bounds = array<i64: 1, 4>}, {pipeline_mode = #tpu.pipeline_mode<synchronous>, transform_indices = @transform_3, window_bounds = array<i64: 36, 4>}, {transform_indices = @transform_4, window_bounds = array<i64: 1, 128, 4>}, {transform_indices = @transform_5, window_bounds = array<i64: 1, 1, 4>}, {transform_indices = @transform_6, window_bounds = array<i64: 1, 1, 4>}]} {
    %c8_i32 = arith.constant 8 : i32
    %0 = arith.muli %arg1, %c8_i32 : i32
    %c16_i32 = arith.constant 16 : i32
    %1 = arith.muli %0, %c16_i32 : i32
    %2 = tpu.assume_multiple %1, 8 : i32
    %c0 = arith.constant 0 : index
    %c0_0 = arith.constant 0 : index
    %3 = vector.load %arg3[%c0, %c0_0] : memref<1x4xf32, #tpu.memory_space<vmem>>, vector<1x4xf32>
    %c0_1 = arith.constant 0 : index
    %c0_2 = arith.constant 0 : index
    %4 = vector.load %arg4[%c0_1, %c0_2] : memref<1x4xf32, #tpu.memory_space<vmem>>, vector<1x4xf32>
    %cst = arith.constant 0.000000e+00 : bf16
    %5 = vector.broadcast %cst : bf16 to vector<17x4xbf16>
    %c0_3 = arith.constant 0 : index
    %c0_4 = arith.constant 0 : index
    %6 = vector.load %arg9[%c0_3, %c0_4] : memref<162x4xbf16, #tpu.memory_space<vmem>>, vector<17x4xbf16>
    tpu.vector_store %arg9[%c0_3, %c0_4], %5 {strides = array<i32>} : memref<162x4xbf16, #tpu.memory_space<vmem>>, vector<17x4xbf16>,
    %c145 = arith.constant 145 : index
    %c0_5 = arith.constant 0 : index
    %7 = vector.load %arg9[%c145, %c0_5] : memref<162x4xbf16, #tpu.memory_space<vmem>>, vector<17x4xbf16>
    tpu.vector_store %arg9[%c145, %c0_5], %5 {strides = array<i32>} : memref<162x4xbf16, #tpu.memory_space<vmem>>, vector<17x4xbf16>,
    %c0_6 = arith.constant 0 : index
    %8 = arith.index_cast %2 : i32 to index
    %c0_7 = arith.constant 0 : index
    %9 = vector.load %arg2[%c0_6, %8, %c0_7] : memref<1x256x4xbf16, #tpu.memory_space<vmem>>, vector<1x128x4xbf16>
    %10 = vector.shape_cast %9 : vector<1x128x4xbf16> to vector<128x4xbf16>
    %11 = arith.extf %10 : vector<128x4xbf16> to vector<128x4xf32>
    %12 = vector.broadcast %3 : vector<1x4xf32> to vector<128x4xf32>
    %13 = arith.mulf %11, %12 : vector<128x4xf32>
    %14 = vector.broadcast %4 : vector<1x4xf32> to vector<128x4xf32>
    %15 = arith.addf %13, %14 : vector<128x4xf32>
    %cst_8 = arith.constant 0.000000e+00 : f32
    %16 = vector.broadcast %cst_8 : f32 to vector<128x4xf32>
    %17 = arith.maximumf %15, %16 : vector<128x4xf32>
    %18 = arith.truncf %17 : vector<128x4xf32> to vector<128x4xbf16>
    %c17 = arith.constant 17 : index
    %c0_9 = arith.constant 0 : index
    %19 = vector.load %arg9[%c17, %c0_9] : memref<162x4xbf16, #tpu.memory_space<vmem>>, vector<128x4xbf16>
    tpu.vector_store %arg9[%c17, %c0_9], %18 {strides = array<i32>} : memref<162x4xbf16, #tpu.memory_space<vmem>>, vector<128x4xbf16>,
    %c0_i32 = arith.constant 0 : i32
    %20 = arith.cmpi sgt, %0, %c0_i32 : i32
    %21 = arith.extui %20 : i1 to i32
    %c0_i32_10 = arith.constant 0 : i32
    %22 = arith.cmpi ne, %21, %c0_i32_10 : i32
    scf.if %22 {
      %c16_i32_65 = arith.constant 16 : i32
      %112 = arith.subi %2, %c16_i32_65 : i32
      %c0_66 = arith.constant 0 : index
      %113 = arith.index_cast %112 : i32 to index
      %c0_67 = arith.constant 0 : index
      %114 = vector.load %arg2[%c0_66, %113, %c0_67] : memref<1x256x4xbf16, #tpu.memory_space<vmem>>, vector<1x16x4xbf16>
      %115 = vector.shape_cast %114 : vector<1x16x4xbf16> to vector<16x4xbf16>
      %116 = arith.extf %115 : vector<16x4xbf16> to vector<16x4xf32>
      %117 = vector.broadcast %3 : vector<1x4xf32> to vector<16x4xf32>
      %118 = arith.mulf %116, %117 : vector<16x4xf32>
      %119 = vector.broadcast %4 : vector<1x4xf32> to vector<16x4xf32>
      %120 = arith.addf %118, %119 : vector<16x4xf32>
      %cst_68 = arith.constant 0.000000e+00 : f32
      %121 = vector.broadcast %cst_68 : f32 to vector<16x4xf32>
      %122 = arith.maximumf %120, %121 : vector<16x4xf32>
      %123 = arith.truncf %122 : vector<16x4xf32> to vector<16x4xbf16>
      %c1_69 = arith.constant 1 : index
      %c0_70 = arith.constant 0 : index
      %124 = vector.load %arg9[%c1_69, %c0_70] : memref<162x4xbf16, #tpu.memory_space<vmem>>, vector<16x4xbf16>
      tpu.vector_store %arg9[%c1_69, %c0_70], %123 {strides = array<i32>} : memref<162x4xbf16, #tpu.memory_space<vmem>>, vector<16x4xbf16>,
    } else {
    }
    %c8_i32_11 = arith.constant 8 : i32
    %23 = arith.addi %0, %c8_i32_11 : i32
    %c16_i32_12 = arith.constant 16 : i32
    %24 = arith.cmpi slt, %23, %c16_i32_12 : i32
    %25 = arith.extui %24 : i1 to i32
    %c0_i32_13 = arith.constant 0 : i32
    %26 = arith.cmpi ne, %25, %c0_i32_13 : i32
    scf.if %26 {
      %c128_i32 = arith.constant 128 : i32
      %112 = arith.addi %2, %c128_i32 : i32
      %c0_65 = arith.constant 0 : index
      %113 = arith.index_cast %112 : i32 to index
      %c0_66 = arith.constant 0 : index
      %114 = vector.load %arg2[%c0_65, %113, %c0_66] : memref<1x256x4xbf16, #tpu.memory_space<vmem>>, vector<1x16x4xbf16>
      %115 = vector.shape_cast %114 : vector<1x16x4xbf16> to vector<16x4xbf16>
      %116 = arith.extf %115 : vector<16x4xbf16> to vector<16x4xf32>
      %117 = vector.broadcast %3 : vector<1x4xf32> to vector<16x4xf32>
      %118 = arith.mulf %116, %117 : vector<16x4xf32>
      %119 = vector.broadcast %4 : vector<1x4xf32> to vector<16x4xf32>
      %120 = arith.addf %118, %119 : vector<16x4xf32>
      %cst_67 = arith.constant 0.000000e+00 : f32
      %121 = vector.broadcast %cst_67 : f32 to vector<16x4xf32>
      %122 = arith.maximumf %120, %121 : vector<16x4xf32>
      %123 = arith.truncf %122 : vector<16x4xf32> to vector<16x4xbf16>
      %c145_68 = arith.constant 145 : index
      %c0_69 = arith.constant 0 : index
      %124 = vector.load %arg9[%c145_68, %c0_69] : memref<162x4xbf16, #tpu.memory_space<vmem>>, vector<16x4xbf16>
      tpu.vector_store %arg9[%c145_68, %c0_69], %123 {strides = array<i32>} : memref<162x4xbf16, #tpu.memory_space<vmem>>, vector<16x4xbf16>,
    } else {
    }
    %27 = tpu.iota {dimensions = array<i32: 0>} : vector<128x1xi32>
    %c16_i32_14 = arith.constant 16 : i32
    %c0_i32_15 = arith.constant 0 : i32
    %28 = arith.cmpi eq, %c16_i32_14, %c0_i32_15 : i32
    %c1_i32 = arith.constant 1 : i32
    %29 = arith.select %28, %c1_i32, %c16_i32_14 : i32
    %30 = vector.broadcast %29 : i32 to vector<128x1xi32>
    %31 = arith.remsi %27, %30 : vector<128x1xi32>
    %c0_i32_16 = arith.constant 0 : i32
    %32 = vector.broadcast %c0_i32_16 : i32 to vector<128x1xi32>
    %33 = arith.cmpi ne, %31, %32 : vector<128x1xi32>
    %c0_i32_17 = arith.constant 0 : i32
    %34 = vector.broadcast %c0_i32_17 : i32 to vector<128x1xi32>
    %35 = arith.cmpi slt, %31, %34 : vector<128x1xi32>
    %c0_i32_18 = arith.constant 0 : i32
    %36 = arith.cmpi slt, %29, %c0_i32_18 : i32
    %37 = vector.broadcast %36 : i1 to vector<128x1xi1>
    %38 = vector.broadcast %37 : vector<128x1xi1> to vector<128x1xi1>
    %39 = arith.xori %35, %38 : vector<128x1xi1>
    %40 = arith.andi %39, %33 : vector<128x1xi1>
    %41 = vector.broadcast %29 : i32 to vector<128x1xi32>
    %42 = arith.addi %31, %41 : vector<128x1xi32>
    %43 = arith.select %40, %42, %31 : vector<128x1xi1>, vector<128x1xi32>
    %c1_i32_19 = arith.constant 1 : i32
    %44 = vector.broadcast %c1_i32_19 : i32 to vector<128x1xi32>
    %45 = arith.cmpi sge, %43, %44 : vector<128x1xi32>
    %c14_i32 = arith.constant 14 : i32
    %46 = vector.broadcast %c14_i32 : i32 to vector<128x1xi32>
    %47 = arith.cmpi sle, %43, %46 : vector<128x1xi32>
    %c0_20 = arith.constant 0 : index
    %c0_21 = arith.constant 0 : index
    %48 = vector.load %arg9[%c0_20, %c0_21] : memref<162x4xbf16, #tpu.memory_space<vmem>>, vector<128x4xbf16>
    %c0_i32_22 = arith.constant 0 : i32
    %49 = arith.sitofp %c0_i32_22 : i32 to bf16
    %50 = vector.shape_cast %45 : vector<128x1xi1> to vector<128x1xi1>
    %51 = vector.broadcast %50 : vector<128x1xi1> to vector<128x4xi1>
    %52 = vector.broadcast %49 : bf16 to vector<128x4xbf16>
    %53 = arith.select %51, %48, %52 : vector<128x4xi1>, vector<128x4xbf16>
    %c0_23 = arith.constant 0 : index
    %c0_24 = arith.constant 0 : index
    %54 = vector.load %arg10[%c0_23, %c0_24] : memref<128x36xbf16, #tpu.memory_space<vmem>>, vector<128x4xbf16>
    tpu.vector_store %arg10[%c0_23, %c0_24], %53 {strides = array<i32>} : memref<128x36xbf16, #tpu.memory_space<vmem>>, vector<128x4xbf16>,
    %c1 = arith.constant 1 : index
    %c0_25 = arith.constant 0 : index
    %55 = vector.load %arg9[%c1, %c0_25] : memref<162x4xbf16, #tpu.memory_space<vmem>>, vector<128x4xbf16>
    %c0_26 = arith.constant 0 : index
    %c4 = arith.constant 4 : index
    %56 = vector.load %arg10[%c0_26, %c4] : memref<128x36xbf16, #tpu.memory_space<vmem>>, vector<128x4xbf16>
    tpu.vector_store %arg10[%c0_26, %c4], %55 {strides = array<i32>} : memref<128x36xbf16, #tpu.memory_space<vmem>>, vector<128x4xbf16>,
    %c2 = arith.constant 2 : index
    %c0_27 = arith.constant 0 : index
    %57 = vector.load %arg9[%c2, %c0_27] : memref<162x4xbf16, #tpu.memory_space<vmem>>, vector<128x4xbf16>
    %c0_i32_28 = arith.constant 0 : i32
    %58 = arith.sitofp %c0_i32_28 : i32 to bf16
    %59 = vector.shape_cast %47 : vector<128x1xi1> to vector<128x1xi1>
    %60 = vector.broadcast %59 : vector<128x1xi1> to vector<128x4xi1>
    %61 = vector.broadcast %58 : bf16 to vector<128x4xbf16>
    %62 = arith.select %60, %57, %61 : vector<128x4xi1>, vector<128x4xbf16>
    %c0_29 = arith.constant 0 : index
    %c8 = arith.constant 8 : index
    %63 = vector.load %arg10[%c0_29, %c8] : memref<128x36xbf16, #tpu.memory_space<vmem>>, vector<128x4xbf16>
    tpu.vector_store %arg10[%c0_29, %c8], %62 {strides = array<i32>} : memref<128x36xbf16, #tpu.memory_space<vmem>>, vector<128x4xbf16>,
    %c16 = arith.constant 16 : index
    %c0_30 = arith.constant 0 : index
    %64 = vector.load %arg9[%c16, %c0_30] : memref<162x4xbf16, #tpu.memory_space<vmem>>, vector<128x4xbf16>
    %c0_i32_31 = arith.constant 0 : i32
    %65 = arith.sitofp %c0_i32_31 : i32 to bf16
    %66 = vector.shape_cast %45 : vector<128x1xi1> to vector<128x1xi1>
    %67 = vector.broadcast %66 : vector<128x1xi1> to vector<128x4xi1>
    %68 = vector.broadcast %65 : bf16 to vector<128x4xbf16>
    %69 = arith.select %67, %64, %68 : vector<128x4xi1>, vector<128x4xbf16>
    %c0_32 = arith.constant 0 : index
    %c12 = arith.constant 12 : index
    %70 = vector.load %arg10[%c0_32, %c12] : memref<128x36xbf16, #tpu.memory_space<vmem>>, vector<128x4xbf16>
    tpu.vector_store %arg10[%c0_32, %c12], %69 {strides = array<i32>} : memref<128x36xbf16, #tpu.memory_space<vmem>>, vector<128x4xbf16>,
    %c17_33 = arith.constant 17 : index
    %c0_34 = arith.constant 0 : index
    %71 = vector.load %arg9[%c17_33, %c0_34] : memref<162x4xbf16, #tpu.memory_space<vmem>>, vector<128x4xbf16>
    %c0_35 = arith.constant 0 : index
    %c16_36 = arith.constant 16 : index
    %72 = vector.load %arg10[%c0_35, %c16_36] : memref<128x36xbf16, #tpu.memory_space<vmem>>, vector<128x4xbf16>
    tpu.vector_store %arg10[%c0_35, %c16_36], %71 {strides = array<i32>} : memref<128x36xbf16, #tpu.memory_space<vmem>>, vector<128x4xbf16>,
    %c18 = arith.constant 18 : index
    %c0_37 = arith.constant 0 : index
    %73 = vector.load %arg9[%c18, %c0_37] : memref<162x4xbf16, #tpu.memory_space<vmem>>, vector<128x4xbf16>
    %c0_i32_38 = arith.constant 0 : i32
    %74 = arith.sitofp %c0_i32_38 : i32 to bf16
    %75 = vector.shape_cast %47 : vector<128x1xi1> to vector<128x1xi1>
    %76 = vector.broadcast %75 : vector<128x1xi1> to vector<128x4xi1>
    %77 = vector.broadcast %74 : bf16 to vector<128x4xbf16>
    %78 = arith.select %76, %73, %77 : vector<128x4xi1>, vector<128x4xbf16>
    %c0_39 = arith.constant 0 : index
    %c20 = arith.constant 20 : index
    %79 = vector.load %arg10[%c0_39, %c20] : memref<128x36xbf16, #tpu.memory_space<vmem>>, vector<128x4xbf16>
    tpu.vector_store %arg10[%c0_39, %c20], %78 {strides = array<i32>} : memref<128x36xbf16, #tpu.memory_space<vmem>>, vector<128x4xbf16>,
    %c32 = arith.constant 32 : index
    %c0_40 = arith.constant 0 : index
    %80 = vector.load %arg9[%c32, %c0_40] : memref<162x4xbf16, #tpu.memory_space<vmem>>, vector<128x4xbf16>
    %c0_i32_41 = arith.constant 0 : i32
    %81 = arith.sitofp %c0_i32_41 : i32 to bf16
    %82 = vector.shape_cast %45 : vector<128x1xi1> to vector<128x1xi1>
    %83 = vector.broadcast %82 : vector<128x1xi1> to vector<128x4xi1>
    %84 = vector.broadcast %81 : bf16 to vector<128x4xbf16>
    %85 = arith.select %83, %80, %84 : vector<128x4xi1>, vector<128x4xbf16>
    %c0_42 = arith.constant 0 : index
    %c24 = arith.constant 24 : index
    %86 = vector.load %arg10[%c0_42, %c24] : memref<128x36xbf16, #tpu.memory_space<vmem>>, vector<128x4xbf16>
    tpu.vector_store %arg10[%c0_42, %c24], %85 {strides = array<i32>} : memref<128x36xbf16, #tpu.memory_space<vmem>>, vector<128x4xbf16>,
    %c33 = arith.constant 33 : index
    %c0_43 = arith.constant 0 : index
    %87 = vector.load %arg9[%c33, %c0_43] : memref<162x4xbf16, #tpu.memory_space<vmem>>, vector<128x4xbf16>
    %c0_44 = arith.constant 0 : index
    %c28 = arith.constant 28 : index
    %88 = vector.load %arg10[%c0_44, %c28] : memref<128x36xbf16, #tpu.memory_space<vmem>>, vector<128x4xbf16>
    tpu.vector_store %arg10[%c0_44, %c28], %87 {strides = array<i32>} : memref<128x36xbf16, #tpu.memory_space<vmem>>, vector<128x4xbf16>,
    %c34 = arith.constant 34 : index
    %c0_45 = arith.constant 0 : index
    %89 = vector.load %arg9[%c34, %c0_45] : memref<162x4xbf16, #tpu.memory_space<vmem>>, vector<128x4xbf16>
    %c0_i32_46 = arith.constant 0 : i32
    %90 = arith.sitofp %c0_i32_46 : i32 to bf16
    %91 = vector.shape_cast %47 : vector<128x1xi1> to vector<128x1xi1>
    %92 = vector.broadcast %91 : vector<128x1xi1> to vector<128x4xi1>
    %93 = vector.broadcast %90 : bf16 to vector<128x4xbf16>
    %94 = arith.select %92, %89, %93 : vector<128x4xi1>, vector<128x4xbf16>
    %c0_47 = arith.constant 0 : index
    %c32_48 = arith.constant 32 : index
    %95 = vector.load %arg10[%c0_47, %c32_48] : memref<128x36xbf16, #tpu.memory_space<vmem>>, vector<128x4xbf16>
    tpu.vector_store %arg10[%c0_47, %c32_48], %94 {strides = array<i32>} : memref<128x36xbf16, #tpu.memory_space<vmem>>, vector<128x4xbf16>,
    %c0_49 = arith.constant 0 : index
    %c0_50 = arith.constant 0 : index
    %96 = vector.load %arg10[%c0_49, %c0_50] : memref<128x36xbf16, #tpu.memory_space<vmem>>, vector<128x36xbf16>
    %c0_51 = arith.constant 0 : index
    %c0_52 = arith.constant 0 : index
    %97 = vector.load %arg5[%c0_51, %c0_52] : memref<36x4xbf16, #tpu.memory_space<vmem>>, vector<36x4xbf16>
    %cst_53 = arith.constant dense<0.000000e+00> : vector<128x4xf32>
    %98 = tpu.matmul %96, %97, %cst_53 {dimension_numbers = #tpu.dot_dimension_numbers<[1], [0], [0], [1], [0, 0, 1, 1], [], []>} : vector<128x36xbf16>, vector<36x4xbf16>, vector<128x4xf32> -> vector<128x4xf32>
    %cst_54 = arith.constant dense<0.000000e+00> : vector<4xf32>
    %99 = vector.multi_reduction <add>, %98, %cst_54 [0] : vector<128x4xf32> to vector<4xf32>
    %100 = vector.shape_cast %99 : vector<4xf32> to vector<1x4xf32>
    %101 = vector.shape_cast %100 : vector<1x4xf32> to vector<1x1x4xf32>
    %c0_55 = arith.constant 0 : index
    %c0_56 = arith.constant 0 : index
    %c0_57 = arith.constant 0 : index
    %102 = vector.load %arg7[%c0_55, %c0_56, %c0_57] : memref<1x1x4xf32, #tpu.memory_space<vmem>>, vector<1x1x4xf32>
    tpu.vector_store %arg7[%c0_55, %c0_56, %c0_57], %101 {strides = array<i32>} : memref<1x1x4xf32, #tpu.memory_space<vmem>>, vector<1x1x4xf32>,
    %103 = arith.mulf %98, %98 : vector<128x4xf32>
    %cst_58 = arith.constant dense<0.000000e+00> : vector<4xf32>
    %104 = vector.multi_reduction <add>, %103, %cst_58 [0] : vector<128x4xf32> to vector<4xf32>
    %105 = vector.shape_cast %104 : vector<4xf32> to vector<1x4xf32>
    %106 = vector.shape_cast %105 : vector<1x4xf32> to vector<1x1x4xf32>
    %c0_59 = arith.constant 0 : index
    %c0_60 = arith.constant 0 : index
    %c0_61 = arith.constant 0 : index
    %107 = vector.load %arg8[%c0_59, %c0_60, %c0_61] : memref<1x1x4xf32, #tpu.memory_space<vmem>>, vector<1x1x4xf32>
    tpu.vector_store %arg8[%c0_59, %c0_60, %c0_61], %106 {strides = array<i32>} : memref<1x1x4xf32, #tpu.memory_space<vmem>>, vector<1x1x4xf32>,
    %108 = arith.truncf %98 : vector<128x4xf32> to vector<128x4xbf16>
    %c0_62 = arith.constant 0 : index
    %c0_63 = arith.constant 0 : index
    %c0_64 = arith.constant 0 : index
    %109 = vector.load %arg6[%c0_62, %c0_63, %c0_64] : memref<1x128x4xbf16, #tpu.memory_space<vmem>>, vector<1x128x4xbf16>
    %110 = vector.shape_cast %109 : vector<1x128x4xbf16> to vector<128x4xbf16>
    %111 = vector.shape_cast %108 : vector<128x4xbf16> to vector<1x128x4xbf16>
    tpu.vector_store %arg6[%c0_62, %c0_63, %c0_64], %111 {strides = array<i32>} : memref<1x128x4xbf16, #tpu.memory_space<vmem>>, vector<1x128x4xbf16>,
    return
  }
  func.func @transform_0(%arg0: i32, %arg1: i32) -> (i32, i32, i32) {
    %c0_i32 = arith.constant 0 : i32
    %c0_i32_0 = arith.constant 0 : i32
    %c0_i32_1 = arith.constant 0 : i32
    return %arg0, %c0_i32, %c0_i32_0 : i32, i32, i32
  }
  func.func @transform_1(%arg0: i32, %arg1: i32) -> (i32, i32) {
    %c0_i32 = arith.constant 0 : i32
    %c0_i32_0 = arith.constant 0 : i32
    %c0_i32_1 = arith.constant 0 : i32
    return %c0_i32, %c0_i32_0 : i32, i32
  }
  func.func @transform_2(%arg0: i32, %arg1: i32) -> (i32, i32) {
    %c0_i32 = arith.constant 0 : i32
    %c0_i32_0 = arith.constant 0 : i32
    %c0_i32_1 = arith.constant 0 : i32
    return %c0_i32, %c0_i32_0 : i32, i32
  }
  func.func @transform_3(%arg0: i32, %arg1: i32) -> (i32, i32) {
    %c0_i32 = arith.constant 0 : i32
    %c0_i32_0 = arith.constant 0 : i32
    %c0_i32_1 = arith.constant 0 : i32
    return %c0_i32, %c0_i32_0 : i32, i32
  }
  func.func @transform_4(%arg0: i32, %arg1: i32) -> (i32, i32, i32) {
    %c0_i32 = arith.constant 0 : i32
    %c0_i32_0 = arith.constant 0 : i32
    return %arg0, %arg1, %c0_i32 : i32, i32, i32
  }
  func.func @transform_5(%arg0: i32, %arg1: i32) -> (i32, i32, i32) {
    %c2_i32 = arith.constant 2 : i32
    %0 = arith.muli %arg0, %c2_i32 : i32
    %1 = arith.addi %0, %arg1 : i32
    %c0_i32 = arith.constant 0 : i32
    %c0_i32_0 = arith.constant 0 : i32
    %c0_i32_1 = arith.constant 0 : i32
    return %1, %c0_i32, %c0_i32_0 : i32, i32, i32
  }
  func.func @transform_6(%arg0: i32, %arg1: i32) -> (i32, i32, i32) {
    %c2_i32 = arith.constant 2 : i32
    %0 = arith.muli %arg0, %c2_i32 : i32
    %1 = arith.addi %0, %arg1 : i32
    %c0_i32 = arith.constant 0 : i32
    %c0_i32_0 = arith.constant 0 : i32
    %c0_i32_1 = arith.constant 0 : i32
    return %1, %c0_i32, %c0_i32_0 : i32, i32, i32
  }
}

module attributes {stable_mosaic.version = 11 : i64} {
  func.func @_epilogue_kernel(%arg0: i32, %arg1: memref<128x16xbf16, #tpu.memory_space<vmem>>, %arg2: memref<128x16xbf16, #tpu.memory_space<vmem>>, %arg3: memref<1x16xf32, #tpu.memory_space<vmem>>, %arg4: memref<1x16xf32, #tpu.memory_space<vmem>>, %arg5: memref<128x16xf32, #tpu.memory_space<vmem>>) attributes {dimension_semantics = [#tpu.dimension_semantics<parallel>], iteration_bounds = array<i64: 4>, scalar_prefetch = 0 : i64, scratch_operands = 0 : i64, tpu.core_type = #tpu.core_type<tc>, window_params = [{transform_indices = @transform_0, window_bounds = array<i64: 128, 16>}, {transform_indices = @transform_1, window_bounds = array<i64: 128, 16>}, {pipeline_mode = #tpu.pipeline_mode<synchronous>, transform_indices = @transform_2, window_bounds = array<i64: 1, 16>}, {pipeline_mode = #tpu.pipeline_mode<synchronous>, transform_indices = @transform_3, window_bounds = array<i64: 1, 16>}, {transform_indices = @transform_4, window_bounds = array<i64: 128, 16>}]} {
    %c0 = arith.constant 0 : index
    %c0_0 = arith.constant 0 : index
    %0 = vector.load %arg1[%c0, %c0_0] : memref<128x16xbf16, #tpu.memory_space<vmem>>, vector<128x16xbf16>
    %1 = arith.extf %0 : vector<128x16xbf16> to vector<128x16xf32>
    %c0_1 = arith.constant 0 : index
    %c0_2 = arith.constant 0 : index
    %2 = vector.load %arg3[%c0_1, %c0_2] : memref<1x16xf32, #tpu.memory_space<vmem>>, vector<1x16xf32>
    %3 = vector.broadcast %2 : vector<1x16xf32> to vector<128x16xf32>
    %4 = arith.mulf %1, %3 : vector<128x16xf32>
    %c0_3 = arith.constant 0 : index
    %c0_4 = arith.constant 0 : index
    %5 = vector.load %arg4[%c0_3, %c0_4] : memref<1x16xf32, #tpu.memory_space<vmem>>, vector<1x16xf32>
    %6 = vector.broadcast %5 : vector<1x16xf32> to vector<128x16xf32>
    %7 = arith.addf %4, %6 : vector<128x16xf32>
    %c0_5 = arith.constant 0 : index
    %c0_6 = arith.constant 0 : index
    %8 = vector.load %arg2[%c0_5, %c0_6] : memref<128x16xbf16, #tpu.memory_space<vmem>>, vector<128x16xbf16>
    %9 = arith.extf %8 : vector<128x16xbf16> to vector<128x16xf32>
    %10 = arith.addf %7, %9 : vector<128x16xf32>
    %cst = arith.constant 0.000000e+00 : f32
    %11 = vector.broadcast %cst : f32 to vector<128x16xf32>
    %12 = arith.maximumf %10, %11 : vector<128x16xf32>
    %c0_7 = arith.constant 0 : index
    %c0_8 = arith.constant 0 : index
    %13 = vector.load %arg5[%c0_7, %c0_8] : memref<128x16xf32, #tpu.memory_space<vmem>>, vector<128x16xf32>
    tpu.vector_store %arg5[%c0_7, %c0_8], %12 {strides = array<i32>} : memref<128x16xf32, #tpu.memory_space<vmem>>, vector<128x16xf32>,
    return
  }
  func.func @transform_0(%arg0: i32) -> (i32, i32) {
    %c0_i32 = arith.constant 0 : i32
    %c0_i32_0 = arith.constant 0 : i32
    return %arg0, %c0_i32 : i32, i32
  }
  func.func @transform_1(%arg0: i32) -> (i32, i32) {
    %c0_i32 = arith.constant 0 : i32
    %c0_i32_0 = arith.constant 0 : i32
    return %arg0, %c0_i32 : i32, i32
  }
  func.func @transform_2(%arg0: i32) -> (i32, i32) {
    %c0_i32 = arith.constant 0 : i32
    %c0_i32_0 = arith.constant 0 : i32
    %c0_i32_1 = arith.constant 0 : i32
    return %c0_i32, %c0_i32_0 : i32, i32
  }
  func.func @transform_3(%arg0: i32) -> (i32, i32) {
    %c0_i32 = arith.constant 0 : i32
    %c0_i32_0 = arith.constant 0 : i32
    %c0_i32_1 = arith.constant 0 : i32
    return %c0_i32, %c0_i32_0 : i32, i32
  }
  func.func @transform_4(%arg0: i32) -> (i32, i32) {
    %c0_i32 = arith.constant 0 : i32
    %c0_i32_0 = arith.constant 0 : i32
    return %arg0, %c0_i32 : i32, i32
  }
}

</mosaic_0001>

<bundles_post_ra>
// kernel: bottleneck_forward.4
= control target key start
LH: loop header
LB: loop body
LE: loop exit
PB: predicated region body
PF: predicated region fallthrough
CT: control target
= control target key end

     0   :  { %s825_s15 = smov 0   ;;  %s944_s0 = inlined_call_operand.vmem [shape: bf16[512,16], index: 0, kind: input, shape index: {}]   ;;  %s945_s1 = inlined_call_operand.vmem [shape: bf16[16,4], index: 1, kind: input, shape index: {}]   ;;  %s946_s2 = inlined_call_operand.vmem [shape: bf16[512,4], index: 2, kind: output, shape index: {0}]   ;;  %s947_s3 = inlined_call_operand.vmem [shape: f32[4,1,4], index: 3, kind: output, shape index: {1}]   ;;  %s948_s4 = inlined_call_operand.vmem [shape: f32[4,1,4], index: 4, kind: output, shape index: {2}]  }
   0x1 LB: > { %s831_s16 = sadd.s32 4294967295, %s798_s15   ;;  %p690_p0 = scmp.ge.s32.totalorder %s798_s15, 1  ;;  %s798_s15 = sphi %s825_s15, %s15_s15  }
   0x2   : > { %p168_p1 = scmp.lt.s32.totalorder %s798_s15, 5 }
   0x4   : > { %p169_p2 = pnand %p690_p0, %p168_p1 }
   0x5   : > { %v783_v0 = vld [vmem:[%s945_s1] sm:$0xff] (!%p169_p2)   ;;  %s691_s19 = sshll.u32 (!%p169_p2), %s831_s16, 4  ;;  %vm283_vm0 = vcmask (!%p169_p2), 130048   ;;  %vm563_vm1 = vcmask (!%p169_p2), 27648   ;;  %vm405_vm2 = vcmask (!%p169_p2), 31744   ;;  %p212_p4 = scmp.lt.s32.totalorder (!%p169_p2), %s831_s16, 3 }
   0x6   : > { %172 = sbr.rel (%p169_p2) target bundleno = 279 (0x117), region = 28  ;;  %p201_p3 = scmp.lt.s32.totalorder (!%p169_p2), %s691_s19, 63  ;;  %755 = vmatprep.subr.bf16.mxu0 (!%p169_p2), %v783_v0  ;;  %773 = vmatprep.subr.bf16.mxu1 (!%p169_p2), %v783_v0  ;;  %vm443_vm3 = vcmask (!%p169_p2), 24576  }
   0x7   : > { %756 = vmatpush3.bf16.msra.mxu0 (!%p169_p2), %v783_v0  ;;  %774 = vmatpush3.bf16.msra.mxu1 (!%p169_p2), %v783_v0 }
   0xd   : > { %s950_s19 = smov (!%p201_p3, %s691_s19), 63  ;;  %s952_s16 = smov (!%p212_p4, %s831_s16), 3 }
   0xe   : > { %s692_s20 = sshll.u32 %s950_s19, 2  ;;  %s214_s29 = scalar_lea.vmem %s947_s3, %s952_s16 }
   0xf   : > { %s204_s23 = scalar_lea.vmem %s944_s0, %s692_s20  ;;  %s853_s26 = scalar_lea.vmem %s946_s2, %s692_s20 }
  0x10   : > { %v784_v1 = vld [vmem:[%s204_s23] sm:$0xff]   ;;  %v785_v2 = vld [vmem:[%s204_s23 + $0x8] sm:$0xff]   ;;  %v786_v3 = vld [vmem:[%s204_s23 + $0x10] sm:$0xff]   ;;  %s217_s6 = scalar_lea.vmem %s948_s4, %s952_s16 }
  0x11   : > { %757 = vmatprep.mubr.msk.bf16.mxu0 %vm283_vm0, %v784_v1  ;;  %v788_v4 = vld [vmem:[%s204_s23 + $0x20] sm:$0xff]   ;;  %v789_v5 = vld [vmem:[%s204_s23 + $0x28] sm:$0xff]   ;;  %v790_v6 = vld [vmem:[%s204_s23 + $0x30] sm:$0xff]  }
  0x12   : > { %758 = vmatmul.mubr.msk.bf16.vlgmr.msra.gmra.mrb[0].mxu0 %vm283_vm0, %v785_v2  ;;  %765 = vmatprep.mubr.msk.bf16.mxu1 %vm283_vm0, %v788_v4  ;;  %v787_v7 = vld [vmem:[%s204_s23 + $0x18] sm:$0xff]  }
  0x13   : > { %761 = vmatprep.mubr.msk.bf16.mxu0 %vm283_vm0, %v786_v3  ;;  %766 = vmatmul.mubr.msk.bf16.vlgmr.msra.gmra.mrb[0].mxu1 %vm283_vm0, %v789_v5  ;;  %v791_v8 = vld [vmem:[%s204_s23 + $0x38] sm:$0xff]  }
  0x14   : > { %769 = vmatprep.mubr.msk.bf16.mxu1 %vm283_vm0, %v790_v6 }
  0x1a   : > { %762 = vmatmul.mubr.msk.bf16.gmra.mrb[4].mxu0 %vm283_vm0, %v787_v7 }
  0x1b   : > { %770 = vmatmul.mubr.msk.bf16.gmra.mrb[4].mxu1 %vm283_vm0, %v791_v8 }
  0xe5   : > { %v759_v9 = vpop.f32.mrb[0].mxu0 }
  0xe6   : > { %v732_v10 = vpack.c.bf16 %v759_v9, %v759_v9  ;;  %v342_v11 = vpop.f32.mrb[1].mxu0  ;;  %v447_v15 = vmul.f32 %v759_v9, %v759_v9  ;;  %v861_v22 = vpop.f32.mrb[0].mxu1  ;;  %v409_v26 = vsel %vm405_vm2, %v759_v9, 0.0 }
  0xe7   : > { %v445_v12 = vmul.f32 %v342_v11, %v342_v11  ;;  %v730_v13 = vpack.c.bf16 %v342_v11, %v342_v11  ;;  %v760_v14 = vpop.f32.mrb[2].mxu0  ;;  %v406_v18 = vsel %vm405_vm2, %v342_v11, 0.0  ;;  %v374_v25 = vpop.f32.mrb[1].mxu1  ;;  %v740_v29 = vpack.c.bf16 %v861_v22, %v861_v22 }
  0xe8   : > { %566 = vst.msk [vmem:[%s853_s26 + $0x8] sm:$0xf] %vm563_vm1, %v732_v10  ;;  %v733_v16 = vpack.c.bf16 %v760_v14, %v760_v14  ;;  %v345_v17 = vpop.f32.mrb[3].mxu0  ;;  %v448_v23 = vmul.f32 %v760_v14, %v760_v14  ;;  %v872_v30 = vpop.f32.mrb[2].mxu1  ;;  %v738_v33 = vpack.c.bf16 %v374_v25, %v374_v25  ;;  %v464_v35 = vsel %vm405_vm2, %v447_v15, 0.0 }
  0xe9   : > { %564 = vst.msk [vmem:[%s853_s26] sm:$0xf] %vm563_vm1, %v730_v13  ;;  %v407_v19 = vsel %vm405_vm2, %v345_v17, 0.0  ;;  %v446_v20 = vmul.f32 %v345_v17, %v345_v17  ;;  %v731_v21 = vpack.c.bf16 %v345_v17, %v345_v17  ;;  %v461_v27 = vsel %vm405_vm2, %v445_v12, 0.0  ;;  %v377_v34 = vpop.f32.mrb[3].mxu1 }
  0xea   : > { %567 = vst.msk [vmem:[%s853_s26 + $0xc] sm:$0xf] %vm563_vm1, %v733_v16  ;;  %v408_v24 = vadd.f32 %v407_v19, %v406_v18  ;;  %574 = vst.msk [vmem:[%s853_s26 + $0x28] sm:$0xf] %vm563_vm1, %v740_v29  ;;  %v741_v37 = vpack.c.bf16 %v872_v30, %v872_v30  ;;  %v411_v38 = vsel %vm405_vm2, %v760_v14, 0.0  ;;  %v466_v39 = vsel %vm405_vm2, %v448_v23, 0.0 }
  0xeb   : > { %v462_v28 = vsel %vm405_vm2, %v446_v20, 0.0  ;;  %565 = vst.msk [vmem:[%s853_s26 + $0x4] sm:$0xf] %vm563_vm1, %v731_v21  ;;  %572 = vst.msk [vmem:[%s853_s26 + $0x20] sm:$0xf] %vm563_vm1, %v738_v33  ;;  %v453_v61 = vmul.f32 %v374_v25, %v374_v25  ;;  %v739_v2 = vpack.c.bf16 %v377_v34, %v377_v34  ;;  %v421_v9 = vsel %vm405_vm2, %v374_v25, 0.0 }
  0xec   : > { %v410_v31 = vadd.f32 %v409_v26, %v408_v24  ;;  %v463_v32 = vadd.f32 %v462_v28, %v461_v27  ;;  %575 = vst.msk [vmem:[%s853_s26 + $0x2c] sm:$0xf] %vm563_vm1, %v741_v37  ;;  %v454_v15 = vmul.f32 %v377_v34, %v377_v34  ;;  %v455_v20 = vmul.f32 %v861_v22, %v861_v22 }
  0xed   : > { %v763_v36 = vpop.f32.mrb[4].mxu0  ;;  %573 = vst.msk [vmem:[%s853_s26 + $0x24] sm:$0xf] %vm563_vm1, %v739_v2  ;;  %v476_v14 = vsel %vm405_vm2, %v453_v61, 0.0  ;;  %v423_v21 = vsel %vm405_vm2, %v377_v34, 0.0  ;;  %v425_v25 = vsel %vm405_vm2, %v861_v22, 0.0  ;;  %v456_v26 = vmul.f32 %v872_v30, %v872_v30 }
  0xee   : > { %v465_v40 = vadd.f32 %v464_v35, %v463_v32  ;;  %v736_v41 = vpack.c.bf16 %v763_v36, %v763_v36  ;;  %v358_v42 = vpop.f32.mrb[5].mxu0  ;;  %v412_v43 = vadd.f32 %v411_v38, %v410_v31  ;;  %v771_v54 = vpop.f32.mrb[4].mxu1  ;;  %v451_v55 = vmul.f32 %v763_v36, %v763_v36 }
  0xef   : > { %v413_v44 = vsel %vm405_vm2, %v358_v42, 0.0  ;;  %v449_v45 = vmul.f32 %v358_v42, %v358_v42  ;;  %v734_v46 = vpack.c.bf16 %v358_v42, %v358_v42  ;;  %v764_v47 = vpop.f32.mrb[6].mxu0  ;;  %v390_v59 = vpop.f32.mrb[5].mxu1  ;;  %v417_v63 = vsel %vm405_vm2, %v763_v36, 0.0 }
  0xf0   : > { %570 = vst.msk [vmem:[%s853_s26 + $0x18] sm:$0xf] %vm563_vm1, %v736_v41  ;;  %v467_v48 = vadd.f32 %v466_v39, %v465_v40  ;;  %v361_v49 = vpop.f32.mrb[7].mxu0  ;;  %v414_v50 = vadd.f32 %v413_v44, %v412_v43  ;;  %v737_v52 = vpack.c.bf16 %v764_v47, %v764_v47  ;;  %v772_v62 = vpop.f32.mrb[6].mxu1  ;;  %v452_v0 = vmul.f32 %v764_v47, %v764_v47 }
  0xf1   : > { %v468_v51 = vsel %vm405_vm2, %v449_v45, 0.0  ;;  %568 = vst.msk [vmem:[%s853_s26 + $0x10] sm:$0xf] %vm563_vm1, %v734_v46  ;;  %v415_v53 = vsel %vm405_vm2, %v361_v49, 0.0  ;;  %v450_v57 = vmul.f32 %v361_v49, %v361_v49  ;;  %v735_v58 = vpack.c.bf16 %v361_v49, %v361_v49  ;;  %v393_v3 = vpop.f32.mrb[7].mxu1 }
  0xf2   : > { %v469_v56 = vadd.f32 %v468_v51, %v467_v48  ;;  %571 = vst.msk [vmem:[%s853_s26 + $0x1c] sm:$0xf] %vm563_vm1, %v737_v52  ;;  %v416_v60 = vadd.f32 %v415_v53, %v414_v50  ;;  %v744_v6 = vpack.c.bf16 %v771_v54, %v771_v54  ;;  %v472_v7 = vsel %vm405_vm2, %v451_v55, 0.0 }
  0xf3   : > { %v470_v1 = vsel %vm405_vm2, %v450_v57, 0.0  ;;  %569 = vst.msk [vmem:[%s853_s26 + $0x14] sm:$0xf] %vm563_vm1, %v735_v58  ;;  %v419_v8 = vsel %vm405_vm2, %v764_v47, 0.0  ;;  %v742_v10 = vpack.c.bf16 %v390_v59, %v390_v59  ;;  %v474_v13 = vsel %vm405_vm2, %v452_v0, 0.0 }
  0xf4   : > { %v418_v4 = vadd.f32 %v417_v63, %v416_v60  ;;  %v471_v5 = vadd.f32 %v470_v1, %v469_v56  ;;  %578 = vst.msk [vmem:[%s853_s26 + $0x38] sm:$0xf] %vm563_vm1, %v744_v6  ;;  %v745_v16 = vpack.c.bf16 %v772_v62, %v772_v62  ;;  %v743_v19 = vpack.c.bf16 %v393_v3, %v393_v3 }
  0xf5   : > { %576 = vst.msk [vmem:[%s853_s26 + $0x30] sm:$0xf] %vm563_vm1, %v742_v10  ;;  %v478_v27 = vsel %vm405_vm2, %v454_v15, 0.0  ;;  %v457_v28 = vmul.f32 %v390_v59, %v390_v59  ;;  %v480_v32 = vsel %vm405_vm2, %v455_v20, 0.0  ;;  %v427_v33 = vsel %vm405_vm2, %v872_v30, 0.0 }
  0xf6   : > { %v473_v11 = vadd.f32 %v472_v7, %v471_v5  ;;  %v420_v12 = vadd.f32 %v419_v8, %v418_v4  ;;  %579 = vst.msk [vmem:[%s853_s26 + $0x3c] sm:$0xf] %vm563_vm1, %v745_v16  ;;  %577 = vst.msk [vmem:[%s853_s26 + $0x34] sm:$0xf] %vm563_vm1, %v743_v19  ;;  %v429_v34 = vsel %vm405_vm2, %v390_v59, 0.0  ;;  %v482_v37 = vsel %vm405_vm2, %v456_v26, 0.0 }
  0xf7   : > { %v484_v22 = vsel %vm405_vm2, %v457_v28, 0.0  ;;  %v458_v38 = vmul.f32 %v393_v3, %v393_v3  ;;  %v459_v41 = vmul.f32 %v771_v54, %v771_v54  ;;  %v431_v42 = vsel %vm405_vm2, %v393_v3, 0.0 }
  0xf8   : > { %v422_v17 = vadd.f32 %v421_v9, %v420_v12  ;;  %v475_v18 = vadd.f32 %v474_v13, %v473_v11  ;;  %v433_v45 = vsel %vm405_vm2, %v771_v54, 0.0  ;;  %v460_v30 = vmul.f32 %v772_v62, %v772_v62 }
  0xf9   : > { %v486_v46 = vsel %vm405_vm2, %v458_v38, 0.0  ;;  %v488_v49 = vsel %vm405_vm2, %v459_v41, 0.0  ;;  %v435_v50 = vsel %vm405_vm2, %v772_v62, 0.0 }
  0xfa   : > { %v477_v23 = vadd.f32 %v476_v14, %v475_v18  ;;  %v424_v24 = vadd.f32 %v423_v21, %v422_v17  ;;  %v490_v53 = vsel %vm405_vm2, %v460_v30, 0.0 }
  0xfc   : > { %v426_v29 = vadd.f32 %v425_v25, %v424_v24  ;;  %v479_v31 = vadd.f32 %v478_v27, %v477_v23 }
  0xfe   : > { %v481_v35 = vadd.f32 %v480_v32, %v479_v31  ;;  %v428_v36 = vadd.f32 %v427_v33, %v426_v29 }
 0x100   : > { %v430_v39 = vadd.f32 %v429_v34, %v428_v36  ;;  %v483_v40 = vadd.f32 %v482_v37, %v481_v35 }
 0x102   : > { %v485_v43 = vadd.f32 %v484_v22, %v483_v40  ;;  %v432_v44 = vadd.f32 %v431_v42, %v430_v39 }
 0x104   : > { %v434_v47 = vadd.f32 %v433_v45, %v432_v44  ;;  %v487_v48 = vadd.f32 %v486_v46, %v485_v43 }
 0x106   : > { %v436_v51 = vadd.f32 %v435_v50, %v434_v47  ;;  %v489_v52 = vadd.f32 %v488_v49, %v487_v48 }
 0x108   : > { %v437_v55 = vrot.slane %v436_v51, 4  ;;  %v491_v56 = vadd.f32 %v490_v53, %v489_v52 }
 0x10a   : > { %v438_v57 = vadd.f32 %v437_v55, %v436_v51  ;;  %v492_v58 = vrot.slane %v491_v56, 4 }
 0x10c   : > { %v439_v54 = vrot.slane %v438_v57, 2  ;;  %v493_v59 = vadd.f32 %v492_v58, %v491_v56 }
 0x10e   : > { %v440_v60 = vadd.f32 %v439_v54, %v438_v57  ;;  %v494_v61 = vrot.slane %v493_v59, 2 }
 0x110   : > { %v441_v63 = vrot.slane %v440_v60, 1  ;;  %v495_v0 = vadd.f32 %v494_v61, %v493_v59 }
 0x112   : > { %v442_v62 = vadd.f32 %v441_v63, %v440_v60  ;;  %v496_v1 = vrot.slane %v495_v0, 1 }
 0x114   : > { %444 = vst.msk [vmem:[%s214_s29] sm:$0x1] %vm443_vm3, %v442_v62  ;;  %v497_v2 = vadd.f32 %v496_v1, %v495_v0 }
 0x116   : > { %498 = vst.msk [vmem:[%s217_s6] sm:$0x1] %vm443_vm3, %v497_v2 }
 0x117 PF: > { %s15_s15 = sadd.s32 1, %s798_s15  }
 0x118   : > { %p12_p5 = scmp.ge.s32.totalorder %s15_s15, 6  }
 0x11a   :  { %14 = sbr.rel (!%p12_p5) target bundleno = 1 (0x1), region = 82 }

// kernel: bottleneck_forward.6
= control target key start
LH: loop header
LB: loop body
LE: loop exit
PB: predicated region body
PF: predicated region fallthrough
CT: control target
= control target key end

     0   :  { %s957_s21 = smov 0   ;;  %s1128_s0 = inlined_call_operand.vmem [shape: bf16[512,4], index: 0, kind: input, shape index: {}]   ;;  %s1129_s1 = inlined_call_operand.vmem [shape: f32[1,4], index: 1, kind: input, shape index: {}]   ;;  %s1130_s2 = inlined_call_operand.vmem [shape: f32[1,4], index: 2, kind: input, shape index: {}]   ;;  %s1131_s3 = inlined_call_operand.vmem [shape: bf16[4,16], index: 3, kind: input, shape index: {}]   ;;  %s1132_s4 = inlined_call_operand.vmem [shape: bf16[512,16], index: 4, kind: output, shape index: {0}]   ;;  %s1133_s5 = inlined_call_operand.vmem [shape: f32[4,1,16], index: 5, kind: output, shape index: {1}]   ;;  %s1134_s6 = inlined_call_operand.vmem [shape: f32[4,1,16], index: 6, kind: output, shape index: {2}]  }
   0x1 LB: > { %s963_s22 = sadd.s32 4294967295, %s920_s21   ;;  %p787_p0 = scmp.ge.s32.totalorder %s920_s21, 1  ;;  %s920_s21 = sphi %s957_s21, %s17_s21  }
   0x2   : > { %p218_p1 = scmp.lt.s32.totalorder %s920_s21, 5 }
   0x4   : > { %p219_p2 = pnand %p787_p0, %p218_p1 }
   0x5   : > { %v375_v0 = vld [vmem:[%s1131_s3] sm:$0x3] (!%p219_p2)  ;;  %vm401_vm0 = vcmask (!%p219_p2), 1041408   ;;  %s788_s25 = sshll.u32 (!%p219_p2), %s963_s22, 4  ;;  %vm376_vm1 = vcmask (!%p219_p2), 31744   ;;  %vm660_vm2 = vcmask (!%p219_p2), 125952  }
   0x6   : > { %222 = sbr.rel (%p219_p2) target bundleno = 289 (0x121), region = 36  ;;  %904 = vmatprep.subr.msk.bf16.mxu0 (!%p219_p2), %vm401_vm0, %v375_v0  ;;  %v403_v1 = vsel (!%p219_p2), %vm401_vm0, %v375_v0, 0  ;;  %p255_p3 = scmp.lt.s32.totalorder (!%p219_p2), %s788_s25, 63  ;;  %905 = vmatprep.subr.msk.bf16.mxu1 (!%p219_p2), %vm401_vm0, %v375_v0  ;;  %v984_v2 = vld [vmem:[%s1129_s1] ss:$0 sm:$0xff] (!%p219_p2)  ;;  %vm502_vm3 = vcmask (!%p219_p2), 130048  }
   0x7   : > { %885 = vmatpush3.bf16.msra.mxu0 (!%p219_p2), %v403_v1  ;;  %903 = vmatpush3.bf16.msra.mxu1 (!%p219_p2), %v403_v1  ;;  %v993_v11 = vld [vmem:[%s1130_s2] ss:$0 sm:$0xff] (!%p219_p2)  ;;  %p266_p4 = scmp.lt.s32.totalorder (!%p219_p2), %s963_s22, 3  ;;  %vm540_vm4 = vcmask (!%p219_p2), 122880  }
   0xd   : > { %s1136_s25 = smov (!%p255_p3, %s788_s25), 63  ;;  %s1138_s22 = smov (!%p266_p4, %s963_s22), 3 }
   0xe   : > { %s789_s26 = sshll.u32 %s1136_s25, 2  ;;  %s268_s15 = scalar_lea.vmem %s1133_s5, %s1138_s22 }
   0xf   : > { %s979_s29 = scalar_lea.vmem %s1128_s0, %s789_s26  ;;  %s1044_s12 = scalar_lea.vmem %s1132_s4, %s789_s26 }
  0x10   : > { %v837_v3 = vld [vmem:[%s979_s29] sm:$0xff]   ;;  %v868_v4 = vld [vmem:[%s979_s29 + $0x8] sm:$0xff]   ;;  %v869_v5 = vld [vmem:[%s979_s29 + $0x10] sm:$0xff]   ;;  %s271_s18 = scalar_lea.vmem %s1134_s6, %s1138_s22 }
  0x11   : > { %v838_v6 = vunpack.c.l.bf16 %v837_v3  ;;  %v839_v7 = vunpack.c.h.bf16 %v837_v3  ;;  %v842_v8 = vunpack.c.l.bf16 %v868_v4  ;;  %v843_v9 = vunpack.c.h.bf16 %v868_v4  ;;  %v870_v10 = vld [vmem:[%s979_s29 + $0x18] sm:$0xff]   ;;  %v871_v32 = vld [vmem:[%s979_s29 + $0x20] sm:$0xff]   ;;  %v872_v37 = vld [vmem:[%s979_s29 + $0x28] sm:$0xff]  }
  0x12   : > { %v846_v12 = vunpack.c.l.bf16 %v869_v5  ;;  %v847_v13 = vunpack.c.h.bf16 %v869_v5  ;;  %v850_v14 = vunpack.c.l.bf16 %v870_v10  ;;  %v851_v15 = vunpack.c.h.bf16 %v870_v10  ;;  %v873_v42 = vld [vmem:[%s979_s29 + $0x30] sm:$0xff]   ;;  %v874_v47 = vld [vmem:[%s979_s29 + $0x38] sm:$0xff]  }
  0x13   : > { %v312_v16 = vmul.f32 %v838_v6, %v984_v2  ;;  %v313_v17 = vmul.f32 %v839_v7, %v984_v2  ;;  %v314_v18 = vmul.f32 %v842_v8, %v984_v2  ;;  %v315_v19 = vmul.f32 %v843_v9, %v984_v2 }
  0x14   : > { %v316_v20 = vmul.f32 %v846_v12, %v984_v2  ;;  %v317_v21 = vmul.f32 %v847_v13, %v984_v2  ;;  %v318_v22 = vmul.f32 %v850_v14, %v984_v2  ;;  %v319_v23 = vmul.f32 %v851_v15, %v984_v2 }
  0x15   : > { %v335_v24 = vadd.f32 %v993_v11, %v312_v16  ;;  %v336_v25 = vadd.f32 %v993_v11, %v313_v17  ;;  %v337_v26 = vadd.f32 %v993_v11, %v314_v18  ;;  %v338_v27 = vadd.f32 %v993_v11, %v315_v19 }
  0x16   : > { %v339_v28 = vadd.f32 %v993_v11, %v316_v20  ;;  %v340_v29 = vadd.f32 %v993_v11, %v317_v21  ;;  %v341_v30 = vadd.f32 %v993_v11, %v318_v22  ;;  %v342_v31 = vadd.f32 %v993_v11, %v319_v23 }
  0x17   : > { %v351_v33 = vmax.f32 %v335_v24, 0.0  ;;  %v352_v34 = vmax.f32 %v336_v25, 0.0  ;;  %v353_v35 = vmax.f32 %v337_v26, 0.0  ;;  %v354_v36 = vmax.f32 %v338_v27, 0.0 }
  0x18   : > { %v355_v38 = vmax.f32 %v339_v28, 0.0  ;;  %v356_v39 = vmax.f32 %v340_v29, 0.0  ;;  %v357_v40 = vmax.f32 %v341_v30, 0.0  ;;  %v358_v41 = vmax.f32 %v342_v31, 0.0 }
  0x19   : > { %v367_v43 = vpack.c.bf16 %v352_v34, %v351_v33  ;;  %v368_v44 = vpack.c.bf16 %v354_v36, %v353_v35  ;;  %v854_v45 = vunpack.c.l.bf16 %v871_v32  ;;  %v855_v46 = vunpack.c.h.bf16 %v871_v32 }
  0x1a   : > { %v369_v48 = vpack.c.bf16 %v356_v39, %v355_v38  ;;  %v370_v49 = vpack.c.bf16 %v358_v41, %v357_v40  ;;  %v858_v50 = vunpack.c.l.bf16 %v872_v37  ;;  %v859_v51 = vunpack.c.h.bf16 %v872_v37 }
  0x1b   : > { %886 = vmatprep.mubr.msk.bf16.mxu0 %vm376_vm1, %v367_v43  ;;  %v320_v52 = vmul.f32 %v854_v45, %v984_v2  ;;  %v321_v53 = vmul.f32 %v855_v46, %v984_v2  ;;  %v862_v54 = vunpack.c.l.bf16 %v873_v42  ;;  %v863_v55 = vunpack.c.h.bf16 %v873_v42 }
  0x1c   : > { %887 = vmatmul.mubr.msk.bf16.vlgmr.msra.gmra.mrb[0].mxu0 %vm376_vm1, %v368_v44  ;;  %v322_v56 = vmul.f32 %v858_v50, %v984_v2  ;;  %v323_v57 = vmul.f32 %v859_v51, %v984_v2  ;;  %v866_v58 = vunpack.c.l.bf16 %v874_v47  ;;  %v867_v59 = vunpack.c.h.bf16 %v874_v47 }
  0x1d   : > { %890 = vmatprep.mubr.msk.bf16.mxu0 %vm376_vm1, %v369_v48  ;;  %v343_v60 = vadd.f32 %v993_v11, %v320_v52  ;;  %v344_v61 = vadd.f32 %v993_v11, %v321_v53  ;;  %v324_v62 = vmul.f32 %v862_v54, %v984_v2  ;;  %v325_v63 = vmul.f32 %v863_v55, %v984_v2 }
  0x1e   : > { %v345_v0 = vadd.f32 %v993_v11, %v322_v56  ;;  %v346_v1 = vadd.f32 %v993_v11, %v323_v57  ;;  %v326_v3 = vmul.f32 %v866_v58, %v984_v2  ;;  %v327_v4 = vmul.f32 %v867_v59, %v984_v2 }
  0x1f   : > { %v359_v5 = vmax.f32 %v343_v60, 0.0  ;;  %v360_v6 = vmax.f32 %v344_v61, 0.0  ;;  %v347_v7 = vadd.f32 %v993_v11, %v324_v62  ;;  %v348_v8 = vadd.f32 %v993_v11, %v325_v63 }
  0x20   : > { %v361_v9 = vmax.f32 %v345_v0, 0.0  ;;  %v362_v10 = vmax.f32 %v346_v1, 0.0  ;;  %v349_v12 = vadd.f32 %v993_v11, %v326_v3  ;;  %v350_v13 = vadd.f32 %v993_v11, %v327_v4 }
  0x21   : > { %v371_v14 = vpack.c.bf16 %v360_v6, %v359_v5  ;;  %v363_v15 = vmax.f32 %v347_v7, 0.0  ;;  %v364_v16 = vmax.f32 %v348_v8, 0.0 }
  0x22   : > { %v372_v17 = vpack.c.bf16 %v362_v10, %v361_v9  ;;  %v365_v18 = vmax.f32 %v349_v12, 0.0  ;;  %v366_v19 = vmax.f32 %v350_v13, 0.0 }
  0x23   : > { %894 = vmatprep.mubr.msk.bf16.mxu1 %vm376_vm1, %v371_v14  ;;  %v373_v2 = vpack.c.bf16 %v364_v16, %v363_v15 }
  0x24   : > { %891 = vmatmul.mubr.msk.bf16.gmra.mrb[4].mxu0 %vm376_vm1, %v370_v49  ;;  %895 = vmatmul.mubr.msk.bf16.vlgmr.msra.gmra.mrb[0].mxu1 %vm376_vm1, %v372_v17  ;;  %v374_v20 = vpack.c.bf16 %v366_v19, %v365_v18 }
  0x25   : > { %898 = vmatprep.mubr.msk.bf16.mxu1 %vm376_vm1, %v373_v2 }
  0x2c   : > { %899 = vmatmul.mubr.msk.bf16.gmra.mrb[4].mxu1 %vm376_vm1, %v374_v20 }
  0xef   : > { %v888_v11 = vpop.f32.mrb[0].mxu0 }
  0xf0   : > { %v822_v21 = vpack.c.bf16 %v888_v11, %v888_v11  ;;  %v439_v22 = vpop.f32.mrb[1].mxu0  ;;  %v544_v26 = vmul.f32 %v888_v11, %v888_v11  ;;  %v506_v35 = vsel %vm502_vm3, %v888_v11, 0.0 }
  0xf1   : > { %v542_v23 = vmul.f32 %v439_v22, %v439_v22  ;;  %v820_v24 = vpack.c.bf16 %v439_v22, %v439_v22  ;;  %v889_v25 = vpop.f32.mrb[2].mxu0  ;;  %v503_v29 = vsel %vm502_vm3, %v439_v22, 0.0 }
  0xf2   : > { %663 = vst.msk [vmem:[%s1044_s12 + $0x8] sm:$0xf] %vm660_vm2, %v822_v21  ;;  %v823_v27 = vpack.c.bf16 %v889_v25, %v889_v25  ;;  %v442_v28 = vpop.f32.mrb[3].mxu0  ;;  %v545_v33 = vmul.f32 %v889_v25, %v889_v25  ;;  %v561_v40 = vsel %vm502_vm3, %v544_v26, 0.0  ;;  %v508_v43 = vsel %vm502_vm3, %v889_v25, 0.0 }
  0xf3   : > { %661 = vst.msk [vmem:[%s1044_s12] sm:$0xf] %vm660_vm2, %v820_v24  ;;  %v504_v30 = vsel %vm502_vm3, %v442_v28, 0.0  ;;  %v543_v31 = vmul.f32 %v442_v28, %v442_v28  ;;  %v821_v32 = vpack.c.bf16 %v442_v28, %v442_v28  ;;  %v558_v36 = vsel %vm502_vm3, %v542_v23, 0.0 }
  0xf4   : > { %664 = vst.msk [vmem:[%s1044_s12 + $0xc] sm:$0xf] %vm660_vm2, %v823_v27  ;;  %v505_v34 = vadd.f32 %v504_v30, %v503_v29  ;;  %v563_v44 = vsel %vm502_vm3, %v545_v33, 0.0 }
  0xf5   : > { %v559_v37 = vsel %vm502_vm3, %v543_v31, 0.0  ;;  %662 = vst.msk [vmem:[%s1044_s12 + $0x4] sm:$0xf] %vm660_vm2, %v821_v32 }
  0xf6   : > { %v507_v38 = vadd.f32 %v506_v35, %v505_v34  ;;  %v560_v39 = vadd.f32 %v559_v37, %v558_v36 }
  0xf7   : > { %v892_v41 = vpop.f32.mrb[4].mxu0  ;;  %v896_v42 = vpop.f32.mrb[0].mxu1 }
  0xf8   : > { %v562_v45 = vadd.f32 %v561_v40, %v560_v39  ;;  %v826_v46 = vpack.c.bf16 %v892_v41, %v892_v41  ;;  %v455_v47 = vpop.f32.mrb[5].mxu0  ;;  %v471_v48 = vpop.f32.mrb[1].mxu1  ;;  %v509_v49 = vadd.f32 %v508_v43, %v507_v38  ;;  %v548_v62 = vmul.f32 %v892_v41, %v892_v41 }
  0xf9   : > { %v510_v50 = vsel %vm502_vm3, %v455_v47, 0.0  ;;  %v546_v51 = vmul.f32 %v455_v47, %v455_v47  ;;  %v824_v52 = vpack.c.bf16 %v455_v47, %v455_v47  ;;  %v893_v53 = vpop.f32.mrb[6].mxu0  ;;  %v1063_v54 = vpop.f32.mrb[2].mxu1  ;;  %v514_v3 = vsel %vm502_vm3, %v892_v41, 0.0 }
  0xfa   : > { %667 = vst.msk [vmem:[%s1044_s12 + $0x18] sm:$0xf] %vm660_vm2, %v826_v46  ;;  %v564_v55 = vadd.f32 %v563_v44, %v562_v45  ;;  %v458_v56 = vpop.f32.mrb[7].mxu0  ;;  %v474_v57 = vpop.f32.mrb[3].mxu1  ;;  %v511_v58 = vadd.f32 %v510_v50, %v509_v49  ;;  %v827_v60 = vpack.c.bf16 %v893_v53, %v893_v53  ;;  %v830_v5 = vpack.c.bf16 %v896_v42, %v896_v42 }
  0xfb   : > { %v565_v59 = vsel %vm502_vm3, %v546_v51, 0.0  ;;  %665 = vst.msk [vmem:[%s1044_s12 + $0x10] sm:$0xf] %vm660_vm2, %v824_v52  ;;  %v512_v61 = vsel %vm502_vm3, %v458_v56, 0.0  ;;  %v547_v0 = vmul.f32 %v458_v56, %v458_v56  ;;  %v825_v1 = vpack.c.bf16 %v458_v56, %v458_v56 }
  0xfc   : > { %v566_v63 = vadd.f32 %v565_v59, %v564_v55  ;;  %668 = vst.msk [vmem:[%s1044_s12 + $0x1c] sm:$0xf] %vm660_vm2, %v827_v60  ;;  %v513_v4 = vadd.f32 %v512_v61, %v511_v58  ;;  %v549_v6 = vmul.f32 %v893_v53, %v893_v53  ;;  %v550_v8 = vmul.f32 %v471_v48, %v471_v48 }
  0xfd   : > { %v567_v7 = vsel %vm502_vm3, %v547_v0, 0.0  ;;  %666 = vst.msk [vmem:[%s1044_s12 + $0x14] sm:$0xf] %vm660_vm2, %v825_v1  ;;  %v828_v9 = vpack.c.bf16 %v471_v48, %v471_v48  ;;  %671 = vst.msk [vmem:[%s1044_s12 + $0x28] sm:$0xf] %vm660_vm2, %v830_v5  ;;  %v569_v14 = vsel %vm502_vm3, %v548_v62, 0.0  ;;  %v831_v17 = vpack.c.bf16 %v1063_v54, %v1063_v54 }
  0xfe   : > { %v515_v10 = vadd.f32 %v514_v3, %v513_v4  ;;  %v568_v12 = vadd.f32 %v567_v7, %v566_v63  ;;  %v516_v15 = vsel %vm502_vm3, %v893_v53, 0.0  ;;  %v518_v16 = vsel %vm502_vm3, %v471_v48, 0.0 }
  0xff   : > { %v900_v13 = vpop.f32.mrb[4].mxu1  ;;  %669 = vst.msk [vmem:[%s1044_s12 + $0x20] sm:$0xf] %vm660_vm2, %v828_v9  ;;  %v829_v20 = vpack.c.bf16 %v474_v57, %v474_v57  ;;  %v571_v21 = vsel %vm502_vm3, %v549_v6, 0.0  ;;  %v573_v22 = vsel %vm502_vm3, %v550_v8, 0.0  ;;  %v551_v23 = vmul.f32 %v474_v57, %v474_v57 }
 0x100   : > { %v487_v2 = vpop.f32.mrb[5].mxu1  ;;  %v570_v18 = vadd.f32 %v569_v14, %v568_v12  ;;  %v517_v19 = vadd.f32 %v516_v15, %v515_v10  ;;  %672 = vst.msk [vmem:[%s1044_s12 + $0x2c] sm:$0xf] %vm660_vm2, %v831_v17  ;;  %v834_v24 = vpack.c.bf16 %v900_v13, %v900_v13  ;;  %v552_v28 = vmul.f32 %v896_v42, %v896_v42 }
 0x101   : > { %v901_v11 = vpop.f32.mrb[6].mxu1  ;;  %670 = vst.msk [vmem:[%s1044_s12 + $0x24] sm:$0xf] %vm660_vm2, %v829_v20  ;;  %v520_v29 = vsel %vm502_vm3, %v474_v57, 0.0  ;;  %v832_v30 = vpack.c.bf16 %v487_v2, %v487_v2  ;;  %v522_v31 = vsel %vm502_vm3, %v896_v42, 0.0  ;;  %v553_v35 = vmul.f32 %v1063_v54, %v1063_v54 }
 0x102   : > { %v490_v25 = vpop.f32.mrb[7].mxu1  ;;  %v519_v26 = vadd.f32 %v518_v16, %v517_v19  ;;  %v572_v27 = vadd.f32 %v571_v21, %v570_v18  ;;  %675 = vst.msk [vmem:[%s1044_s12 + $0x38] sm:$0xf] %vm660_vm2, %v834_v24  ;;  %v835_v34 = vpack.c.bf16 %v901_v11, %v901_v11  ;;  %v575_v36 = vsel %vm502_vm3, %v551_v23, 0.0 }
 0x103   : > { %v554_v37 = vmul.f32 %v487_v2, %v487_v2  ;;  %673 = vst.msk [vmem:[%s1044_s12 + $0x30] sm:$0xf] %vm660_vm2, %v832_v30  ;;  %v833_v38 = vpack.c.bf16 %v490_v25, %v490_v25  ;;  %v577_v41 = vsel %vm502_vm3, %v552_v28, 0.0  ;;  %v524_v42 = vsel %vm502_vm3, %v1063_v54, 0.0 }
 0x104   : > { %v574_v32 = vadd.f32 %v573_v22, %v572_v27  ;;  %v521_v33 = vadd.f32 %v520_v29, %v519_v26  ;;  %676 = vst.msk [vmem:[%s1044_s12 + $0x3c] sm:$0xf] %vm660_vm2, %v835_v34  ;;  %v526_v43 = vsel %vm502_vm3, %v487_v2, 0.0  ;;  %v579_v46 = vsel %vm502_vm3, %v553_v35, 0.0 }
 0x105   : > { %674 = vst.msk [vmem:[%s1044_s12 + $0x34] sm:$0xf] %vm660_vm2, %v833_v38  ;;  %v581_v47 = vsel %vm502_vm3, %v554_v37, 0.0  ;;  %v555_v48 = vmul.f32 %v490_v25, %v490_v25  ;;  %v556_v51 = vmul.f32 %v900_v13, %v900_v13  ;;  %v528_v52 = vsel %vm502_vm3, %v490_v25, 0.0 }
 0x106   : > { %v523_v39 = vadd.f32 %v522_v31, %v521_v33  ;;  %v576_v40 = vadd.f32 %v575_v36, %v574_v32  ;;  %v530_v54 = vsel %vm502_vm3, %v900_v13, 0.0  ;;  %v557_v56 = vmul.f32 %v901_v11, %v901_v11 }
 0x107   : > { %v583_v57 = vsel %vm502_vm3, %v555_v48, 0.0  ;;  %v585_v60 = vsel %vm502_vm3, %v556_v51, 0.0  ;;  %v532_v61 = vsel %vm502_vm3, %v901_v11, 0.0 }
 0x108   : > { %v578_v44 = vadd.f32 %v577_v41, %v576_v40  ;;  %v525_v45 = vadd.f32 %v524_v42, %v523_v39  ;;  %v587_v0 = vsel %vm502_vm3, %v557_v56, 0.0 }
 0x10a   : > { %v527_v49 = vadd.f32 %v526_v43, %v525_v45  ;;  %v580_v50 = vadd.f32 %v579_v46, %v578_v44 }
 0x10c   : > { %v582_v53 = vadd.f32 %v581_v47, %v580_v50  ;;  %v529_v55 = vadd.f32 %v528_v52, %v527_v49 }
 0x10e   : > { %v531_v58 = vadd.f32 %v530_v54, %v529_v55  ;;  %v584_v59 = vadd.f32 %v583_v57, %v582_v53 }
 0x110   : > { %v533_v62 = vadd.f32 %v532_v61, %v531_v58  ;;  %v586_v63 = vadd.f32 %v585_v60, %v584_v59 }
 0x112   : > { %v534_v1 = vrot.slane %v533_v62, 4  ;;  %v588_v3 = vadd.f32 %v587_v0, %v586_v63 }
 0x114   : > { %v535_v4 = vadd.f32 %v534_v1, %v533_v62  ;;  %v589_v5 = vrot.slane %v588_v3, 4 }
 0x116   : > { %v536_v6 = vrot.slane %v535_v4, 2  ;;  %v590_v7 = vadd.f32 %v589_v5, %v588_v3 }
 0x118   : > { %v537_v8 = vadd.f32 %v536_v6, %v535_v4  ;;  %v591_v9 = vrot.slane %v590_v7, 2 }
 0x11a   : > { %v538_v10 = vrot.slane %v537_v8, 1  ;;  %v592_v12 = vadd.f32 %v591_v9, %v590_v7 }
 0x11c   : > { %v539_v13 = vadd.f32 %v538_v10, %v537_v8  ;;  %v593_v14 = vrot.slane %v592_v12, 1 }
 0x11e   : > { %541 = vst.msk [vmem:[%s268_s15] sm:$0x1] %vm540_vm4, %v539_v13  ;;  %v594_v15 = vadd.f32 %v593_v14, %v592_v12 }
 0x120   : > { %595 = vst.msk [vmem:[%s271_s18] sm:$0x1] %vm540_vm4, %v594_v15 }
 0x121 PF: > { %s17_s21 = sadd.s32 1, %s920_s21  }
 0x122   : > { %p14_p5 = scmp.ge.s32.totalorder %s17_s21, 6  }
 0x124   :  { %16 = sbr.rel (!%p14_p5) target bundleno = 1 (0x1), region = 90 }

// kernel: bottleneck_forward.7
= control target key start
LH: loop header
LB: loop body
LE: loop exit
PB: predicated region body
PF: predicated region fallthrough
CT: control target
= control target key end

     0   :  { %s584_s15 = smov 0   ;;  %s704_s0 = inlined_call_operand.vmem [shape: bf16[512,16], index: 0, kind: input, shape index: {}]   ;;  %s705_s1 = inlined_call_operand.vmem [shape: bf16[512,16], index: 1, kind: input, shape index: {}]   ;;  %s706_s2 = inlined_call_operand.vmem [shape: f32[1,16], index: 2, kind: input, shape index: {}]   ;;  %s707_s3 = inlined_call_operand.vmem [shape: f32[1,16], index: 3, kind: input, shape index: {}]   ;;  %s708_s4 = inlined_call_operand.vmem [shape: f32[512,16], index: 4, kind: output, shape index: {}]  }
   0x1 LB: > { %s450_s16 = sadd.s32 4294967295, %s557_s15   ;;  %p454_p0 = scmp.ge.s32.totalorder %s557_s15, 1  ;;  %s557_s15 = sphi %s584_s15, %s14_s15  }
   0x2   : > { %p174_p1 = scmp.lt.s32.totalorder %s557_s15, 5 }
   0x4   : > { %p175_p2 = pnand %p454_p0, %p174_p1 }
   0x5   : > { %s455_s17 = sshll.u32 (!%p175_p2), %s450_s16, 4  ;;  %v608_v0 = vld [vmem:[%s706_s2] ss:$0 sm:$0xff] (!%p175_p2)  ;;  %vm365_vm0 = vcmask (!%p175_p2), 130048  }
   0x6   : > { %178 = sbr.rel (%p175_p2) target bundleno = 48 (0x30), region = 36  ;;  %p206_p3 = scmp.lt.s32.totalorder (!%p175_p2), %s455_s17, 63  ;;  %v619_v11 = vld [vmem:[%s707_s3] ss:$0 sm:$0xff] (!%p175_p2) }
   0xd   : > { %s710_s17 = smov (!%p206_p3, %s455_s17), 63 }
   0xe   : > { %s456_s18 = sshll.u32 %s710_s17, 2  ;;  %s460_s29 = sshll.u32 %s710_s17, 3 }
   0xf   : > { %s598_s21 = scalar_lea.vmem %s704_s0, %s456_s18  ;;  %s603_s24 = scalar_lea.vmem %s705_s1, %s456_s18 }
  0x10   : > { %v466_v1 = vld [vmem:[%s598_s21] sm:$0xff]   ;;  %v529_v3 = vld [vmem:[%s598_s21 + $0x8] sm:$0xff]   ;;  %v530_v9 = vld [vmem:[%s598_s21 + $0x10] sm:$0xff]   ;;  %s639_s6 = scalar_lea.vmem %s708_s4, %s460_s29 }
  0x11   : > { %v498_v2 = vld [vmem:[%s603_s24] sm:$0xff]   ;;  %v467_v4 = vunpack.c.l.bf16 %v466_v1  ;;  %v468_v6 = vunpack.c.h.bf16 %v466_v1  ;;  %v536_v8 = vld [vmem:[%s603_s24 + $0x8] sm:$0xff]   ;;  %v537_v10 = vld [vmem:[%s603_s24 + $0x10] sm:$0xff]   ;;  %v471_v12 = vunpack.c.l.bf16 %v529_v3  ;;  %v472_v14 = vunpack.c.h.bf16 %v529_v3 }
  0x12   : > { %v499_v5 = vunpack.c.l.bf16 %v498_v2  ;;  %v500_v7 = vunpack.c.h.bf16 %v498_v2  ;;  %v503_v13 = vunpack.c.l.bf16 %v536_v8  ;;  %v504_v15 = vunpack.c.h.bf16 %v536_v8  ;;  %v531_v16 = vld [vmem:[%s598_s21 + $0x18] sm:$0xff]   ;;  %v532_v42 = vld [vmem:[%s598_s21 + $0x20] sm:$0xff]   ;;  %v533_v52 = vld [vmem:[%s598_s21 + $0x28] sm:$0xff]  }
  0x13   : > { %v262_v17 = vmul.f32 %v467_v4, %v608_v0  ;;  %v263_v18 = vmul.f32 %v468_v6, %v608_v0  ;;  %v475_v19 = vunpack.c.l.bf16 %v530_v9  ;;  %v507_v20 = vunpack.c.l.bf16 %v537_v10  ;;  %v538_v21 = vld [vmem:[%s603_s24 + $0x18] sm:$0xff]   ;;  %v539_v47 = vld [vmem:[%s603_s24 + $0x20] sm:$0xff]   ;;  %v540_v57 = vld [vmem:[%s603_s24 + $0x28] sm:$0xff]  }
  0x14   : > { %v264_v22 = vmul.f32 %v471_v12, %v608_v0  ;;  %v265_v23 = vmul.f32 %v472_v14, %v608_v0  ;;  %v476_v24 = vunpack.c.h.bf16 %v530_v9  ;;  %v508_v25 = vunpack.c.h.bf16 %v537_v10  ;;  %v534_v62 = vld [vmem:[%s598_s21 + $0x30] sm:$0xff]   ;;  %v535_v14 = vld [vmem:[%s598_s21 + $0x38] sm:$0xff]  }
  0x15   : > { %v285_v26 = vadd.f32 %v619_v11, %v262_v17  ;;  %v286_v27 = vadd.f32 %v619_v11, %v263_v18  ;;  %v266_v28 = vmul.f32 %v475_v19, %v608_v0  ;;  %v479_v29 = vunpack.c.l.bf16 %v531_v16  ;;  %v541_v4 = vld [vmem:[%s603_s24 + $0x30] sm:$0xff]  }
  0x16   : > { %v287_v30 = vadd.f32 %v619_v11, %v264_v22  ;;  %v288_v31 = vadd.f32 %v619_v11, %v265_v23  ;;  %v267_v32 = vmul.f32 %v476_v24, %v608_v0  ;;  %v511_v33 = vunpack.c.l.bf16 %v538_v21  ;;  %v542_v23 = vld [vmem:[%s603_s24 + $0x38] sm:$0xff]  }
  0x17   : > { %v333_v34 = vadd.f32 %v499_v5, %v285_v26  ;;  %v334_v35 = vadd.f32 %v500_v7, %v286_v27  ;;  %v289_v36 = vadd.f32 %v619_v11, %v266_v28  ;;  %v268_v37 = vmul.f32 %v479_v29, %v608_v0 }
  0x18   : > { %v335_v38 = vadd.f32 %v503_v13, %v287_v30  ;;  %v336_v39 = vadd.f32 %v504_v15, %v288_v31  ;;  %v290_v40 = vadd.f32 %v619_v11, %v267_v32  ;;  %v480_v41 = vunpack.c.h.bf16 %v531_v16 }
  0x19   : > { %v349_v43 = vmax.f32 %v333_v34, 0.0  ;;  %v350_v44 = vmax.f32 %v334_v35, 0.0  ;;  %v337_v45 = vadd.f32 %v507_v20, %v289_v36  ;;  %v291_v46 = vadd.f32 %v619_v11, %v268_v37 }
  0x1a   : > { %v351_v48 = vmax.f32 %v335_v38, 0.0  ;;  %v352_v49 = vmax.f32 %v336_v39, 0.0  ;;  %v338_v50 = vadd.f32 %v508_v25, %v290_v40  ;;  %v269_v51 = vmul.f32 %v480_v41, %v608_v0 }
  0x1b   : > { %366 = vst.msk [vmem:[%s639_s6] sm:$0xff] %vm365_vm0, %v349_v43  ;;  %367 = vst.msk [vmem:[%s639_s6 + $0x8] sm:$0xff] %vm365_vm0, %v350_v44  ;;  %v353_v53 = vmax.f32 %v337_v45, 0.0  ;;  %v339_v54 = vadd.f32 %v511_v33, %v291_v46  ;;  %v512_v55 = vunpack.c.h.bf16 %v538_v21  ;;  %v483_v56 = vunpack.c.l.bf16 %v532_v42 }
  0x1c   : > { %368 = vst.msk [vmem:[%s639_s6 + $0x10] sm:$0xff] %vm365_vm0, %v351_v48  ;;  %369 = vst.msk [vmem:[%s639_s6 + $0x18] sm:$0xff] %vm365_vm0, %v352_v49  ;;  %v354_v58 = vmax.f32 %v338_v50, 0.0  ;;  %v292_v59 = vadd.f32 %v619_v11, %v269_v51  ;;  %v515_v60 = vunpack.c.l.bf16 %v539_v47  ;;  %v484_v61 = vunpack.c.h.bf16 %v532_v42 }
  0x1d   : > { %370 = vst.msk [vmem:[%s639_s6 + $0x20] sm:$0xff] %vm365_vm0, %v353_v53  ;;  %v355_v63 = vmax.f32 %v339_v54, 0.0  ;;  %v270_v1 = vmul.f32 %v483_v56, %v608_v0  ;;  %v516_v2 = vunpack.c.h.bf16 %v539_v47  ;;  %v487_v3 = vunpack.c.l.bf16 %v533_v52 }
  0x1e   : > { %371 = vst.msk [vmem:[%s639_s6 + $0x28] sm:$0xff] %vm365_vm0, %v354_v58  ;;  %v340_v5 = vadd.f32 %v512_v55, %v292_v59  ;;  %v271_v6 = vmul.f32 %v484_v61, %v608_v0  ;;  %v519_v7 = vunpack.c.l.bf16 %v540_v57  ;;  %v488_v8 = vunpack.c.h.bf16 %v533_v52 }
  0x1f   : > { %372 = vst.msk [vmem:[%s639_s6 + $0x30] sm:$0xff] %vm365_vm0, %v355_v63  ;;  %v293_v9 = vadd.f32 %v619_v11, %v270_v1  ;;  %v272_v10 = vmul.f32 %v487_v3, %v608_v0  ;;  %v520_v12 = vunpack.c.h.bf16 %v540_v57  ;;  %v491_v13 = vunpack.c.l.bf16 %v534_v62 }
  0x20   : > { %v356_v15 = vmax.f32 %v340_v5, 0.0  ;;  %v294_v16 = vadd.f32 %v619_v11, %v271_v6  ;;  %v273_v17 = vmul.f32 %v488_v8, %v608_v0  ;;  %v523_v18 = vunpack.c.l.bf16 %v541_v4 }
  0x21   : > { %v341_v19 = vadd.f32 %v515_v60, %v293_v9  ;;  %v295_v20 = vadd.f32 %v619_v11, %v272_v10  ;;  %v274_v21 = vmul.f32 %v491_v13, %v608_v0  ;;  %v492_v22 = vunpack.c.h.bf16 %v534_v62 }
  0x22   : > { %373 = vst.msk [vmem:[%s639_s6 + $0x38] sm:$0xff] %vm365_vm0, %v356_v15  ;;  %v342_v24 = vadd.f32 %v516_v2, %v294_v16  ;;  %v296_v25 = vadd.f32 %v619_v11, %v273_v17  ;;  %v524_v26 = vunpack.c.h.bf16 %v541_v4  ;;  %v495_v27 = vunpack.c.l.bf16 %v535_v14 }
  0x23   : > { %v357_v28 = vmax.f32 %v341_v19, 0.0  ;;  %v343_v29 = vadd.f32 %v519_v7, %v295_v20  ;;  %v297_v30 = vadd.f32 %v619_v11, %v274_v21  ;;  %v275_v31 = vmul.f32 %v492_v22, %v608_v0 }
  0x24   : > { %v358_v32 = vmax.f32 %v342_v24, 0.0  ;;  %v344_v33 = vadd.f32 %v520_v12, %v296_v25  ;;  %v276_v34 = vmul.f32 %v495_v27, %v608_v0  ;;  %v527_v35 = vunpack.c.l.bf16 %v542_v23 }
  0x25   : > { %374 = vst.msk [vmem:[%s639_s6 + $0x40] sm:$0xff] %vm365_vm0, %v357_v28  ;;  %v359_v36 = vmax.f32 %v343_v29, 0.0  ;;  %v345_v37 = vadd.f32 %v523_v18, %v297_v30  ;;  %v298_v38 = vadd.f32 %v619_v11, %v275_v31  ;;  %v496_v39 = vunpack.c.h.bf16 %v535_v14 }
  0x26   : > { %375 = vst.msk [vmem:[%s639_s6 + $0x48] sm:$0xff] %vm365_vm0, %v358_v32  ;;  %v360_v40 = vmax.f32 %v344_v33, 0.0  ;;  %v299_v41 = vadd.f32 %v619_v11, %v276_v34  ;;  %v528_v45 = vunpack.c.h.bf16 %v542_v23 }
  0x27   : > { %376 = vst.msk [vmem:[%s639_s6 + $0x50] sm:$0xff] %vm365_vm0, %v359_v36  ;;  %v361_v42 = vmax.f32 %v345_v37, 0.0  ;;  %v346_v43 = vadd.f32 %v524_v26, %v298_v38  ;;  %v277_v44 = vmul.f32 %v496_v39, %v608_v0 }
  0x28   : > { %377 = vst.msk [vmem:[%s639_s6 + $0x58] sm:$0xff] %vm365_vm0, %v360_v40  ;;  %v347_v46 = vadd.f32 %v527_v35, %v299_v41 }
  0x29   : > { %378 = vst.msk [vmem:[%s639_s6 + $0x60] sm:$0xff] %vm365_vm0, %v361_v42  ;;  %v362_v47 = vmax.f32 %v346_v43, 0.0  ;;  %v300_v48 = vadd.f32 %v619_v11, %v277_v44 }
  0x2a   : > { %v363_v49 = vmax.f32 %v347_v46, 0.0 }
  0x2b   : > { %379 = vst.msk [vmem:[%s639_s6 + $0x68] sm:$0xff] %vm365_vm0, %v362_v47  ;;  %v348_v50 = vadd.f32 %v528_v45, %v300_v48 }
  0x2c   : > { %380 = vst.msk [vmem:[%s639_s6 + $0x70] sm:$0xff] %vm365_vm0, %v363_v49 }
  0x2d   : > { %v364_v51 = vmax.f32 %v348_v50, 0.0 }
  0x2f   : > { %381 = vst.msk [vmem:[%s639_s6 + $0x78] sm:$0xff] %vm365_vm0, %v364_v51 }
  0x30 PF: > { %s14_s15 = sadd.s32 1, %s557_s15  }
  0x31   : > { %p11_p4 = scmp.ge.s32.totalorder %s14_s15, 6  }
  0x33   :  { %13 = sbr.rel (!%p11_p4) target bundleno = 1 (0x1), region = 69 }

// kernel: bottleneck_forward.5
= control target key start
LH: loop header
LB: loop body
LE: loop exit
PB: predicated region body
PF: predicated region fallthrough
CT: control target
= control target key end

     0   :  { %s3275_s21 = smov 0   ;;  %s3277_s22 = smov 0   ;;  %s4400_s0 = inlined_call_operand.vmem [shape: bf16[2,256,4], index: 0, kind: input, shape index: {}]   ;;  %s4401_s1 = inlined_call_operand.vmem [shape: f32[1,4], index: 1, kind: input, shape index: {}]   ;;  %s4402_s2 = inlined_call_operand.vmem [shape: f32[1,4], index: 2, kind: input, shape index: {}]   ;;  %s4403_s3 = inlined_call_operand.vmem [shape: bf16[36,4], index: 3, kind: input, shape index: {}]   ;;  %s4404_s4 = inlined_call_operand.vmem [shape: bf16[2,256,4], index: 4, kind: output, shape index: {0}]   ;;  %s4405_s5 = inlined_call_operand.vmem [shape: f32[4,1,4], index: 5, kind: output, shape index: {1}]   ;;  %s4406_s6 = inlined_call_operand.vmem [shape: f32[4,1,4], index: 6, kind: output, shape index: {2}]  }
   0x1   :  { %s3279_s23 = smov 0   ;;  %s3281_s24 = smov 0  }
   0x2   :  { %s3283_s25 = smov 0  }
   0x3 LB: > { %s26_s26 = sadd.s32 1, %s3220_s23  ;;  %s29_s27 = sadd.s32 1, %s3224_s24  ;;  %s3228_s25 = sphi %s3283_s25, %s17_s25   ;;  %s3224_s24 = sphi %s3281_s24, %s4479_s24   ;;  %s3220_s23 = sphi %s3279_s23, %s4478_s23   ;;  %s3216_s22 = sphi %s3277_s22, %s4477_s22   ;;  %s3212_s21 = sphi %s3275_s21, %s4476_s21  }
   0x4   : > { %p27_p0 = scmp.ge.s32.totalorder %s26_s26, 2  ;;  %p2840_p1 = scmp.ge.s32.totalorder %s3228_s25, 1 }
   0x5   : > { %p239_p2 = scmp.lt.s32.totalorder %s3228_s25, 5 }
   0x6   : > { %s4481_s26 = smov (%p27_p0, %s26_s26), 0  ;;  %s4483_s27 = smov (!%p27_p0, %s29_s27), %s3224_s24 }
   0x7   : > { %p240_p3 = pnand %p2840_p1, %p239_p2  ;;  %p31_p4 = scmp.ge.s32.totalorder %s4483_s27, 2 }
   0x8   : > { %vm4407_vm0 = vcmask (!%p240_p3), 24576   ;;  %vm323_vm1 = vsmask.f32 (!%p240_p3), 256  ;;  %v325_v0 = vld [vmem:[#allocation2 + $0x8] sm:$0x1] (!%p240_p3)  ;;  %vm4408_vm2 = vcmask (!%p240_p3), 27648  }
   0x9   : > { %s4485_s27 = smov (%p31_p4, %s4483_s27), 0  ;;  %243 = sbr.rel (%p240_p3) target bundleno = 611 (0x263), region = 36 }
   0xa   : > { %vm3311_vm3 = vmand (!%p240_p3), %vm4407_vm0, %vm323_vm1  ;;  %vm329_vm4 = vsmask.f32 (!%p240_p3), 7938  ;;  %v331_v2 = vld [vmem:[#allocation2 + $0x48] sm:$0xf] (!%p240_p3)  ;;  %s2846_s28 = sshll.u32 (!%p240_p3), %s3216_s22, 1  ;;  %v3230_v5 = vmov (!%p240_p3), 0  }
   0xb   : > { %v326_v3 = vsel (!%p240_p3), %vm3311_vm3, 0, %v325_v0  ;;  %vm3320_vm5 = vmand (!%p240_p3), %vm4408_vm2, %vm329_vm4  ;;  %s299_s30 = sadd.s32 (!%p240_p3), %s3212_s21, %s2846_s28  ;;  %320 = vst.msk [vmem:[#allocation2] sm:$0xf] (!%p240_p3), %vm4408_vm2, %v3230_v5  ;;  %p283_p5 = scmp.lt.s32.totalorder (!%p240_p3), %s3216_s22, 1  ;;  %v3365_v7 = vld [vmem:[%s4401_s1] ss:$0 sm:$0xff] (!%p240_p3) }
   0xc   : > { %327 = vst [vmem:[#allocation2 + $0x8] sm:$0x1] (!%p240_p3), %v326_v3  ;;  %321 = vst.msk [vmem:[#allocation2 + $0x4] sm:$0xf] (!%p240_p3), %vm4408_vm2, %v3230_v5  ;;  %v332_v6 = vsel (!%p240_p3), %vm3320_vm5, 0, %v331_v2  ;;  %p300_p6 = scmp.lt.s32.totalorder (!%p240_p3), %s299_s30, 3 }
   0xd   : > { %334 = vst.msk [vmem:[#allocation2 + $0x4c] sm:$0xf] (!%p240_p3), %vm4408_vm2, %v3230_v5  ;;  %s2843_s7 = sshll.u32 (!%p240_p3), %s3212_s21, 4  ;;  %333 = vst [vmem:[#allocation2 + $0x48] sm:$0xf] (!%p240_p3), %v332_v6  ;;  %s3354_s19 = sshll.u32 (!%p240_p3), %s3212_s21, 7 }
   0xe   : > { %336 = vst.msk [vmem:[#allocation2 + $0x50] sm:$0x1] (!%p240_p3), %vm4407_vm0, %v3230_v5  ;;  %p291_p7 = scmp.lt.s32.totalorder (!%p240_p3), %s2843_s7, 31  ;;  %s337_s28 = sshra.s32 (!%p240_p3), %s3354_s19, 3  ;;  %v3377_v16 = vld [vmem:[%s4402_s2] ss:$0 sm:$0xff] (!%p240_p3) }
   0xf   : > { %s2850_s9 = sshll.u32 (!%p240_p3), %s337_s28, 2  ;;  %vm481_vm6 = vsmask.f32 (!%p240_p3), 4368  ;;  %s4415_s11 = sshll.u32 (!%p240_p3), %s3212_s21, 3 }
  0x10   : > { %s4487_s22 = smov (!%p283_p5, %s3216_s22), 1  ;;  %s4489_s30 = smov (!%p300_p6, %s299_s30), 3  ;;  %vm3399_vm7 = vmor %vm323_vm1, %vm481_vm6 }
  0x11   : > { %s2985_s8 = sshll.u32 %s4487_s22, 7  ;;  %s309_s14 = scalar_lea.vmem %s4406_s6, %s4489_s30 }
  0x12   : > { %s2844_s15 = sshll.u32 %s4487_s22, 5  ;;  %s4491_s7 = smov (!%p291_p7, %s2843_s7), 31 }
  0x13   : > { %s3351_s18 = scalar_lea.vmem %s4400_s0, %s2985_s8  ;;  %s294_s20 = sadd.s32 %s2844_s15, %s4491_s7  ;;  %v643_v3 = vld [vmem:[#allocation2 + $0x8] sm:$0xf] }
  0x14   : > { %s2845_s29 = sshll.u32 %s294_s20, 2  ;;  %s3368_s8 = scalar_lea.vmem %s3351_s18, %s2850_s9 }
  0x15   : > { %s3360_s12 = scalar_lea.vmem %s4404_s4, %s2845_s29  ;;  %v3023_v8 = vld [vmem:[%s3368_s8] sm:$0xff]   ;;  %v3062_v9 = vld [vmem:[%s3368_s8 + $0x8] sm:$0xff]   ;;  %v3063_v10 = vld [vmem:[%s3368_s8 + $0x10] sm:$0xff]   ;;  %p2869_p8 = scmp.le.s32.totalorder %s4415_s11, 0 }
  0x16   : > { %v3024_v11 = vunpack.c.l.bf16 %v3023_v8  ;;  %v3025_v12 = vunpack.c.h.bf16 %v3023_v8  ;;  %v3028_v13 = vunpack.c.l.bf16 %v3062_v9  ;;  %v3029_v14 = vunpack.c.h.bf16 %v3062_v9  ;;  %v3064_v15 = vld [vmem:[%s3368_s8 + $0x18] sm:$0xff]   ;;  %s2870_s15 = sadd.s32 (!%p2869_p8), 4294967280, %s3354_s19 }
  0x17   : > { %v3032_v17 = vunpack.c.l.bf16 %v3063_v10  ;;  %v3033_v18 = vunpack.c.h.bf16 %v3063_v10  ;;  %v3036_v19 = vunpack.c.l.bf16 %v3064_v15  ;;  %v3037_v20 = vunpack.c.h.bf16 %v3064_v15  ;;  %s669_s16 = sshra.s32 (!%p2869_p8), %s2870_s15, 3 }
  0x18   : > { %v379_v21 = vmul.f32 %v3024_v11, %v3365_v7  ;;  %v380_v22 = vmul.f32 %v3025_v12, %v3365_v7  ;;  %v381_v23 = vmul.f32 %v3028_v13, %v3365_v7  ;;  %v382_v24 = vmul.f32 %v3029_v14, %v3365_v7  ;;  %s2871_s17 = sshll.u32 (!%p2869_p8), %s669_s16, 2 }
  0x19   : > { %v383_v25 = vmul.f32 %v3032_v17, %v3365_v7  ;;  %v384_v26 = vmul.f32 %v3033_v18, %v3365_v7  ;;  %v385_v27 = vmul.f32 %v3036_v19, %v3365_v7  ;;  %v386_v28 = vmul.f32 %v3037_v20, %v3365_v7  ;;  %s672_s20 = scalar_lea.vmem (!%p2869_p8), %s3351_s18, %s2871_s17 }
  0x1a   : > { %v401_v29 = vadd.f32 %v3377_v16, %v379_v21  ;;  %v402_v30 = vadd.f32 %v3377_v16, %v380_v22  ;;  %v403_v31 = vadd.f32 %v3377_v16, %v381_v23  ;;  %v404_v32 = vadd.f32 %v3377_v16, %v382_v24  ;;  %v3065_v24 = vld [vmem:[%s3368_s8 + $0x20] sm:$0xff]  }
  0x1b   : > { %v405_v33 = vadd.f32 %v3377_v16, %v383_v25  ;;  %v406_v34 = vadd.f32 %v3377_v16, %v384_v26  ;;  %v407_v35 = vadd.f32 %v3377_v16, %v385_v27  ;;  %v408_v36 = vadd.f32 %v3377_v16, %v386_v28 }
  0x1c   : > { %v417_v37 = vmax.f32 %v401_v29, 0.0  ;;  %v418_v38 = vmax.f32 %v402_v30, 0.0  ;;  %v419_v39 = vmax.f32 %v403_v31, 0.0  ;;  %v420_v40 = vmax.f32 %v404_v32, 0.0  ;;  %v3066_v29 = vld [vmem:[%s3368_s8 + $0x28] sm:$0xff]  }
  0x1d   : > { %v421_v41 = vmax.f32 %v405_v33, 0.0  ;;  %v422_v42 = vmax.f32 %v406_v34, 0.0  ;;  %v423_v43 = vmax.f32 %v407_v35, 0.0  ;;  %v424_v44 = vmax.f32 %v408_v36, 0.0 }
  0x1e   : > { %v2986_v45 = vpack.c.bf16 %v417_v37, %v417_v37  ;;  %v2987_v46 = vpack.c.bf16 %v418_v38, %v418_v38  ;;  %v2988_v47 = vpack.c.bf16 %v419_v39, %v419_v39  ;;  %v2989_v48 = vpack.c.bf16 %v420_v40, %v420_v40  ;;  %v3067_v38 = vld [vmem:[%s3368_s8 + $0x30] sm:$0xff]  }
  0x1f   : > { %v2990_v49 = vpack.c.bf16 %v421_v41, %v421_v41  ;;  %v2991_v50 = vpack.c.bf16 %v422_v42, %v422_v42  ;;  %v2992_v51 = vpack.c.bf16 %v423_v43, %v423_v43  ;;  %v3395_v52 = vpack.c.bf16 %v424_v44, %v424_v44 }
  0x20   : > { %v484_v53 = vshrl.u32 %v2986_v45, 16  ;;  %v487_v54 = vshll.u32 %v2986_v45, 16  ;;  %v492_v55 = vshrl.u32 %v2987_v46, 16  ;;  %v495_v56 = vshll.u32 %v2987_v46, 16 }
  0x21   : > { %v501_v57 = vshrl.u32 %v2988_v47, 16  ;;  %v504_v58 = vshll.u32 %v2988_v47, 16  ;;  %v510_v59 = vshrl.u32 %v2989_v48, 16  ;;  %v513_v60 = vshll.u32 %v2989_v48, 16 }
  0x22   : > { %v486_v61 = vrot.slane %v484_v53, 7  ;;  %v494_v62 = vrot.slane %v492_v55, 7  ;;  %v519_v63 = vshrl.u32 %v2990_v49, 16  ;;  %v522_v0 = vshll.u32 %v2990_v49, 16 }
  0x23   : > { %v503_v6 = vrot.slane %v501_v57, 7  ;;  %v512_v8 = vrot.slane %v510_v59, 7  ;;  %v528_v9 = vshrl.u32 %v2991_v50, 16  ;;  %v531_v10 = vshll.u32 %v2991_v50, 16 }
  0x24   : > { %v489_v11 = vor.u32 %v487_v54, %v486_v61  ;;  %v490_v12 = vrot.slane %v486_v61, 4  ;;  %v497_v13 = vor.u32 %v495_v56, %v494_v62  ;;  %v499_v14 = vrot.slane %v494_v62, 4 }
  0x25   : > { %v506_v15 = vor.u32 %v504_v58, %v503_v6  ;;  %v508_v17 = vrot.slane %v503_v6, 4  ;;  %v515_v18 = vor.u32 %v513_v60, %v512_v8  ;;  %v517_v19 = vrot.slane %v512_v8, 4 }
  0x26   : > { %v644_v20 = vsel %vm3320_vm5, %v489_v11, %v643_v3  ;;  %v498_v21 = vsel %vm3399_vm7, %v490_v12, %v497_v13  ;;  %v521_v22 = vrot.slane %v519_v63, 7  ;;  %v530_v23 = vrot.slane %v528_v9, 7 }
  0x27   : > { %645 = vst [vmem:[#allocation2 + $0x8] sm:$0xf] %v644_v20  ;;  %646 = vst.msk [vmem:[#allocation2 + $0xc] sm:$0xf] %vm4408_vm2, %v498_v21  ;;  %v507_v25 = vsel %vm3399_vm7, %v499_v14, %v506_v15  ;;  %v516_v26 = vsel %vm3399_vm7, %v508_v17, %v515_v18  ;;  %v537_v27 = vshrl.u32 %v2992_v51, 16  ;;  %v540_v28 = vshll.u32 %v2992_v51, 16 }
  0x28   : > { %647 = vst.msk [vmem:[#allocation2 + $0x10] sm:$0xf] %vm4408_vm2, %v507_v25  ;;  %648 = vst.msk [vmem:[#allocation2 + $0x14] sm:$0xf] %vm4408_vm2, %v516_v26  ;;  %v524_v30 = vor.u32 %v522_v0, %v521_v22  ;;  %v526_v31 = vrot.slane %v521_v22, 4  ;;  %v533_v32 = vor.u32 %v531_v10, %v530_v23  ;;  %v535_v33 = vrot.slane %v530_v23, 4 }
  0x29   : > { %v539_v34 = vrot.slane %v537_v27, 7  ;;  %v546_v35 = vshrl.u32 %v3395_v52, 16  ;;  %v549_v36 = vshll.u32 %v3395_v52, 16  ;;  %v3040_v37 = vunpack.c.l.bf16 %v3065_v24  ;;  %v3068_v51 = vld [vmem:[%s3368_s8 + $0x38] sm:$0xff]  }
  0x2a   : > { %v525_v39 = vsel %vm3399_vm7, %v517_v19, %v524_v30  ;;  %v534_v40 = vsel %vm3399_vm7, %v526_v31, %v533_v32  ;;  %v3041_v41 = vunpack.c.h.bf16 %v3065_v24  ;;  %v3044_v42 = vunpack.c.l.bf16 %v3066_v29 }
  0x2b   : > { %649 = vst.msk [vmem:[#allocation2 + $0x18] sm:$0xf] %vm4408_vm2, %v525_v39  ;;  %650 = vst.msk [vmem:[#allocation2 + $0x1c] sm:$0xf] %vm4408_vm2, %v534_v40  ;;  %v542_v43 = vor.u32 %v540_v28, %v539_v34  ;;  %v544_v44 = vrot.slane %v539_v34, 4  ;;  %v548_v45 = vrot.slane %v546_v35, 7  ;;  %v387_v46 = vmul.f32 %v3040_v37, %v3365_v7 }
  0x2c   : > { %v388_v47 = vmul.f32 %v3041_v41, %v3365_v7  ;;  %v389_v48 = vmul.f32 %v3044_v42, %v3365_v7  ;;  %v3045_v49 = vunpack.c.h.bf16 %v3066_v29  ;;  %v3048_v50 = vunpack.c.l.bf16 %v3067_v38 }
  0x2d   : > { %v543_v52 = vsel %vm3399_vm7, %v535_v33, %v542_v43  ;;  %v551_v53 = vor.u32 %v549_v36, %v548_v45  ;;  %v409_v54 = vadd.f32 %v3377_v16, %v387_v46  ;;  %v553_v55 = vrot.slane %v548_v45, 4 }
  0x2e   : > { %651 = vst.msk [vmem:[#allocation2 + $0x20] sm:$0xf] %vm4408_vm2, %v543_v52  ;;  %v410_v56 = vadd.f32 %v3377_v16, %v388_v47  ;;  %v411_v57 = vadd.f32 %v3377_v16, %v389_v48  ;;  %v390_v58 = vmul.f32 %v3045_v49, %v3365_v7  ;;  %v391_v59 = vmul.f32 %v3048_v50, %v3365_v7 }
  0x2f   : > { %v552_v60 = vsel %vm3399_vm7, %v544_v44, %v551_v53  ;;  %v425_v61 = vmax.f32 %v409_v54, 0.0  ;;  %v3049_v62 = vunpack.c.h.bf16 %v3067_v38  ;;  %v3052_v63 = vunpack.c.l.bf16 %v3068_v51 }
  0x30   : > { %652 = vst.msk [vmem:[#allocation2 + $0x24] sm:$0xf] %vm4408_vm2, %v552_v60  ;;  %v426_v0 = vmax.f32 %v410_v56, 0.0  ;;  %v427_v3 = vmax.f32 %v411_v57, 0.0  ;;  %v412_v6 = vadd.f32 %v3377_v16, %v390_v58  ;;  %v413_v8 = vadd.f32 %v3377_v16, %v391_v59 }
  0x31   : > { %v2994_v9 = vpack.c.bf16 %v425_v61, %v425_v61  ;;  %v392_v10 = vmul.f32 %v3049_v62, %v3365_v7  ;;  %v393_v11 = vmul.f32 %v3052_v63, %v3365_v7  ;;  %v3053_v12 = vunpack.c.h.bf16 %v3068_v51 }
  0x32   : > { %v2995_v13 = vpack.c.bf16 %v426_v0, %v426_v0  ;;  %v2996_v14 = vpack.c.bf16 %v427_v3, %v427_v3  ;;  %v428_v15 = vmax.f32 %v412_v6, 0.0  ;;  %v429_v17 = vmax.f32 %v413_v8, 0.0 }
  0x33   : > { %v555_v18 = vshrl.u32 %v2994_v9, 16  ;;  %v558_v19 = vshll.u32 %v2994_v9, 16  ;;  %v414_v20 = vadd.f32 %v3377_v16, %v392_v10  ;;  %v415_v21 = vadd.f32 %v3377_v16, %v393_v11 }
  0x34   : > { %v564_v22 = vshrl.u32 %v2995_v13, 16  ;;  %v567_v23 = vshll.u32 %v2995_v13, 16  ;;  %v573_v24 = vshrl.u32 %v2996_v14, 16  ;;  %v576_v25 = vshll.u32 %v2996_v14, 16 }
  0x35   : > { %v557_v26 = vrot.slane %v555_v18, 7  ;;  %v2997_v27 = vpack.c.bf16 %v428_v15, %v428_v15  ;;  %v2998_v28 = vpack.c.bf16 %v429_v17, %v429_v17  ;;  %v430_v29 = vmax.f32 %v414_v20, 0.0  ;;  %v661_v17 = vld [vmem:[#allocation2 + $0x48] sm:$0x1] }
  0x36   : > { %v566_v30 = vrot.slane %v564_v22, 7  ;;  %v575_v31 = vrot.slane %v573_v24, 7  ;;  %v431_v32 = vmax.f32 %v415_v21, 0.0  ;;  %v394_v33 = vmul.f32 %v3053_v12, %v3365_v7  ;;  %v3055_v22 = vld [vmem:[%s672_s20] sm:$0xff] (!%p2869_p8)  }
  0x37   : > { %v560_v34 = vor.u32 %v558_v19, %v557_v26  ;;  %v562_v35 = vrot.slane %v557_v26, 4  ;;  %v582_v36 = vshrl.u32 %v2997_v27, 16  ;;  %v585_v37 = vshll.u32 %v2997_v27, 16 }
  0x38   : > { %v569_v38 = vor.u32 %v567_v23, %v566_v30  ;;  %v571_v39 = vrot.slane %v566_v30, 4  ;;  %v578_v40 = vor.u32 %v576_v25, %v575_v31  ;;  %v580_v41 = vrot.slane %v575_v31, 4 }
  0x39   : > { %v561_v42 = vsel %vm3399_vm7, %v553_v55, %v560_v34  ;;  %v584_v43 = vrot.slane %v582_v36, 7  ;;  %v591_v44 = vshrl.u32 %v2998_v28, 16  ;;  %v594_v45 = vshll.u32 %v2998_v28, 16 }
  0x3a   : > { %653 = vst.msk [vmem:[#allocation2 + $0x28] sm:$0xf] %vm4408_vm2, %v561_v42  ;;  %v570_v46 = vsel %vm3399_vm7, %v562_v35, %v569_v38  ;;  %v579_v47 = vsel %vm3399_vm7, %v571_v39, %v578_v40  ;;  %v2999_v48 = vpack.c.bf16 %v430_v29, %v430_v29  ;;  %v3000_v49 = vpack.c.bf16 %v431_v32, %v431_v32  ;;  %v709_v39 = vld [vmem:[#allocation2] sm:$0xf] (!%p2869_p8)  ;;  %v713_v40 = vld [vmem:[#allocation2 + $0x8] sm:$0x1] (!%p2869_p8) }
  0x3b   : > { %654 = vst.msk [vmem:[#allocation2 + $0x2c] sm:$0xf] %vm4408_vm2, %v570_v46  ;;  %655 = vst.msk [vmem:[#allocation2 + $0x30] sm:$0xf] %vm4408_vm2, %v579_v47  ;;  %v587_v50 = vor.u32 %v585_v37, %v584_v43  ;;  %v589_v51 = vrot.slane %v584_v43, 4  ;;  %v593_v52 = vrot.slane %v591_v44, 7  ;;  %v416_v53 = vadd.f32 %v3377_v16, %v394_v33 }
  0x3c   : > { %v600_v54 = vshrl.u32 %v2999_v48, 16  ;;  %v603_v55 = vshll.u32 %v2999_v48, 16  ;;  %v609_v56 = vshrl.u32 %v3000_v49, 16  ;;  %v612_v57 = vshll.u32 %v3000_v49, 16 }
  0x3d   : > { %v588_v58 = vsel %vm3399_vm7, %v580_v41, %v587_v50  ;;  %v596_v59 = vor.u32 %v594_v45, %v593_v52  ;;  %v432_v60 = vmax.f32 %v416_v53, 0.0  ;;  %v598_v61 = vrot.slane %v593_v52, 4 }
  0x3e   : > { %656 = vst.msk [vmem:[#allocation2 + $0x34] sm:$0xf] %vm4408_vm2, %v588_v58  ;;  %v602_v62 = vrot.slane %v600_v54, 7  ;;  %v611_v63 = vrot.slane %v609_v56, 7  ;;  %v3056_v23 = vunpack.c.l.bf16 (!%p2869_p8), %v3055_v22  ;;  %v3057_v24 = vunpack.c.h.bf16 (!%p2869_p8), %v3055_v22 }
  0x3f   : > { %v597_v0 = vsel %vm3399_vm7, %v589_v51, %v596_v59  ;;  %v3001_v3 = vpack.c.bf16 %v432_v60, %v432_v60 }
  0x40   : > { %657 = vst.msk [vmem:[#allocation2 + $0x38] sm:$0xf] %vm4408_vm2, %v597_v0  ;;  %v605_v6 = vor.u32 %v603_v55, %v602_v62  ;;  %v607_v8 = vrot.slane %v602_v62, 4  ;;  %v614_v9 = vor.u32 %v612_v57, %v611_v63  ;;  %v616_v14 = vrot.slane %v611_v63, 4 }
  0x41   : > { %v618_v10 = vshrl.u32 %v3001_v3, 16  ;;  %v621_v11 = vshll.u32 %v3001_v3, 16  ;;  %v677_v25 = vmul.f32 (!%p2869_p8), %v3056_v23, %v3365_v7  ;;  %v678_v26 = vmul.f32 (!%p2869_p8), %v3057_v24, %v3365_v7 }
  0x42   : > { %v606_v12 = vsel %vm3399_vm7, %v598_v61, %v605_v6  ;;  %v615_v13 = vsel %vm3399_vm7, %v607_v8, %v614_v9  ;;  %667 = sbr.rel (%p2869_p8) target bundleno = 82 (0x52), region = 40 }
  0x43   : > { %658 = vst.msk [vmem:[#allocation2 + $0x3c] sm:$0xf] %vm4408_vm2, %v606_v12  ;;  %659 = vst.msk [vmem:[#allocation2 + $0x40] sm:$0xf] %vm4408_vm2, %v615_v13  ;;  %v620_v15 = vrot.slane %v618_v10, 7  ;;  %v679_v27 = vadd.f32 (!%p2869_p8), %v3377_v16, %v677_v25  ;;  %v680_v28 = vadd.f32 (!%p2869_p8), %v3377_v16, %v678_v26 }
  0x45   : > { %v623_v18 = vor.u32 %v621_v11, %v620_v15  ;;  %v625_v19 = vrot.slane %v620_v15, 4  ;;  %v681_v29 = vmax.f32 (!%p2869_p8), %v679_v27, 0.0  ;;  %v682_v30 = vmax.f32 (!%p2869_p8), %v680_v28, 0.0 }
  0x47   : > { %v624_v20 = vsel %vm3399_vm7, %v616_v14, %v623_v18  ;;  %v662_v21 = vsel %vm3311_vm3, %v625_v19, %v661_v17  ;;  %v3002_v31 = vpack.c.bf16 (!%p2869_p8), %v681_v29, %v681_v29  ;;  %v3003_v32 = vpack.c.bf16 (!%p2869_p8), %v682_v30, %v682_v30 }
  0x48   : > { %660 = vst.msk [vmem:[#allocation2 + $0x44] sm:$0xf] %vm4408_vm2, %v624_v20  ;;  %663 = vst [vmem:[#allocation2 + $0x48] sm:$0x1] %v662_v21 }
  0x49   : > { %v690_v33 = vshrl.u32 %v3002_v31, 16  ;;  %v693_v34 = vshll.u32 %v3002_v31, 16  ;;  %v698_v35 = vshrl.u32 %v3003_v32, 16  ;;  %v701_v36 = vshll.u32 %v3003_v32, 16 }
  0x4b   : > { %v692_v37 = vrot.slane %v690_v33, 7  ;;  %v700_v38 = vrot.slane %v698_v35, 7 }
  0x4d   : > { %v695_v41 = vor.u32 %v693_v34, %v692_v37  ;;  %v696_v42 = vrot.slane %v692_v37, 4  ;;  %v703_v43 = vor.u32 %v701_v36, %v700_v38  ;;  %v705_v44 = vrot.slane %v700_v38, 4 }
  0x4f   : > { %v710_v45 = vsel %vm3320_vm5, %v695_v41, %v709_v39  ;;  %v704_v46 = vsel %vm3399_vm7, %v696_v42, %v703_v43  ;;  %v714_v47 = vsel %vm3311_vm3, %v705_v44, %v713_v40 }
  0x50   : > { %711 = vst [vmem:[#allocation2] sm:$0xf] %v710_v45  ;;  %712 = vst.msk [vmem:[#allocation2 + $0x4] sm:$0xf] %vm4408_vm2, %v704_v46 }
  0x51   : > { %715 = vst [vmem:[#allocation2 + $0x8] sm:$0x1] %v714_v47 }
  0x52 PF: > { %s4416_s28 = sshll.u32 %s3212_s21, 3 }
  0x53   : > { %s716_s9 = sadd.s32 8, %s4416_s28 }
  0x54   : > { %p2874_p9 = scmp.ge.s32.totalorder %s716_s9, 16 }
  0x55   : > { %s721_s10 = sadd.s32 (!%p2874_p9), 128, %s3354_s19  ;;  %v766_v6 = vld [vmem:[#allocation2 + $0x50] sm:$0x1] (!%p2874_p9) }
  0x56   : > { %720 = sbr.rel (%p2874_p9) target bundleno = 109 (0x6d), region = 44  ;;  %s722_s22 = sshra.s32 (!%p2874_p9), %s721_s10, 3 }
  0x57   : > { %s2875_s13 = sshll.u32 (!%p2874_p9), %s722_s22, 2 }
  0x58   : > { %s725_s8 = scalar_lea.vmem (!%p2874_p9), %s3351_s18, %s2875_s13  ;;  %v762_v3 = vld [vmem:[#allocation2 + $0x48] sm:$0xf] (!%p2874_p9) }
  0x59   : > { %v3059_v48 = vld [vmem:[%s725_s8] sm:$0xff] (!%p2874_p9)  }
  0x5a   : > { %v3060_v49 = vunpack.c.l.bf16 (!%p2874_p9), %v3059_v48  ;;  %v3061_v50 = vunpack.c.h.bf16 (!%p2874_p9), %v3059_v48 }
  0x5c   : > { %v730_v51 = vmul.f32 (!%p2874_p9), %v3060_v49, %v3365_v7  ;;  %v731_v52 = vmul.f32 (!%p2874_p9), %v3061_v50, %v3365_v7 }
  0x5e   : > { %v732_v53 = vadd.f32 %v3377_v16, %v730_v51  ;;  %v733_v54 = vadd.f32 %v3377_v16, %v731_v52 }
  0x60   : > { %v734_v55 = vmax.f32 %v732_v53, 0.0  ;;  %v735_v56 = vmax.f32 %v733_v54, 0.0 }
  0x62   : > { %v3004_v57 = vpack.c.bf16 %v734_v55, %v734_v55  ;;  %v3005_v58 = vpack.c.bf16 %v735_v56, %v735_v56 }
  0x64   : > { %v743_v59 = vshrl.u32 %v3004_v57, 16  ;;  %v746_v60 = vshll.u32 %v3004_v57, 16  ;;  %v751_v61 = vshrl.u32 %v3005_v58, 16  ;;  %v754_v62 = vshll.u32 %v3005_v58, 16 }
  0x66   : > { %v745_v63 = vrot.slane %v743_v59, 7  ;;  %v753_v0 = vrot.slane %v751_v61, 7 }
  0x68   : > { %v748_v8 = vor.u32 %v746_v60, %v745_v63  ;;  %v749_v9 = vrot.slane %v745_v63, 4  ;;  %v756_v10 = vor.u32 %v754_v62, %v753_v0  ;;  %v758_v7 = vrot.slane %v753_v0, 4 }
  0x6a   : > { %v763_v11 = vsel %vm3320_vm5, %v748_v8, %v762_v3  ;;  %v757_v16 = vsel %vm3399_vm7, %v749_v9, %v756_v10  ;;  %v767_v12 = vsel %vm3311_vm3, %v758_v7, %v766_v6 }
  0x6b   : > { %764 = vst [vmem:[#allocation2 + $0x48] sm:$0xf] %v763_v11  ;;  %765 = vst.msk [vmem:[#allocation2 + $0x4c] sm:$0xf] %vm4408_vm2, %v757_v16 }
  0x6c   : > { %768 = vst [vmem:[#allocation2 + $0x50] sm:$0x1] %v767_v12 }
  0x6d PF: > { %v3160_v13 = vld [vmem:[#allocation2] sm:$0xff]   ;;  %v3161_v14 = vld [vmem:[#allocation2 + $0x8] sm:$0xff]   ;;  %vm1207_vm8 = vsmask.f32 7424  ;;  %v3162_v15 = vld [vmem:[#allocation2 + $0x10] sm:$0xff]   ;;  %v769_v17 = vlaneseq  ;;  %s3231_s21 = smov 4   ;;  %s4474_s8 = scalar_lea.vmem %s4405_s5, %s4489_s30 }
  0x6e   : > { %v1209_v18 = vshrl.u32 %v3160_v13, 16  ;;  %v1211_v19 = vshll.u32 %v3160_v13, 16  ;;  %v1216_v4 = vshll.u32 %v3161_v14, 16  ;;  %v3504_v20 = vld [vmem:[#allocation2 + $0x18] sm:$0xff]   ;;  %v1741_v2 = vshll.u32 %v3162_v15, 16  ;;  %v3506_v22 = vld [vmem:[#allocation2 + $0x10] sm:$0xff]  }
  0x6f   : > { %v1745_v21 = vshrl.u32 %v3162_v15, 16  ;;  %v1749_v24 = vshll.u32 %v3504_v20, 16  ;;  %v1220_v25 = vshrl.u32 %v3161_v14, 16  ;;  %v1224_v27 = vshll.u32 %v3506_v22, 16  ;;  %v1571_v35 = vld [vmem:[#allocation2 + $0x14] sm:$0xf] }
  0x70   : > { %v1213_v1 = vrot.slane %v1211_v19, 1  ;;  %v1218_v23 = vrot.slane %v1216_v4, 1  ;;  %v3509_v26 = vrot.slane %v1741_v2, 1  ;;  %v3512_v28 = vshrl.u32 %v769_v17, 7  ;;  %v1568_v36 = vld [vmem:[#allocation2 + $0x8] sm:$0xf] }
  0x71   : > { %v3514_v30 = vrot.slane %v1749_v24, 1  ;;  %v3517_v33 = vrot.slane %v1224_v27, 1  ;;  %v1570_v38 = vld [vmem:[#allocation2 + $0x10] sm:$0xf]  ;;  %v1569_v40 = vld [vmem:[#allocation2 + $0xc] sm:$0xf] }
  0x72   : > { %v1214_v29 = vor.u32 %v1213_v1, %v1209_v18  ;;  %v1222_v31 = vor.u32 %v1220_v25, %v1218_v23  ;;  %v1747_v32 = vor.u32 %v1745_v21, %v3509_v26  ;;  %v772_v34 = vadd.s32 16, %v3512_v28  ;;  %v1963_v41 = vld [vmem:[#allocation2 + $0x18] sm:$0xf]  ;;  %v3165_v42 = vld [vmem:[#allocation2 + $0x8] sm:$0xff]   ;;  %v1964_v47 = vld [vmem:[#allocation2 + $0x1c] sm:$0xf] }
  0x73   : > { %v790_v39 = vand.u32 15, %v3512_v28  ;;  %vm3232_vm9 = vmmov 1   ;;  %s3233_s18 = smov 16   ;;  %v1734_v49 = vshrl.u32 %v3165_v42, 16  ;;  %v1736_v50 = vshll.u32 %v3165_v42, 16  ;;  %s3234_s19 = smov 12  }
  0x74   : > { %v1219_v37 = vsel %vm1207_vm8, %v1214_v29, %v1218_v23  ;;  %v1752_v43 = vsel %vm1207_vm8, %v1747_v32, %v3514_v30  ;;  %v1227_v44 = vsel %vm1207_vm8, %v1222_v31, %v3517_v33  ;;  %v804_v45 = vand.u32 15, %v772_v34  ;;  %vm3527_vm10 = vmpackc.low %vm3232_vm9, %vm3232_vm9  ;;  %v1961_v8 = vld [vmem:[#allocation2 + $0x10] sm:$0xf]  ;;  %v1962_v9 = vld [vmem:[#allocation2 + $0x14] sm:$0xf]  ;;  %s3235_s29 = smov 24  }
  0x75   : > { %1276 = vrot.lane.b32.xlu0 %v1219_v37, %s3231_s21  ;;  %1803 = vrot.lane.b32.xlu1 %v1752_v43, %s3233_s18  ;;  %vm978_vm11 = vcmp.ge.s32.totalorder %v790_v39, 1  ;;  %v1585_v48 = vsel %vm3527_vm10, %v1569_v40, 0  ;;  %v1587_v51 = vsel %vm3527_vm10, %v1571_v35, 0  ;;  %v771_v53 = vadd.s32 8, %v3512_v28  ;;  %v1309_v11 = vld [vmem:[#allocation2] sm:$0xe] }
  0x76   : > { %vm980_vm12 = vcmp.ge.s32.totalorder %v804_v45, 1  ;;  %vm3536_vm13 = vmpackc.low %vm978_vm11, %vm978_vm11  ;;  %v773_v54 = vadd.s32 24, %v3512_v28  ;;  %v1980_v57 = vsel %vm3527_vm10, %v1964_v47, 0  ;;  %v1738_v58 = vrot.slane %v1736_v50, 1  ;;  %v1834_v15 = vld [vmem:[#allocation2 + $0x8] sm:$0xe] }
  0x77   : > { %vm3542_vm14 = vmpackc.low %vm980_vm12, %vm980_vm12  ;;  %v1584_v56 = vsel %vm3536_vm13, %v1568_v36, 0  ;;  %v1374_v59 = vsel %vm3527_vm10, 65537, %v3230_v5  ;;  %v797_v63 = vand.u32 15, %v771_v53  ;;  %vm1390_vm1 = vcmask 1040384   ;;  %v1310_v18 = vld [vmem:[#allocation2 + $0x4] sm:$0xf] }
  0x78   : > { %v1586_v60 = vsel %vm3542_vm14, %v1570_v38, 0  ;;  %v2904_v61 = vcombine.low %v1584_v56, %v1585_v48  ;;  %v1979_v62 = vsel %vm3542_vm14, %v1963_v41, 0  ;;  %v1739_v3 = vor.u32 %v1738_v58, %v1734_v49  ;;  %v1312_v19 = vld [vmem:[#allocation2 + $0xc] sm:$0xf]  ;;  %v1311_v1 = vld [vmem:[#allocation2 + $0x8] sm:$0xf] }
  0x79   : > { %1278 = vrot.lane.b32.xlu0 %v1227_v44, %s3231_s21  ;;  %v2905_v0 = vcombine.low %v1586_v60, %v1587_v51  ;;  %v811_v6 = vand.u32 15, %v773_v54  ;;  %vm995_vm15 = vcmp.le.s32.totalorder %v797_v63, 14  ;;  %vm1391_vm3 = vcmask 1044484   ;;  %v1836_v32 = vld [vmem:[#allocation2 + $0x10] sm:$0xf]  ;;  %v3167_v54 = vld [vmem:[#allocation2 + $0x18] sm:$0xff]  }
  0x7a   : > { %v3558_v10 = vrot.slane %v1374_v59, 7  ;;  %v2931_v7 = vcombine.low %v1979_v62, %v1980_v57  ;;  %vm1359_vm5 = vmpackc.low %vm995_vm15, %vm995_vm15  ;;  %v1977_v16 = vsel %vm3536_vm13, %v1961_v8, 0  ;;  %v1978_v14 = vsel %vm3527_vm10, %v1962_v9, 0  ;;  %v1837_v34 = vld [vmem:[#allocation2 + $0x14] sm:$0xf]  ;;  %s3236_s7 = smov 8  }
  0x7b   : > { %1642 = vrot.lane.b32.xlu1 %v2905_v0, %s3234_s19  ;;  %vm997_vm4 = vcmp.le.s32.totalorder %v811_v6, 14  ;;  %v1375_v12 = vsel %vm1359_vm5, 65537, %v3230_v5  ;;  %v1744_v17 = vsel %vm1207_vm8, %v1739_v3, %v3509_v26  ;;  %vm3576_vm9 = vmor %vm1390_vm1, %vm1391_vm3  ;;  %vm1517_vm11 = vcmask 1046528   ;;  %v1835_v26 = vld [vmem:[#allocation2 + $0xc] sm:$0xf]  ;;  %v3166_v48 = vld [vmem:[#allocation2 + $0x10] sm:$0xff]  }
  0x7c   : > { %vm1361_vm6 = vmpackc.low %vm997_vm4, %vm997_vm4  ;;  %v3566_v13 = vrot.slane %v3558_v10, 4  ;;  %vm1440_vm7 = vcmp.ne.s16.totalorder %v3558_v10, 0  ;;  %v1395_v21 = vrot.slane %v1375_v12, 7  ;;  %v775_v25 = vadd.s32 40, %v3512_v28  ;;  %v1313_v38 = vld [vmem:[#allocation2 + $0x10] sm:$0xf] }
  0x7d   : > { %1640 = vrot.lane.b32.xlu0 %v2904_v61, %s3234_s19  ;;  %v1377_v4 = vsel %vm1361_vm6, 65537, %v3230_v5  ;;  %v1457_v24 = vsel %vm1440_vm7, %v1309_v11, 0  ;;  %v2930_v31 = vcombine.low %v1977_v16, %v1978_v14  ;;  %v1851_v35 = vsel %vm1440_vm7, %v1834_v15, 0  ;;  %v1838_v43 = vld [vmem:[#allocation2 + $0x18] sm:$0xf]  ;;  %v3639_v15 = vld [vmem:[#allocation2 + $0x20] sm:$0xff]  }
  0x7e   : > { %v1401_v23 = vrot.slane %v1377_v4, 7  ;;  %v3587_v27 = vsel %vm3576_vm9, %v3566_v13, %v1395_v21  ;;  %v1397_v29 = vrot.slane %v1395_v21, 4  ;;  %v825_v37 = vand.u32 15, %v775_v25  ;;  %v1314_v60 = vld [vmem:[#allocation2 + $0x14] sm:$0xf]  ;;  %s3237_s11 = smov 20  }
  0x7f   : > { %2035 = vrot.lane.b32.xlu1 %v2931_v7, %s3235_s29  ;;  %vm1441_vm12 = vcmp.ne.s16.totalorder %v3587_v27, 0  ;;  %v1839_v6 = vld [vmem:[#allocation2 + $0x1c] sm:$0xf]  ;;  %v2127_v9 = vshrl.u32 %v3166_v48, 16  ;;  %v2129_v7 = vshll.u32 %v3166_v48, 16  ;;  %v2134_v14 = vshll.u32 %v3167_v54, 16 }
  0x80   : > { %v3595_v36 = vsel %vm3576_vm9, %v3566_v13, %v1401_v23  ;;  %v1403_v39 = vrot.slane %v1401_v23, 4  ;;  %v1399_v40 = vsel %vm3576_vm9, %v1397_v29, %v3558_v10  ;;  %v1458_v41 = vsel %vm1441_vm12, %v1310_v18, 0  ;;  %v2228_v4 = vld [vmem:[#allocation2 + $0x14] sm:$0xf]  ;;  %v2229_v21 = vld [vmem:[#allocation2 + $0x18] sm:$0xf] }
  0x81   : > { %1801 = vrot.lane.b32.xlu0 %v1744_v17, %s3233_s18  ;;  %vm1443_vm15 = vcmp.ne.s16.totalorder %v3595_v36, 0  ;;  %v1852_v42 = vsel %vm1441_vm12, %v1835_v26, 0  ;;  %vm3606_vm1 = vcmp.ne.s16.totalorder %v1399_v40, 0  ;;  %v2895_v47 = vcombine.low %v1457_v24, %v1458_v41  ;;  %v2227_v17 = vld [vmem:[#allocation2 + $0x10] sm:$0xe]  ;;  %v3646_v26 = vld [vmem:[#allocation2 + $0x18] sm:$0xff]  }
  0x82   : > { %v1460_v45 = vsel %vm1443_vm15, %v1312_v19, 0  ;;  %vm999_vm3 = vcmp.le.s32.totalorder %v825_v37, 14  ;;  %v1459_v49 = vsel %vm3606_vm1, %v1311_v1, 0  ;;  %v1405_v50 = vsel %vm3576_vm9, %v1403_v39, %v3558_v10  ;;  %v2231_v41 = vld [vmem:[#allocation2 + $0x20] sm:$0xf]  ;;  %s3238_s15 = smov 28  }
  0x83   : > { %vm1363_vm4 = vmpackc.low %vm999_vm3, %vm999_vm3  ;;  %v1853_v51 = vsel %vm3606_vm1, %v1836_v32, 0  ;;  %v1854_v53 = vsel %vm1443_vm15, %v1837_v34, 0  ;;  %v2896_v56 = vcombine.low %v1459_v49, %v1460_v45  ;;  %v1518_v57 = vrot.slane %v2895_v47, 1  ;;  %v2232_v47 = vld [vmem:[#allocation2 + $0x24] sm:$0xf]  ;;  %s3239_s16 = smov 32  }
  0x84   : > { %v3623_v58 = vsel %vm1363_vm4, 65537, %v3230_v5  ;;  %vm3625_vm5 = vcmp.ne.s16.totalorder %v1405_v50, 0  ;;  %v2921_v63 = vcombine.low %v1851_v35, %v1852_v42  ;;  %v2922_v0 = vcombine.low %v1853_v51, %v1854_v53  ;;  %v2230_v35 = vld [vmem:[#allocation2 + $0x1c] sm:$0xf]  ;;  %v3671_v53 = vld [vmem:[#allocation2 + $0x20] sm:$0xff]  }
  0x85   : > { %2033 = vrot.lane.b32.xlu0 %v2930_v31, %s3235_s29  ;;  %v1407_v61 = vrot.slane %v3623_v58, 7  ;;  %v1461_v62 = vsel %vm3625_vm5, %v1313_v38, 0  ;;  %v1519_v3 = vrot.slane %v2896_v56, 1  ;;  %v1855_v8 = vsel %vm3625_vm5, %v1838_v43, 0 }
  0x86   : > { %v1911_v16 = vrot.slane %v2921_v63, 1  ;;  %v1912_v12 = vrot.slane %v2922_v0, 1  ;;  %v2131_v19 = vrot.slane %v2129_v7, 1  ;;  %v2136_v25 = vrot.slane %v2134_v14, 1 }
  0x87   : > { %v1408_v11 = vsel %vm3576_vm9, %v3566_v13, %v1407_v61  ;;  %v1520_v18 = vsel %vm1517_vm11, %v1518_v57, %v1519_v3  ;;  %v2138_v34 = vshrl.u32 %v3167_v54, 16  ;;  %v2142_v37 = vshll.u32 %v3639_v15, 16 }
  0x88   : > { %vm1445_vm6 = vcmp.ne.s16.totalorder %v1408_v11, 0  ;;  %1535 = vrot.lane.b32.xlu1 %v1520_v18, %s3236_s7  ;;  %v1913_v23 = vsel %vm1517_vm11, %v1911_v16, %v1912_v12  ;;  %v2132_v32 = vor.u32 %v2131_v19, %v2127_v9  ;;  %v2244_v38 = vsel %vm1440_vm7, %v2227_v17, 0  ;;  %v1315_v18 = vld [vmem:[#allocation2 + $0x18] sm:$0xf] }
  0x89   : > { %v1462_v1 = vsel %vm1445_vm6, %v1314_v60, 0  ;;  %v1856_v24 = vsel %vm1445_vm6, %v1839_v6, 0  ;;  %1928 = vrot.lane.b32.xlu0 %v1913_v23, %s3237_s11  ;;  %v2245_v39 = vsel %vm1441_vm12, %v2228_v4, 0  ;;  %v2246_v40 = vsel %vm3606_vm1, %v2229_v21, 0  ;;  %v1573_v21 = vld [vmem:[#allocation2 + $0x1c] sm:$0xf] }
  0x8a   : > { %v3648_v29 = vcombine.low %v1461_v62, %v1462_v1  ;;  %v3651_v31 = vcombine.low %v1855_v8, %v1856_v24  ;;  %v2137_v45 = vsel %vm1207_vm8, %v2132_v32, %v2136_v25  ;;  %v2247_v48 = vsel %vm1443_vm15, %v2230_v35, 0  ;;  %v3709_v23 = vld [vmem:[#allocation2 + $0x20] sm:$0xff]  }
  0x8b   : > { %v2947_v49 = vcombine.low %v2244_v38, %v2245_v39  ;;  %v1228_v50 = vshrl.u32 %v3506_v22, 16  ;;  %v1232_v27 = vshll.u32 %v3646_v26, 16  ;;  %v2948_v51 = vcombine.low %v2246_v40, %v2247_v48  ;;  %v1317_v40 = vld [vmem:[#allocation2 + $0x20] sm:$0xf] }
  0x8c   : > { %v1521_v42 = vrot.slane %v3648_v29, 1  ;;  %v1914_v43 = vrot.slane %v3651_v31, 1  ;;  %v2140_v54 = vor.u32 %v2138_v34, %v2136_v25  ;;  %v3674_v36 = vrot.slane %v2142_v37, 1  ;;  %v1316_v34 = vld [vmem:[#allocation2 + $0x1c] sm:$0xf] }
  0x8d   : > { %2194 = vrot.lane.b32.xlu0 %v2137_v45, %s3238_s15  ;;  %v2304_v56 = vrot.slane %v2947_v49, 1  ;;  %v2248_v22 = vsel %vm3625_vm5, %v2231_v41, 0  ;;  %v2305_v60 = vrot.slane %v2948_v51, 1  ;;  %v1230_v62 = vor.u32 %v1228_v50, %v3517_v33  ;;  %v1318_v41 = vld [vmem:[#allocation2 + $0x24] sm:$0xf] }
  0x8e   : > { %v1522_v44 = vsel %vm1517_vm11, %v1519_v3, %v1521_v42  ;;  %v1915_v57 = vsel %vm1517_vm11, %v1912_v12, %v1914_v43  ;;  %v2249_v63 = vsel %vm1445_vm6, %v2232_v47, 0  ;;  %v1234_v0 = vrot.slane %v1232_v27, 1  ;;  %v1572_v50 = vld [vmem:[#allocation2 + $0x18] sm:$0xf] }
  0x8f   : > { %1537 = vrot.lane.b32.xlu1 %v1522_v44, %s3236_s7  ;;  %v3683_v3 = vcombine.low %v2248_v22, %v2249_v63  ;;  %v777_v6 = vadd.s32 56, %v3512_v28  ;;  %v1409_v8 = vrot.slane %v1407_v61, 4  ;;  %v2306_v59 = vsel %vm1517_vm11, %v2304_v56, %v2305_v60 }
  0x90   : > { %v1236_v9 = vshrl.u32 %v3646_v26, 16  ;;  %v1240_v7 = vshll.u32 %v3671_v53, 16  ;;  %v779_v16 = vadd.s32 72, %v3512_v28  ;;  %v774_v61 = vadd.s32 32, %v3512_v28 }
  0x91   : > { %2321 = vrot.lane.b32.xlu0 %v2306_v59, %s3239_s16  ;;  %v2307_v33 = vrot.slane %v3683_v3, 1  ;;  %v839_v11 = vand.u32 15, %v777_v6  ;;  %v1411_v58 = vsel %vm3576_vm9, %v1409_v8, %v3558_v10  ;;  %v2145_v12 = vsel %vm1207_vm8, %v2140_v54, %v3674_v36  ;;  %v1575_v6 = vld [vmem:[#allocation2 + $0x24] sm:$0xf] }
  0x92   : > { %v853_v14 = vand.u32 15, %v779_v16  ;;  %v818_v19 = vand.u32 15, %v774_v61  ;;  %vm3704_vm15 = vcmp.ne.s16.totalorder %v1411_v58, 0  ;;  %v776_v1 = vadd.s32 48, %v3512_v28  ;;  %v1841_v8 = vld [vmem:[#allocation2 + $0x24] sm:$0xf] }
  0x93   : > { %1930 = vrot.lane.b32.xlu1 %v1915_v57, %s3237_s11  ;;  %v2308_v17 = vsel %vm1517_vm11, %v2305_v60, %v2307_v33  ;;  %vm1001_vm7 = vcmp.le.s32.totalorder %v839_v11, 14  ;;  %v1235_v24 = vsel %vm1207_vm8, %v1230_v62, %v1234_v0  ;;  %v1238_v25 = vor.u32 %v1236_v9, %v1234_v0  ;;  %v1840_v57 = vld [vmem:[#allocation2 + $0x20] sm:$0xf]  ;;  %v1842_v61 = vld [vmem:[#allocation2 + $0x28] sm:$0xf] }
  0x94   : > { %vm1365_vm12 = vmpackc.low %vm1001_vm7, %vm1001_vm7  ;;  %vm1003_vm1 = vcmp.le.s32.totalorder %v853_v14, 14  ;;  %v3714_v26 = vrot.slane %v1240_v7, 1  ;;  %vm982_vm4 = vcmp.ge.s32.totalorder %v818_v19, 1  ;;  %v832_v38 = vand.u32 15, %v776_v1  ;;  %v1574_v0 = vld [vmem:[#allocation2 + $0x20] sm:$0xf] }
  0x95   : > { %2323 = vrot.lane.b32.xlu0 %v2308_v17, %s3239_s16  ;;  %v1381_v32 = vsel %vm1365_vm12, 65537, %v3230_v5  ;;  %vm1367_vm3 = vmpackc.low %vm1003_vm1, %vm1003_vm1  ;;  %v1463_v39 = vsel %vm3704_vm15, %v1315_v18, 0  ;;  %v1589_v47 = vsel %vm3527_vm10, %v1573_v21, 0  ;;  %v1753_v27 = vshrl.u32 %v3504_v20, 16  ;;  %v3749_v20 = vld [vmem:[#allocation2 + $0x28] sm:$0xff]  }
  0x96   : > { %v1413_v35 = vrot.slane %v1381_v32, 7  ;;  %v3718_v37 = vsel %vm1367_vm3, 65537, %v3230_v5  ;;  %v1757_v44 = vshll.u32 %v3709_v23, 16  ;;  %vm3741_vm6 = vmpackc.low %vm982_vm4, %vm982_vm4  ;;  %vm3745_vm7 = vcmp.ge.s32.totalorder %v832_v38, 1  ;;  %v1843_v19 = vld [vmem:[#allocation2 + $0x2c] sm:$0xf] }
  0x97   : > { %2196 = vrot.lane.b32.xlu1 %v2145_v12, %s3238_s15  ;;  %v1419_v45 = vrot.slane %v3718_v37, 7  ;;  %v1761_v22 = vshrl.u32 %v3709_v23, 16  ;;  %v1243_v60 = vsel %vm1207_vm8, %v1238_v25, %v3714_v26  ;;  %v1588_v11 = vsel %vm3741_vm6, %v1572_v50, 0  ;;  %vm3773_vm3 = vmpackc.low %vm3745_vm7, %vm3745_vm7  ;;  %v3187_v23 = vld [vmem:[%s4403_s3] sm:$0xff]  }
  0x98   : > { %v3728_v48 = vsel %vm3576_vm9, %v3566_v13, %v1413_v35  ;;  %v1415_v49 = vrot.slane %v1413_v35, 4  ;;  %v1759_v17 = vrot.slane %v1757_v44, 1  ;;  %v1765_v18 = vshll.u32 %v3749_v20, 16  ;;  %3080 = vmatprep.subr.bf16.mxu0 %v3187_v23  ;;  %3102 = vmatprep.subr.bf16.mxu1 %v3187_v23  ;;  %v1965_v50 = vld [vmem:[#allocation2 + $0x20] sm:$0xf]  ;;  %v3173_v44 = vld [vmem:[#allocation2 + $0x28] sm:$0xff]  }
  0x99   : > { %vm1447_vm5 = vcmp.ne.s16.totalorder %v3728_v48, 0  ;;  %v3739_v51 = vsel %vm3576_vm9, %v3566_v13, %v1419_v45  ;;  %v1857_v21 = vsel %vm3704_vm15, %v1840_v57, 0  ;;  %v1590_v32 = vsel %vm3773_vm3, %v1574_v0, 0  ;;  %3081 = vmatpush3.bf16.msra.mxu0 %v3187_v23  ;;  %v1967_v57 = vld [vmem:[#allocation2 + $0x28] sm:$0xf]  ;;  %3105 = vmatpush3.bf16.msra.mxu1 %v3187_v23 }
  0x9a   : > { %v1464_v62 = vsel %vm1447_vm5, %v1316_v34, 0  ;;  %v1417_v63 = vsel %vm3576_vm9, %v1415_v49, %v3558_v10  ;;  %vm1449_vm12 = vcmp.ne.s16.totalorder %v3739_v51, 0  ;;  %v1858_v1 = vsel %vm1447_vm5, %v1841_v8, 0  ;;  %v1324_v51 = vld [vmem:[#allocation2 + $0x3c] sm:$0xf] }
  0x9b   : > { %1280 = vrot.lane.b32.xlu1 %v1235_v24, %s3231_s21  ;;  %v2898_v59 = vcombine.low %v1463_v39, %v1464_v62  ;;  %vm3760_vm1 = vcmp.ne.s16.totalorder %v1417_v63, 0  ;;  %v1466_v7 = vsel %vm1449_vm12, %v1318_v41, 0  ;;  %v1591_v34 = vsel %vm3527_vm10, %v1575_v6, 0  ;;  %v3813_v62 = vld [vmem:[#allocation2 + $0x30] sm:$0xff]   ;;  %v2233_v63 = vld [vmem:[#allocation2 + $0x28] sm:$0xf] }
  0x9c   : > { %v1465_v16 = vsel %vm3760_vm1, %v1317_v40, 0  ;;  %v2906_v35 = vcombine.low %v1588_v11, %v1589_v47  ;;  %v1755_v38 = vor.u32 %v1753_v27, %v3514_v30  ;;  %v1859_v39 = vsel %vm3760_vm1, %v1842_v61, 0  ;;  %v1966_v27 = vld [vmem:[#allocation2 + $0x24] sm:$0xf] }
  0x9d   : > { %v1523_v12 = vrot.slane %v2898_v59, 1  ;;  %v3778_v14 = vcombine.low %v1465_v16, %v1466_v7  ;;  %v1860_v29 = vsel %vm1449_vm12, %v1843_v19, 0  ;;  %v1763_v41 = vor.u32 %v1761_v22, %v1759_v17  ;;  %v2234_v7 = vld [vmem:[#allocation2 + $0x2c] sm:$0xf] }
  0x9e   : > { %v3808_v49 = vrot.slane %v1765_v18, 1  ;;  %v2924_v47 = vcombine.low %v1857_v21, %v1858_v1  ;;  %v2907_v30 = vcombine.low %v1590_v32, %v1591_v34  ;;  %v3811_v56 = vcombine.low %v1859_v39, %v1860_v29  ;;  %v3833_v21 = vld [vmem:[#allocation2 + $0x28] sm:$0xff]  }
  0x9f   : > { %1282 = vrot.lane.b32.xlu1 %v1243_v60, %s3231_s21  ;;  %v1524_v24 = vsel %vm1517_vm11, %v1521_v42, %v1523_v12  ;;  %v1525_v25 = vrot.slane %v3778_v14, 1  ;;  %v3188_v42 = vld [vmem:[%s4403_s3 + $0x8] sm:$0xff]   ;;  %v1760_v22 = vsel %vm1207_vm8, %v1755_v38, %v1759_v17  ;;  %v1981_v8 = vsel %vm3741_vm6, %v1965_v50, 0  ;;  %v3864_v50 = vld [vmem:[#allocation2 + $0x30] sm:$0xff]  }
  0xa0   : > { %1539 = vrot.lane.b32.xlu0 %v1524_v24, %s3236_s7  ;;  %3082 = vmatprep.subr.bf16.mxu0 %v3188_v42  ;;  %v1968_v60 = vld [vmem:[#allocation2 + $0x2c] sm:$0xf]  ;;  %v1768_v0 = vsel %vm1207_vm8, %v1763_v41, %v3808_v49  ;;  %v1916_v6 = vrot.slane %v2924_v47, 1  ;;  %v1982_v59 = vsel %vm3527_vm10, %v1966_v27, 0  ;;  %v1983_v16 = vsel %vm3773_vm3, %v1967_v57, 0 }
  0xa1   : > { %v1526_v40 = vsel %vm1517_vm11, %v1523_v12, %v1525_v25  ;;  %3103 = vmatprep.subr.bf16.mxu1 %v3188_v42  ;;  %3083 = vmatpush3.bf16.msra.mxu0 %v3188_v42  ;;  %v1984_v11 = vsel %vm3527_vm10, %v1968_v60, 0  ;;  %v2146_v61 = vshrl.u32 %v3639_v15, 16  ;;  %v2150_v12 = vshll.u32 %v3173_v44, 16  ;;  %v2235_v24 = vld [vmem:[#allocation2 + $0x30] sm:$0xf] }
  0xa2   : > { %v1918_v17 = vrot.slane %v3811_v56, 1  ;;  %v2158_v18 = vshll.u32 %v3813_v62, 16  ;;  %v2250_v19 = vsel %vm3704_vm15, %v2233_v63, 0  ;;  %v781_v1 = vadd.s32 88, %v3512_v28  ;;  %3106 = vmatpush3.bf16.msra.mxu1 %v3188_v42  ;;  %v1319_v60 = vld [vmem:[#allocation2 + $0x28] sm:$0xf] }
  0xa3   : > { %1541 = vrot.lane.b32.xlu1 %v1526_v40, %s3236_s7  ;;  %v2251_v23 = vsel %vm1447_vm5, %v2234_v7, 0  ;;  %v1421_v15 = vrot.slane %v1419_v45, 4  ;;  %v1917_v32 = vsel %vm1517_vm11, %v1914_v43, %v1916_v6  ;;  %v2932_v4 = vcombine.low %v1981_v8, %v1982_v59  ;;  %v1321_v7 = vld [vmem:[#allocation2 + $0x30] sm:$0xf] }
  0xa4   : > { %1644 = vrot.lane.b32.xlu0 %v2906_v35, %s3234_s19  ;;  %v2933_v34 = vcombine.low %v1983_v16, %v1984_v11  ;;  %v2236_v35 = vld [vmem:[#allocation2 + $0x34] sm:$0xf]  ;;  %v867_v38 = vand.u32 15, %v781_v1  ;;  %v2148_v39 = vor.u32 %v2146_v61, %v3674_v36  ;;  %v2152_v29 = vrot.slane %v2150_v12, 1 }
  0xa5   : > { %v2154_v42 = vshrl.u32 %v3173_v44, 16  ;;  %v783_v48 = vadd.s32 104, %v3512_v28  ;;  %v1919_v37 = vsel %vm1517_vm11, %v1916_v6, %v1918_v17  ;;  %v3850_v45 = vcombine.low %v2250_v19, %v2251_v23  ;;  %v1322_v12 = vld [vmem:[#allocation2 + $0x34] sm:$0xf] }
  0xa6   : > { %v1248_v31 = vshll.u32 %v3833_v21, 16  ;;  %vm1005_vm15 = vcmp.le.s32.totalorder %v867_v38, 14  ;;  %v3854_v43 = vrot.slane %v2158_v18, 1  ;;  %v1244_v40 = vshrl.u32 %v3671_v53, 16 }
  0xa7   : > { %1646 = vrot.lane.b32.xlu1 %v2907_v30, %s3234_s19  ;;  %vm1369_vm4 = vmpackc.low %vm1005_vm15, %vm1005_vm15  ;;  %v1423_v36 = vsel %vm3576_vm9, %v1421_v15, %v3558_v10  ;;  %v881_v41 = vand.u32 15, %v783_v48  ;;  %v2252_v47 = vsel %vm3760_vm1, %v2235_v24, 0  ;;  %v2253_v30 = vsel %vm1449_vm12, %v2236_v35, 0 }
  0xa8   : > { %1805 = vrot.lane.b32.xlu0 %v1760_v22, %s3233_s18  ;;  %v1252_v27 = vshrl.u32 %v3833_v21, 16  ;;  %v1385_v44 = vsel %vm1369_vm4, 65537, %v3230_v5  ;;  %v2153_v53 = vsel %vm1207_vm8, %v2148_v39, %v2152_v29  ;;  %v2156_v57 = vor.u32 %v2154_v42, %v2152_v29 }
  0xa9   : > { %v1425_v22 = vrot.slane %v1385_v44, 7  ;;  %vm1007_vm5 = vcmp.le.s32.totalorder %v881_v41, 14  ;;  %v2309_v9 = vrot.slane %v3850_v45, 1  ;;  %v1250_v63 = vrot.slane %v1248_v31, 1  ;;  %v1576_v31 = vld [vmem:[#allocation2 + $0x28] sm:$0xf] }
  0xaa   : > { %vm3871_vm7 = vcmp.ne.s16.totalorder %v1423_v36, 0  ;;  %vm1371_vm12 = vmpackc.low %vm1007_vm5, %vm1007_vm5  ;;  %v778_v6 = vadd.s32 64, %v3512_v28  ;;  %v3877_v8 = vcombine.low %v2252_v47, %v2253_v30  ;;  %v1256_v61 = vshll.u32 %v3864_v50, 16  ;;  %v3930_v36 = vld [vmem:[#allocation2 + $0x38] sm:$0xff]   ;;  %v1844_v30 = vld [vmem:[#allocation2 + $0x30] sm:$0xf] }
  0xab   : > { %1807 = vrot.lane.b32.xlu1 %v1768_v0, %s3233_s18  ;;  %v1320_v0 = vld [vmem:[#allocation2 + $0x2c] sm:$0xf]  ;;  %v3882_v59 = vsel %vm3576_vm9, %v3566_v13, %v1425_v22  ;;  %v3885_v16 = vsel %vm1371_vm12, 65537, %v3230_v5  ;;  %v1427_v11 = vrot.slane %v1425_v22, 4  ;;  %v780_v19 = vadd.s32 80, %v3512_v28 }
  0xac   : > { %1932 = vrot.lane.b32.xlu0 %v1917_v32, %s3237_s11  ;;  %vm1451_vm1 = vcmp.ne.s16.totalorder %v3882_v59, 0  ;;  %v1431_v18 = vrot.slane %v3885_v16, 7  ;;  %v1246_v21 = vor.u32 %v1244_v40, %v3714_v26  ;;  %v1467_v1 = vsel %vm3871_vm7, %v1319_v60, 0  ;;  %v1577_v40 = vld [vmem:[#allocation2 + $0x2c] sm:$0xf] }
  0xad   : > { %v1468_v23 = vsel %vm1451_vm1, %v1320_v0, 0  ;;  %v1429_v24 = vsel %vm3576_vm9, %v1427_v11, %v3558_v10  ;;  %v2161_v15 = vsel %vm1207_vm8, %v2156_v57, %v3854_v43  ;;  %v2311_v38 = vrot.slane %v3877_v8, 1  ;;  %v1845_v44 = vld [vmem:[#allocation2 + $0x34] sm:$0xf]  ;;  %v1846_v57 = vld [vmem:[#allocation2 + $0x38] sm:$0xf] }
  0xae   : > { %v3907_v32 = vsel %vm3576_vm9, %v3566_v13, %v1431_v18  ;;  %vm3909_vm15 = vcmp.ne.s16.totalorder %v1429_v24, 0  ;;  %v2900_v39 = vcombine.low %v1467_v1, %v1468_v23  ;;  %v860_v42 = vand.u32 15, %v780_v19  ;;  %v1847_v60 = vld [vmem:[#allocation2 + $0x3c] sm:$0xf]  ;;  %v1578_v0 = vld [vmem:[#allocation2 + $0x30] sm:$0xf] }
  0xaf   : > { %1934 = vrot.lane.b32.xlu1 %v1919_v37, %s3237_s11  ;;  %vm1453_vm4 = vcmp.ne.s16.totalorder %v3907_v32, 0  ;;  %v1469_v35 = vsel %vm3909_vm15, %v1321_v7, 0  ;;  %v1251_v48 = vsel %vm1207_vm8, %v1246_v21, %v1250_v63  ;;  %v3177_v37 = vld [vmem:[#allocation2 + $0x30] sm:$0xff]   ;;  %v1254_v3 = vor.u32 %v1252_v27, %v1250_v63  ;;  %v1325_v26 = vld [vmem:[#allocation2 + $0x40] sm:$0x1] }
  0xb0   : > { %2037 = vrot.lane.b32.xlu0 %v2932_v4, %s3235_s29  ;;  %v846_v4 = vand.u32 15, %v778_v6  ;;  %v1470_v29 = vsel %vm1453_vm4, %v1322_v12, 0  ;;  %v3925_v45 = vrot.slane %v1256_v61, 1  ;;  %v2312_v41 = vsel %vm1517_vm11, %v2309_v9, %v2311_v38  ;;  %v1579_v7 = vld [vmem:[#allocation2 + $0x34] sm:$0xf] }
  0xb1   : > { %v1527_v47 = vrot.slane %v2900_v39, 1  ;;  %vm988_vm12 = vcmp.ge.s32.totalorder %v860_v42, 1  ;;  %v1769_v11 = vshrl.u32 %v3749_v20, 16  ;;  %v1861_v61 = vsel %vm3871_vm7, %v1844_v30, 0  ;;  %v1970_v42 = vld [vmem:[#allocation2 + $0x34] sm:$0xf] }
  0xb2   : > { %vm986_vm5 = vcmp.ge.s32.totalorder %v846_v4, 1  ;;  %v1259_v22 = vsel %vm1207_vm8, %v1254_v3, %v3925_v45  ;;  %vm3946_vm2 = vmpackc.low %vm988_vm12, %vm988_vm12  ;;  %v1862_v12 = vsel %vm1451_vm1, %v1845_v44, 0  ;;  %v1863_v1 = vsel %vm3909_vm15, %v1846_v57, 0  ;;  %v1971_v57 = vld [vmem:[#allocation2 + $0x38] sm:$0xf] }
  0xb3   : > { %2039 = vrot.lane.b32.xlu1 %v2933_v34, %s3235_s29  ;;  %v2310_v34 = vsel %vm1517_vm11, %v2307_v33, %v2309_v9  ;;  %v3927_v33 = vcombine.low %v1469_v35, %v1470_v29  ;;  %vm3936_vm0 = vmpackc.low %vm986_vm5, %vm986_vm5  ;;  %v1593_v9 = vsel %vm3527_vm10, %v1577_v40, 0  ;;  %v1528_v19 = vsel %vm1517_vm11, %v1525_v25, %v1527_v47  ;;  %v1969_v29 = vld [vmem:[#allocation2 + $0x30] sm:$0xf]  ;;  %v1020_v8 = vld [vmem:[#allocation2 + $0x28] sm:$0xf] }
  0xb4   : > { %2198 = vrot.lane.b32.xlu0 %v2153_v53, %s3238_s15  ;;  %v1773_v53 = vshll.u32 %v3177_v37, 16  ;;  %v1592_v21 = vsel %vm3936_vm0, %v1576_v31, 0  ;;  %v1864_v23 = vsel %vm1453_vm4, %v1847_v60, 0  ;;  %v1777_v24 = vshrl.u32 %v3177_v37, 16 }
  0xb5   : > { %v1529_v63 = vrot.slane %v3927_v33, 1  ;;  %v1594_v25 = vsel %vm3946_vm2, %v1578_v0, 0  ;;  %v1595_v4 = vsel %vm3527_vm10, %v1579_v7, 0  ;;  %v2908_v35 = vcombine.low %v1592_v21, %v1593_v9  ;;  %v3989_v7 = vld [vmem:[#allocation2 + $0x40] sm:$0xff]   ;;  %v2238_v21 = vld [vmem:[#allocation2 + $0x3c] sm:$0xf] }
  0xb6   : > { %v1775_v20 = vrot.slane %v1773_v53, 1  ;;  %v3974_v39 = vcombine.low %v1863_v1, %v1864_v23  ;;  %v785_v37 = vadd.s32 120, %v3512_v28  ;;  %v1771_v3 = vor.u32 %v1769_v11, %v3808_v49  ;;  %v1972_v49 = vld [vmem:[#allocation2 + $0x3c] sm:$0xf]  ;;  %v2237_v11 = vld [vmem:[#allocation2 + $0x38] sm:$0xf] }
  0xb7   : > { %2200 = vrot.lane.b32.xlu1 %v2161_v15, %s3238_s15  ;;  %v1781_v15 = vshll.u32 %v3930_v36, 16  ;;  %v1530_v14 = vsel %vm1517_vm11, %v1527_v47, %v1529_v63  ;;  %v2909_v31 = vcombine.low %v1594_v25, %v1595_v4  ;;  %v1985_v44 = vsel %vm3936_vm0, %v1969_v29, 0  ;;  %v2239_v1 = vld [vmem:[#allocation2 + $0x40] sm:$0xf]  ;;  %v2240_v4 = vld [vmem:[#allocation2 + $0x44] sm:$0xf] }
  0xb8   : > { %2325 = vrot.lane.b32.xlu0 %v2310_v34, %s3239_s16  ;;  %v2926_v34 = vcombine.low %v1861_v61, %v1862_v12  ;;  %v1779_v40 = vor.u32 %v1777_v24, %v1775_v20  ;;  %v895_v47 = vand.u32 15, %v785_v37  ;;  %v1986_v53 = vsel %vm3527_vm10, %v1970_v42, 0  ;;  %v4005_v24 = vld [vmem:[#allocation2 + $0x38] sm:$0xff]   ;;  %v3182_v42 = vld [vmem:[#allocation2 + $0x40] ss:$0 sps:$4 sm:$0x11]  }
  0xb9   : > { %v1922_v60 = vrot.slane %v3974_v39, 1  ;;  %v1776_v9 = vsel %vm1207_vm8, %v1771_v3, %v1775_v20  ;;  %v1433_v61 = vrot.slane %v1431_v18, 4  ;;  %v782_v23 = vadd.s32 96, %v3512_v28 }
  0xba   : > { %v1920_v30 = vrot.slane %v2926_v34, 1  ;;  %vm1009_vm5 = vcmp.le.s32.totalorder %v895_v47, 14  ;;  %v1987_v16 = vsel %vm3946_vm2, %v1971_v57, 0  ;;  %v1988_v18 = vsel %vm3527_vm10, %v1972_v49, 0  ;;  %v1011_v34 = vld [vmem:[#allocation2 + $0x4] sm:$0xf] }
  0xbb   : > { %1284 = vrot.lane.b32.xlu1 %v1251_v48, %s3231_s21  ;;  %v3179_v48 = vld [vmem:[#allocation2 + $0x38] sm:$0xff]   ;;  %vm1373_vm12 = vmpackc.low %vm1009_vm5, %vm1009_vm5  ;;  %v2254_v29 = vsel %vm3871_vm7, %v2237_v11, 0  ;;  %v1435_v37 = vsel %vm3576_vm9, %v1433_v61, %v3558_v10  ;;  %v2256_v10 = vsel %vm3909_vm15, %v2239_v1, 0  ;;  %v1075_v59 = vsel %vm3527_vm10, %v1011_v34, 0  ;;  %v4056_v11 = vld [vmem:[#allocation2 + $0x40] sm:$0xff]  }
  0xbc   : > { %2327 = vrot.lane.b32.xlu0 %v2312_v41, %s3239_s16  ;;  %v3979_v41 = vrot.slane %v1781_v15, 1  ;;  %v2166_v0 = vshll.u32 %v3179_v48, 16  ;;  %v1921_v20 = vsel %vm1517_vm11, %v1918_v17, %v1920_v30  ;;  %v2170_v17 = vshrl.u32 %v3179_v48, 16  ;;  %v1012_v61 = vld [vmem:[#allocation2 + $0x8] sm:$0xf] }
  0xbd   : > { %v1260_v48 = vshrl.u32 %v3864_v50, 16  ;;  %vm1138_vm7 = vcmask 31744   ;;  %v2935_v57 = vcombine.low %v1987_v16, %v1988_v18  ;;  %vm1825_vm5 = vcmask 162944  }
  0xbe   : > { %v1784_v12 = vsel %vm1207_vm8, %v1779_v40, %v3979_v41  ;;  %v2168_v25 = vrot.slane %v2166_v0, 1  ;;  %v874_v40 = vand.u32 15, %v782_v23  ;;  %v4063_v23 = vld [vmem:[#allocation2 + $0x38] sm:$0xf]  ;;  %v1021_v0 = vld [vmem:[#allocation2 + $0x2c] sm:$0xf] }
  0xbf   : > { %1286 = vrot.lane.b32.xlu1 %v1259_v22, %s3231_s21  ;;  %v2162_v22 = vshrl.u32 %v3813_v62, 16  ;;  %v1389_v62 = vsel %vm1373_vm12, 65537, %v3230_v5  ;;  %v1923_v5 = vsel %vm1517_vm11, %v1920_v30, %v1922_v60  ;;  %v1264_v30 = vshll.u32 %v4005_v24, 16 }
  0xc0   : > { %1543 = vrot.lane.b32.xlu0 %v1528_v19, %s3236_s7  ;;  %v2934_v19 = vcombine.low %v1985_v44, %v1986_v53  ;;  %v1437_v15 = vrot.slane %v1389_v62, 7  ;;  %v2172_v50 = vor.u32 %v2170_v17, %v2168_v25  ;;  %v1262_v16 = vor.u32 %v1260_v48, %v3925_v45 }
  0xc1   : > { %v2164_v56 = vor.u32 %v2162_v22, %v3854_v43  ;;  %v2255_v43 = vsel %vm1451_vm1, %v2238_v21, 0  ;;  %v1268_v22 = vshrl.u32 %v4005_v24, 16  ;;  %vm4050_vm1 = vcmp.ge.s32.totalorder %v874_v40, 1  ;;  %v1014_v40 = vld [vmem:[#allocation2 + $0x10] sm:$0xf] }
  0xc2   : > { %v4021_v3 = vsel %vm3576_vm9, %v3566_v13, %v1437_v15  ;;  %v2257_v13 = vsel %vm1453_vm4, %v2240_v4, 0  ;;  %v4033_v2 = vrot.slane %v1437_v15, 4  ;;  %vm4039_vm9 = vcmp.ne.s16.totalorder %v1435_v37, 0  ;;  %v4070_v15 = vld [vmem:[#allocation2 + $0x44] sm:$0xf]  ;;  %vm4077_vm4 = vmpackc.low %vm4050_vm1, %vm4050_vm1 }
  0xc3   : > { %1545 = vrot.lane.b32.xlu1 %v1530_v14, %s3236_s7  ;;  %v1010_v14 = vld [vmem:[#allocation2] sm:$0xf]  ;;  %v2952_v32 = vcombine.low %v2254_v29, %v2255_v43  ;;  %v4047_v49 = vcombine.low %v2256_v10, %v2257_v13  ;;  %v1272_v21 = vshll.u32 %v3182_v42, 16  ;;  %v1266_v18 = vrot.slane %v1264_v30, 1  ;;  %v1016_v10 = vld [vmem:[#allocation2 + $0x18] sm:$0xf] }
  0xc4   : > { %1648 = vrot.lane.b32.xlu0 %v2908_v35, %s3234_s19  ;;  %v2174_v35 = vshll.u32 %v3989_v7, 16  ;;  %v1074_v47 = vsel %vm3536_vm13, %v1010_v14, 0  ;;  %vm1455_vm13 = vcmp.ne.s16.totalorder %v4021_v3, 0  ;;  %vm1456_vm15 = vcmp.ne.s16.totalorder %v4033_v2, 0 }
  0xc5   : > { %v2878_v53 = vcombine.low %v1074_v47, %v1075_v59  ;;  %v1472_v62 = vsel %vm1455_vm13, %v1324_v51, 0  ;;  %v784_v24 = vadd.s32 112, %v3512_v28  ;;  %v2315_v28 = vrot.slane %v4047_v49, 1  ;;  %v1015_v47 = vld [vmem:[#allocation2 + $0x14] sm:$0xf] }
  0xc6   : > { %v4044_v52 = vrot.slane %v2174_v35, 1  ;;  %v1270_v34 = vor.u32 %v1268_v22, %v1266_v18  ;;  %v1274_v35 = vrot.slane %v1272_v21, 1  ;;  %v1599_v29 = vsel %vm3527_vm10, %v4070_v15, 0  ;;  %v1017_v59 = vld [vmem:[#allocation2 + $0x1c] sm:$0xf] }
  0xc7   : > { %1650 = vrot.lane.b32.xlu1 %v2909_v31, %s3234_s19  ;;  %v1323_v31 = vld [vmem:[#allocation2 + $0x38] sm:$0xf]  ;;  %1139 = vst.msk [vmem:[#allocation3] sm:$0xff] %vm1138_vm7, %v2878_v53  ;;  %v1596_v42 = vsel %vm4077_vm4, %v4063_v23, 0  ;;  %v888_v37 = vand.u32 15, %v784_v24  ;;  %v1785_v43 = vshrl.u32 %v3930_v36, 16  ;;  %v1267_v30 = vsel %vm1207_vm8, %v1262_v16, %v1266_v18 }
  0xc8   : > { %1809 = vrot.lane.b32.xlu0 %v1776_v9, %s3233_s18  ;;  %v4054_v9 = vld [vmem:[#allocation2 + $0x3c] sm:$0xf]  ;;  %v1471_v1 = vsel %vm4039_vm9, %v1323_v31, 0  ;;  %v2177_v14 = vsel %vm1207_vm8, %v2172_v50, %v4044_v52  ;;  %v1789_v48 = vshll.u32 %v4056_v11, 16  ;;  %v1275_v53 = vsel %vm1207_vm8, %v1270_v34, %v1274_v35  ;;  %v1023_v18 = vld [vmem:[#allocation2 + $0x34] sm:$0xf] }
  0xc9   : > { %v1597_v55 = vsel %vm3527_vm10, %v4054_v9, 0  ;;  %v3189_v50 = vld [vmem:[%s4403_s3 + $0x10] ss:$0 sps:$4 sm:$0x33]   ;;  %v1078_v22 = vsel %vm3741_vm6, %v1014_v40, 0  ;;  %v1081_v16 = vsel %vm3527_vm10, %v1017_v59, 0 }
  0xca   : > { %v3184_v21 = vld [vmem:[#allocation2 + $0x48] ss:$0 sps:$4 sm:$0x11]   ;;  %vm2407_vm6 = vcmask 1041408   ;;  %v1085_v6 = vsel %vm3527_vm10, %v1021_v0, 0  ;;  %v1087_v35 = vsel %vm3527_vm10, %v1023_v18, 0 }
  0xcb   : > { %1811 = vrot.lane.b32.xlu1 %v1784_v12, %s3233_s18  ;;  %v1013_v12 = vld [vmem:[#allocation2 + $0xc] sm:$0xf]  ;;  %3108 = vmatprep.subr.msk.bf16.mxu0 %vm2407_vm6, %v3189_v50  ;;  %v1973_v0 = vld [vmem:[#allocation2 + $0x40] sm:$0xf]  ;;  %vm2057_vm12 = vcmask 228544   ;;  %vm4457_vm1 = vcmask 27648  }
  0xcc   : > { %1936 = vrot.lane.b32.xlu0 %v1921_v20, %s3237_s11  ;;  %v2169_v20 = vsel %vm1207_vm8, %v2164_v56, %v2168_v25  ;;  %v1077_v45 = vsel %vm3527_vm10, %v1013_v12, 0  ;;  %v4087_v56 = vcombine.low %v1471_v1, %v1472_v62  ;;  %v1473_v25 = vsel %vm1456_vm15, %v1325_v26, 0  ;;  %v1019_v26 = vld [vmem:[#allocation2 + $0x24] sm:$0xf]  ;;  %v1848_v1 = vld [vmem:[#allocation2 + $0x40] sm:$0xf]  ;;  %3109 = vmatprep.subr.msk.bf16.mxu1 %vm2407_vm6, %v3189_v50 }
  0xcd   : > { %v2903_v51 = vcombine.low %v1473_v25, %v1473_v25  ;;  %v1079_v62 = vsel %vm3527_vm10, %v1015_v47, 0  ;;  %v1083_v25 = vsel %vm3527_vm10, %v1019_v26, 0  ;;  %v1865_v59 = vsel %vm4039_vm9, %v1848_v1, 0  ;;  %v1976_v15 = vld [vmem:[#allocation2 + $0x4c] sm:$0xf] }
  0xce   : > { %v1531_v13 = vrot.slane %v4087_v56, 1  ;;  %v2880_v24 = vcombine.low %v1078_v22, %v1079_v62  ;;  %v2409_v56 = vsel %vm2407_vm6, %v3189_v50, 0  ;;  %v1992_v39 = vsel %vm3527_vm10, %v1976_v15, 0  ;;  %vm4461_vm6 = vmmov %vm4457_vm1 }
  0xcf   : > { %1938 = vrot.lane.b32.xlu1 %v1923_v5, %s3237_s11  ;;  %v2313_v5 = vrot.slane %v2952_v32, 1  ;;  %v1018_v32 = vld [vmem:[#allocation2 + $0x20] sm:$0xf]  ;;  %v1533_v12 = vrot.slane %v2903_v51, 1  ;;  %3085 = vmatpush3.bf16.msra.mxu0 %v2409_v56 }
  0xd0   : > { %2041 = vrot.lane.b32.xlu0 %v2934_v19, %s3235_s29  ;;  %v1076_v19 = vsel %vm3542_vm14, %v1012_v61, 0  ;;  %vm4118_vm14 = vcmp.ge.s32.totalorder %v888_v37, 1  ;;  %v1022_v61 = vld [vmem:[#allocation2 + $0x30] sm:$0xf]  ;;  %v1532_v54 = vsel %vm1517_vm11, %v1529_v63, %v1531_v13  ;;  %v1082_v58 = vsel %vm3936_vm0, %v1018_v32, 0  ;;  %1141 = vst.msk [vmem:[#allocation3 + $0x10] sm:$0xff] %vm1138_vm7, %v2880_v24  ;;  %3107 = vmatpush3.bf16.msra.mxu1 %v2409_v56 }
  0xd1   : > { %v2879_v4 = vcombine.low %v1076_v19, %v1077_v45  ;;  %v2314_v31 = vsel %vm1517_vm11, %v2311_v38, %v2313_v5  ;;  %v2316_v38 = vsel %vm1517_vm11, %v2313_v5, %v2315_v28  ;;  %v1024_v5 = vld [vmem:[#allocation2 + $0x38] sm:$0xf]  ;;  %v1025_v19 = vld [vmem:[#allocation2 + $0x3c] sm:$0xf]  ;;  %v1849_v45 = vld [vmem:[#allocation2 + $0x44] sm:$0xf]  ;;  %v2882_v27 = vcombine.low %v1082_v58, %v1083_v25 }
  0xd2   : > { %v1582_v63 = vld [vmem:[#allocation2 + $0x40] sm:$0xf]  ;;  %v1086_v34 = vsel %vm4077_vm4, %v1022_v61, 0  ;;  %v1850_v37 = vld [vmem:[#allocation2 + $0x48] sm:$0x1]  ;;  %v1089_v47 = vsel %vm3527_vm10, %v1025_v19, 0  ;;  %v1534_v32 = vsel %vm1517_vm11, %v1531_v13, %v1533_v12  ;;  %v2910_v13 = vcombine.low %v1596_v42, %v1597_v55 }
  0xd3   : > { %2043 = vrot.lane.b32.xlu1 %v2935_v57, %s3235_s29  ;;  %1140 = vst.msk [vmem:[#allocation3 + $0x8] sm:$0xff] %vm1138_vm7, %v2879_v4  ;;  %v1084_v4 = vsel %vm3946_vm2, %v1020_v8, 0  ;;  %v2884_v51 = vcombine.low %v1086_v34, %v1087_v35  ;;  %v1866_v50 = vsel %vm1455_vm13, %v1849_v45, 0  ;;  %1143 = vst.msk [vmem:[#allocation3 + $0x20] sm:$0xff] %vm1138_vm7, %v2882_v27  ;;  %v1791_v8 = vrot.slane %v1789_v48, 1  ;;  %v3185_v57 = vld [vmem:[#allocation2 + $0x48] sm:$0xff]  }
  0xd4   : > { %2202 = vrot.lane.b32.xlu0 %v2169_v20, %s3238_s15  ;;  %v1080_v20 = vsel %vm3773_vm3, %v1016_v10, 0  ;;  %vm4144_vm3 = vmpackc.low %vm4118_vm14, %vm4118_vm14  ;;  %v1793_v10 = vshrl.u32 %v4056_v11, 16  ;;  %v1867_v11 = vsel %vm1456_vm15, %v1850_v37, 0  ;;  %v1787_v48 = vor.u32 %v1785_v43, %v3979_v41  ;;  %v1974_v43 = vld [vmem:[#allocation2 + $0x44] sm:$0xf] }
  0xd5   : > { %v1088_v40 = vsel %vm4144_vm3, %v1024_v5, 0  ;;  %v1598_v26 = vsel %vm4144_vm3, %v1582_v63, 0  ;;  %1145 = vst.msk [vmem:[#allocation3 + $0x30] sm:$0xff] %vm1138_vm7, %v2884_v51  ;;  %vm1300_vm0 = vcmask 64544   ;;  %v2929_v42 = vcombine.low %v1867_v11, %v1867_v11  ;;  %v1975_v61 = vld [vmem:[#allocation2 + $0x48] sm:$0xf]  ;;  %vm4460_vm14 = vmmov %vm4457_vm1 }
  0xd6   : > { %v2911_v9 = vcombine.low %v1598_v26, %v1599_v29  ;;  %v1795_v23 = vor.u32 %v1793_v10, %v1791_v8  ;;  %v1792_v36 = vsel %vm1207_vm8, %v1787_v48, %v1791_v8  ;;  %v3186_v29 = vld [vmem:[#allocation2 + $0x50] ss:$0 sps:$4 sm:$0x11]   ;;  %v2182_v62 = vshll.u32 %v3185_v57, 16 }
  0xd7   : > { %2204 = vrot.lane.b32.xlu1 %v2177_v14, %s3238_s15  ;;  %v2881_v14 = vcombine.low %v1080_v20, %v1081_v16  ;;  %v2241_v20 = vld [vmem:[#allocation2 + $0x48] sm:$0xf]  ;;  %v2242_v16 = vld [vmem:[#allocation2 + $0x4c] sm:$0xf]  ;;  %v1989_v24 = vsel %vm4077_vm4, %v1973_v0, 0  ;;  %v2178_v5 = vshrl.u32 %v3989_v7, 16  ;;  %vm4459_vm4 = vmmov %vm4457_vm1 }
  0xd8   : > { %2329 = vrot.lane.b32.xlu0 %v2314_v31, %s3239_s16  ;;  %v2883_v31 = vcombine.low %v1084_v4, %v1085_v6  ;;  %v2243_v19 = vld [vmem:[#allocation2 + $0x50] sm:$0x1]  ;;  %v1991_v45 = vsel %vm4144_vm3, %v1975_v61, 0  ;;  %v2259_v17 = vsel %vm1455_vm13, %v2242_v16, 0  ;;  %v2184_v58 = vrot.slane %v2182_v62, 1  ;;  %vm4462_vm3 = vmmov %vm4457_vm1 }
  0xd9   : > { %1142 = vst.msk [vmem:[#allocation3 + $0x18] sm:$0xff] %vm1138_vm7, %v2881_v14  ;;  %v1990_v14 = vsel %vm3527_vm10, %v1974_v43, 0  ;;  %v2186_v25 = vshrl.u32 %v3185_v57, 16  ;;  %v2190_v7 = vshll.u32 %v3186_v29, 16  ;;  %v2260_v33 = vsel %vm1456_vm15, %v2243_v19, 0  ;;  %vm4458_vm15 = vmmov %vm4457_vm1 }
  0xda   : > { %1144 = vst.msk [vmem:[#allocation3 + $0x28] sm:$0xff] %vm1138_vm7, %v2883_v31  ;;  %v2936_v4 = vcombine.low %v1989_v24, %v1990_v14  ;;  %v2180_v27 = vor.u32 %v2178_v5, %v4044_v52  ;;  %v2937_v3 = vcombine.low %v1991_v45, %v1992_v39  ;;  %v2955_v35 = vcombine.low %v2260_v33, %v2260_v33 }
  0xdb   : > { %1288 = vrot.lane.b32.xlu1 %v1267_v30, %s3231_s21  ;;  %v2885_v30 = vcombine.low %v1088_v40, %v1089_v47  ;;  %v2188_v6 = vor.u32 %v2186_v25, %v2184_v58  ;;  %v2192_v34 = vrot.slane %v2190_v7, 1  ;;  %vm1559_vm2 = vcmask 97344  }
  0xdc   : > { %2331 = vrot.lane.b32.xlu0 %v2316_v38, %s3239_s16  ;;  %v1797_v38 = vshll.u32 %v3184_v21, 16  ;;  %v1926_v21 = vrot.slane %v2929_v42, 1  ;;  %v2185_v31 = vsel %vm1207_vm8, %v2180_v27, %v2184_v58  ;;  %v2319_v47 = vrot.slane %v2955_v35, 1 }
  0xdd   : > { %1146 = vst.msk [vmem:[#allocation3 + $0x38] sm:$0xff] %vm1138_vm7, %v2885_v30  ;;  %v2193_v2 = vsel %vm1207_vm8, %v2188_v6, %v2192_v34  ;;  %vm1664_vm10 = vcmask 130144   ;;  %vm2382_vm13 = vcmask 293888  }
  0xde   : > { %v1799_v55 = vrot.slane %v1797_v38, 1 }
  0xdf   : > { %1290 = vrot.lane.b32.xlu1 %v1275_v53, %s3231_s21  ;;  %v2928_v53 = vcombine.low %v1865_v59, %v1866_v50 }
  0xe0   : > { %1547 = vrot.lane.b32.xlu0 %v1532_v54, %s3236_s7  ;;  %v1800_v12 = vsel %vm1207_vm8, %v1795_v23, %v1799_v55  ;;  %vm1952_vm8 = vcmask 195744  }
  0xe1   : > { %v1924_v41 = vrot.slane %v2928_v53, 1 }
  0xe3   : > { %1549 = vrot.lane.b32.xlu1 %v1534_v32, %s3236_s7  ;;  %v1925_v54 = vsel %vm1517_vm11, %v1922_v60, %v1924_v41  ;;  %v2258_v60 = vsel %vm4039_vm9, %v2241_v20, 0  ;;  %v1927_v56 = vsel %vm1517_vm11, %v1924_v41, %v1926_v21  ;;  %vm2218_vm9 = vcmask 261344  }
  0xe4   : > { %1652 = vrot.lane.b32.xlu0 %v2910_v13, %s3234_s19  ;;  %v2954_v44 = vcombine.low %v2258_v60, %v2259_v17 }
  0xe6   : > { %v2317_v51 = vrot.slane %v2954_v44, 1 }
  0xe7   : > { %v1277_v22 = vpop.permute.xlu0 %1276  ;;  %1654 = vrot.lane.b32.xlu1 %v2911_v9, %s3234_s19  ;;  %v4199_v1 = vpop.permute.xlu1 %1803 }
  0xe8   : > { %1301 = vst.msk [vmem:[#allocation3] sm:$0xff] %vm1300_vm0, %v1277_v22  ;;  %1813 = vrot.lane.b32.xlu0 %v1792_v36, %s3233_s18  ;;  %v2318_v10 = vsel %vm1517_vm11, %v2315_v28, %v2317_v51  ;;  %v2320_v59 = vsel %vm1517_vm11, %v2317_v51, %v2319_v47  ;;  %vm2345_vm11 = vcmask 294144  }
  0xeb   : > { %v1279_v18 = vpop.permute.xlu0 %1278  ;;  %1815 = vrot.lane.b32.xlu1 %v1800_v12, %s3233_s18 }
  0xec   : > { %1302 = vst.msk [vmem:[#allocation3 + $0x8] sm:$0xff] %vm1300_vm0, %v1279_v18  ;;  %1940 = vrot.lane.b32.xlu0 %v1925_v54, %s3237_s11 }
  0xed   : > { %v1643_v46 = vpop.permute.xlu1 %1642 }
  0xef   : > { %v1641_v63 = vpop.permute.xlu0 %1640  ;;  %1942 = vrot.lane.b32.xlu1 %v1927_v56, %s3237_s11 }
  0xf0   : > { %2045 = vrot.lane.b32.xlu0 %v2936_v4, %s3235_s29 }
  0xf1   : > { %v2036_v40 = vpop.permute.xlu1 %2035 }
  0xf3   : > { %v1802_v37 = vpop.permute.xlu0 %1801  ;;  %2047 = vrot.lane.b32.xlu1 %v2937_v3, %s3235_s29 }
  0xf4   : > { %2206 = vrot.lane.b32.xlu0 %v2185_v31, %s3238_s15 }
  0xf7   : > { %v2034_v52 = vpop.permute.xlu0 %2033  ;;  %2208 = vrot.lane.b32.xlu1 %v2193_v2, %s3238_s15 }
  0xf8   : > { %2333 = vrot.lane.b32.xlu0 %v2318_v10, %s3239_s16 }
  0xfa   : > { %v1536_v50 = vpop.permute.xlu1 %1535 }
  0xfb   : > { %2335 = vrot.lane.b32.xlu1 %v2320_v59, %s3239_s16  ;;  %1560 = vst.msk [vmem:[#allocation3] sm:$0xff] %vm1559_vm2, %v1536_v50  ;;  %v1929_v30 = vpop.permute.xlu0 %1928 }
  0xfc   : > { %1665 = vst.msk [vmem:[#allocation3] sm:$0xff] %vm1664_vm10, %v1641_v63 }
  0xfd   : > { %1826 = vst.msk [vmem:[#allocation3] sm:$0xff] %vm1825_vm5, %v1802_v37 }
  0xfe   : > { %1953 = vst.msk [vmem:[#allocation3] sm:$0xff] %vm1952_vm8, %v1929_v30 }
  0xff   : > { %v2195_v49 = vpop.permute.xlu0 %2194  ;;  %2058 = vst.msk [vmem:[#allocation3] sm:$0xff] %vm2057_vm12, %v2034_v52 }
 0x100   : > { %2219 = vst.msk [vmem:[#allocation3] sm:$0xff] %vm2218_vm9, %v2195_v49 }
 0x101   : > { %v1538_v28 = vpop.permute.xlu1 %1537 }
 0x102   : > { %1561 = vst.msk [vmem:[#allocation3 + $0x8] sm:$0xff] %vm1559_vm2, %v1538_v28 }
 0x103   : > { %1666 = vst.msk [vmem:[#allocation3 + $0x8] sm:$0xff] %vm1664_vm10, %v1643_v46  ;;  %v2322_v26 = vpop.permute.xlu0 %2321 }
 0x104   : > { %1827 = vst.msk [vmem:[#allocation3 + $0x8] sm:$0xff] %vm1825_vm5, %v4199_v1 }
 0x105   : > { %v1931_v32 = vpop.permute.xlu1 %1930  ;;  %2346 = vst.msk [vmem:[#allocation3] sm:$0xff] %vm2345_vm11, %v2322_v26 }
 0x106   : > { %1954 = vst.msk [vmem:[#allocation3 + $0x8] sm:$0xff] %vm1952_vm8, %v1931_v32 }
 0x107   : > { %2059 = vst.msk [vmem:[#allocation3 + $0x8] sm:$0xff] %vm2057_vm12, %v2036_v40  ;;  %v2324_v38 = vpop.permute.xlu0 %2323 }
 0x109   : > { %v2197_v8 = vpop.permute.xlu1 %2196 }
 0x10a   : > { %2220 = vst.msk [vmem:[#allocation3 + $0x8] sm:$0xff] %vm2218_vm9, %v2197_v8 }
 0x10b   : > { %2347 = vst.msk [vmem:[#allocation3 + $0x8] sm:$0xff] %vm2345_vm11, %v2324_v38 }
 0x10c   : > { %v2354_v11 = vld [vmem:[#allocation3] sm:$0xff] }
 0x10d   : > { %v1281_v13 = vpop.permute.xlu1 %1280  ;;  %3086 = vmatprep.mubr.msk.bf16.mxu0 %vm2382_vm13, %v2354_v11 }
 0x10e   : > { %1303 = vst.msk [vmem:[#allocation3 + $0x10] sm:$0xff] %vm1300_vm0, %v1281_v13 }
 0x111   : > { %v1283_v48 = vpop.permute.xlu1 %1282 }
 0x112   : > { %1304 = vst.msk [vmem:[#allocation3 + $0x18] sm:$0xff] %vm1300_vm0, %v1283_v48  ;;  %v2355_v53 = vld [vmem:[#allocation3 + $0x8] sm:$0xff]  ;;  %v1540_v9 = vpop.permute.xlu0 %1539 }
 0x113   : > { %3087 = vmatmul.mubr.msk.bf16.vlgmr.msra.gmra.mrb[0].mxu0 %vm2382_vm13, %v2355_v53  ;;  %1562 = vst.msk [vmem:[#allocation3 + $0x10] sm:$0xff] %vm1559_vm2, %v1540_v9 }
 0x115   : > { %v1542_v23 = vpop.permute.xlu1 %1541 }
 0x116   : > { %1563 = vst.msk [vmem:[#allocation3 + $0x18] sm:$0xff] %vm1559_vm2, %v1542_v23  ;;  %v1645_v55 = vpop.permute.xlu0 %1644 }
 0x117   : > { %1667 = vst.msk [vmem:[#allocation3 + $0x10] sm:$0xff] %vm1664_vm10, %v1645_v55 }
 0x119   : > { %v1647_v42 = vpop.permute.xlu1 %1646 }
 0x11a   : > { %1668 = vst.msk [vmem:[#allocation3 + $0x18] sm:$0xff] %vm1664_vm10, %v1647_v42  ;;  %v1806_v57 = vpop.permute.xlu0 %1805 }
 0x11b   : > { %1828 = vst.msk [vmem:[#allocation3 + $0x10] sm:$0xff] %vm1825_vm5, %v1806_v57 }
 0x11d   : > { %v1808_v22 = vpop.permute.xlu1 %1807 }
 0x11e   : > { %1829 = vst.msk [vmem:[#allocation3 + $0x18] sm:$0xff] %vm1825_vm5, %v1808_v22  ;;  %v1933_v0 = vpop.permute.xlu0 %1932 }
 0x11f   : > { %1955 = vst.msk [vmem:[#allocation3 + $0x10] sm:$0xff] %vm1952_vm8, %v1933_v0 }
 0x121   : > { %v1935_v36 = vpop.permute.xlu1 %1934 }
 0x122   : > { %1956 = vst.msk [vmem:[#allocation3 + $0x18] sm:$0xff] %vm1952_vm8, %v1935_v36  ;;  %v2038_v41 = vpop.permute.xlu0 %2037 }
 0x123   : > { %2060 = vst.msk [vmem:[#allocation3 + $0x10] sm:$0xff] %vm2057_vm12, %v2038_v41 }
 0x125   : > { %v2040_v43 = vpop.permute.xlu1 %2039 }
 0x126   : > { %2061 = vst.msk [vmem:[#allocation3 + $0x18] sm:$0xff] %vm2057_vm12, %v2040_v43  ;;  %v2199_v61 = vpop.permute.xlu0 %2198 }
 0x127   : > { %2221 = vst.msk [vmem:[#allocation3 + $0x10] sm:$0xff] %vm2218_vm9, %v2199_v61 }
 0x129   : > { %v2201_v15 = vpop.permute.xlu1 %2200 }
 0x12a   : > { %2222 = vst.msk [vmem:[#allocation3 + $0x18] sm:$0xff] %vm2218_vm9, %v2201_v15  ;;  %v2326_v29 = vpop.permute.xlu0 %2325 }
 0x12b   : > { %2348 = vst.msk [vmem:[#allocation3 + $0x10] sm:$0xff] %vm2345_vm11, %v2326_v29 }
 0x12d   : > { %v1285_v12 = vpop.permute.xlu1 %1284 }
 0x12e   : > { %1305 = vst.msk [vmem:[#allocation3 + $0x20] sm:$0xff] %vm1300_vm0, %v1285_v12  ;;  %v2328_v21 = vpop.permute.xlu0 %2327 }
 0x12f   : > { %2349 = vst.msk [vmem:[#allocation3 + $0x18] sm:$0xff] %vm2345_vm11, %v2328_v21 }
 0x131   : > { %v1287_v1 = vpop.permute.xlu1 %1286 }
 0x132   : > { %1306 = vst.msk [vmem:[#allocation3 + $0x28] sm:$0xff] %vm1300_vm0, %v1287_v1  ;;  %v1544_v62 = vpop.permute.xlu0 %1543  ;;  %v2356_v20 = vld [vmem:[#allocation3 + $0x10] sm:$0xff] }
 0x133   : > { %1564 = vst.msk [vmem:[#allocation3 + $0x20] sm:$0xff] %vm1559_vm2, %v1544_v62  ;;  %3090 = vmatprep.mubr.msk.bf16.mxu0 %vm2382_vm13, %v2356_v20 }
 0x135   : > { %v1546_v16 = vpop.permute.xlu1 %1545 }
 0x136   : > { %1565 = vst.msk [vmem:[#allocation3 + $0x28] sm:$0xff] %vm1559_vm2, %v1546_v16  ;;  %v1649_v18 = vpop.permute.xlu0 %1648  ;;  %v2357_v54 = vld [vmem:[#allocation3 + $0x18] sm:$0xff] }
 0x137   : > { %1669 = vst.msk [vmem:[#allocation3 + $0x20] sm:$0xff] %vm1664_vm10, %v1649_v18  ;;  %3091 = vmatmul.mubr.msk.bf16.gmra.mrb[4].mxu0 %vm2382_vm13, %v2357_v54 }
 0x139   : > { %v1651_v24 = vpop.permute.xlu1 %1650 }
 0x13a   : > { %1670 = vst.msk [vmem:[#allocation3 + $0x28] sm:$0xff] %vm1664_vm10, %v1651_v24  ;;  %v1810_v14 = vpop.permute.xlu0 %1809 }
 0x13b   : > { %1830 = vst.msk [vmem:[#allocation3 + $0x20] sm:$0xff] %vm1825_vm5, %v1810_v14 }
 0x13d   : > { %v1812_v5 = vpop.permute.xlu1 %1811 }
 0x13e   : > { %1831 = vst.msk [vmem:[#allocation3 + $0x28] sm:$0xff] %vm1825_vm5, %v1812_v5  ;;  %v1937_v19 = vpop.permute.xlu0 %1936 }
 0x13f   : > { %1957 = vst.msk [vmem:[#allocation3 + $0x20] sm:$0xff] %vm1952_vm8, %v1937_v19 }
 0x141   : > { %v1939_v45 = vpop.permute.xlu1 %1938 }
 0x142   : > { %1958 = vst.msk [vmem:[#allocation3 + $0x28] sm:$0xff] %vm1952_vm8, %v1939_v45  ;;  %v2042_v39 = vpop.permute.xlu0 %2041 }
 0x143   : > { %2062 = vst.msk [vmem:[#allocation3 + $0x20] sm:$0xff] %vm2057_vm12, %v2042_v39 }
 0x145   : > { %v2044_v60 = vpop.permute.xlu1 %2043 }
 0x146   : > { %2063 = vst.msk [vmem:[#allocation3 + $0x28] sm:$0xff] %vm2057_vm12, %v2044_v60  ;;  %v2203_v17 = vpop.permute.xlu0 %2202 }
 0x147   : > { %2223 = vst.msk [vmem:[#allocation3 + $0x20] sm:$0xff] %vm2218_vm9, %v2203_v17 }
 0x149   : > { %v2205_v56 = vpop.permute.xlu1 %2204 }
 0x14a   : > { %2224 = vst.msk [vmem:[#allocation3 + $0x28] sm:$0xff] %vm2218_vm9, %v2205_v56  ;;  %v2330_v58 = vpop.permute.xlu0 %2329 }
 0x14b   : > { %2350 = vst.msk [vmem:[#allocation3 + $0x20] sm:$0xff] %vm2345_vm11, %v2330_v58 }
 0x14d   : > { %v1289_v25 = vpop.permute.xlu1 %1288 }
 0x14e   : > { %1307 = vst.msk [vmem:[#allocation3 + $0x30] sm:$0xff] %vm1300_vm0, %v1289_v25  ;;  %v2332_v7 = vpop.permute.xlu0 %2331 }
 0x14f   : > { %2351 = vst.msk [vmem:[#allocation3 + $0x28] sm:$0xff] %vm2345_vm11, %v2332_v7 }
 0x151   : > { %v1291_v4 = vpop.permute.xlu1 %1290 }
 0x152   : > { %1308 = vst.msk [vmem:[#allocation3 + $0x38] sm:$0xff] %vm1300_vm0, %v1291_v4  ;;  %v1548_v63 = vpop.permute.xlu0 %1547  ;;  %v2358_v33 = vld [vmem:[#allocation3 + $0x20] sm:$0xff]  ;;  %vm4463_vm0 = vmmov %vm4457_vm1 }
 0x153   : > { %1566 = vst.msk [vmem:[#allocation3 + $0x30] sm:$0xff] %vm1559_vm2, %v1548_v63  ;;  %3094 = vmatprep.mubr.msk.bf16.mxu1 %vm2382_vm13, %v2358_v33 }
 0x155   : > { %v1550_v46 = vpop.permute.xlu1 %1549 }
 0x156   : > { %1567 = vst.msk [vmem:[#allocation3 + $0x38] sm:$0xff] %vm1559_vm2, %v1550_v46  ;;  %v1653_v27 = vpop.permute.xlu0 %1652  ;;  %v2359_v44 = vld [vmem:[#allocation3 + $0x28] sm:$0xff]  ;;  %vm4464_vm2 = vmmov %vm4463_vm0 }
 0x157   : > { %1671 = vst.msk [vmem:[#allocation3 + $0x30] sm:$0xff] %vm1664_vm10, %v1653_v27  ;;  %3095 = vmatmul.mubr.msk.bf16.vlgmr.msra.gmra.mrb[0].mxu1 %vm2382_vm13, %v2359_v44 }
 0x159   : > { %v1655_v3 = vpop.permute.xlu1 %1654 }
 0x15a   : > { %1672 = vst.msk [vmem:[#allocation3 + $0x38] sm:$0xff] %vm1664_vm10, %v1655_v3  ;;  %v1814_v6 = vpop.permute.xlu0 %1813  ;;  %vm4465_vm10 = vmmov %vm4463_vm0 }
 0x15b   : > { %1832 = vst.msk [vmem:[#allocation3 + $0x30] sm:$0xff] %vm1825_vm5, %v1814_v6 }
 0x15d   : > { %v1816_v34 = vpop.permute.xlu1 %1815 }
 0x15e   : > { %1833 = vst.msk [vmem:[#allocation3 + $0x38] sm:$0xff] %vm1825_vm5, %v1816_v34  ;;  %v1941_v35 = vpop.permute.xlu0 %1940  ;;  %vm4466_vm5 = vmmov %vm4463_vm0 }
 0x15f   : > { %1959 = vst.msk [vmem:[#allocation3 + $0x30] sm:$0xff] %vm1952_vm8, %v1941_v35 }
 0x161   : > { %v1943_v37 = vpop.permute.xlu1 %1942 }
 0x162   : > { %1960 = vst.msk [vmem:[#allocation3 + $0x38] sm:$0xff] %vm1952_vm8, %v1943_v37  ;;  %v2046_v31 = vpop.permute.xlu0 %2045  ;;  %vm4467_vm8 = vmmov %vm4463_vm0 }
 0x163   : > { %2064 = vst.msk [vmem:[#allocation3 + $0x30] sm:$0xff] %vm2057_vm12, %v2046_v31 }
 0x165   : > { %v2048_v51 = vpop.permute.xlu1 %2047 }
 0x166   : > { %2065 = vst.msk [vmem:[#allocation3 + $0x38] sm:$0xff] %vm2057_vm12, %v2048_v51  ;;  %v2207_v2 = vpop.permute.xlu0 %2206  ;;  %vm4468_vm12 = vmmov %vm4463_vm0 }
 0x167   : > { %2225 = vst.msk [vmem:[#allocation3 + $0x30] sm:$0xff] %vm2218_vm9, %v2207_v2 }
 0x169   : > { %v2209_v40 = vpop.permute.xlu1 %2208 }
 0x16a   : > { %2226 = vst.msk [vmem:[#allocation3 + $0x38] sm:$0xff] %vm2218_vm9, %v2209_v40  ;;  %v2334_v47 = vpop.permute.xlu0 %2333  ;;  %vm4469_vm9 = vmmov %vm4463_vm0 }
 0x16b   : > { %2352 = vst.msk [vmem:[#allocation3 + $0x30] sm:$0xff] %vm2345_vm11, %v2334_v47 }
 0x16d   : > { %v2336_v52 = vpop.permute.xlu1 %2335 }
 0x16e   : > { %2353 = vst.msk [vmem:[#allocation3 + $0x38] sm:$0xff] %vm2345_vm11, %v2336_v52  ;;  %vm4470_vm11 = vmmov %vm4463_vm0 }
 0x172   : > { %v2360_v10 = vld [vmem:[#allocation3 + $0x30] sm:$0xff] }
 0x173   : > { %3098 = vmatprep.mubr.msk.bf16.mxu1 %vm2382_vm13, %v2360_v10 }
 0x175   : > { %v2361_v59 = vld [vmem:[#allocation3 + $0x38] sm:$0xff] }
 0x176   : > { %3099 = vmatmul.mubr.msk.bf16.gmra.mrb[4].mxu1 %vm2382_vm13, %v2361_v59  ;;  %vm4471_vm13 = vmmov %vm4463_vm0 }
 0x1e6   : > { %v3088_v50 = vpop.f32.mrb[0].mxu0 }
 0x1e7   : > { %v3008_v30 = vpack.c.bf16 %v3088_v50, %v3088_v50  ;;  %v2445_v49 = vpop.f32.mrb[1].mxu0  ;;  %v2548_v8 = vmul.f32 %v3088_v50, %v3088_v50  ;;  %v2511_v55 = vsel %vm1138_vm7, %v3088_v50, 0.0 }
 0x1e8   : > { %v2546_v28 = vmul.f32 %v2445_v49, %v2445_v49  ;;  %v3006_v32 = vpack.c.bf16 %v2445_v49, %v2445_v49  ;;  %v3089_v26 = vpop.f32.mrb[2].mxu0  ;;  %v2508_v11 = vsel %vm1138_vm7, %v2445_v49, 0.0 }
 0x1e9   : > { %2666 = vst.msk [vmem:[%s3360_s12 + $0x8] sm:$0xf] %vm4457_vm1, %v3008_v30  ;;  %v3009_v38 = vpack.c.bf16 %v3089_v26, %v3089_v26  ;;  %v2448_v13 = vpop.f32.mrb[3].mxu0  ;;  %v2549_v57 = vmul.f32 %v3089_v26, %v3089_v26  ;;  %v2565_v41 = vsel %vm1138_vm7, %v2548_v8, 0.0  ;;  %v2513_v43 = vsel %vm1138_vm7, %v3089_v26, 0.0  ;;  %vm4472_vm1 = vmmov %vm4463_vm0 }
 0x1ea   : > { %2664 = vst.msk [vmem:[%s3360_s12] sm:$0xf] %vm4458_vm15, %v3006_v32  ;;  %v2509_v48 = vsel %vm1138_vm7, %v2448_v13, 0.0  ;;  %v2547_v53 = vmul.f32 %v2448_v13, %v2448_v13  ;;  %v3007_v9 = vpack.c.bf16 %v2448_v13, %v2448_v13  ;;  %v2562_v42 = vsel %vm1138_vm7, %v2546_v28, 0.0 }
 0x1eb   : > { %2667 = vst.msk [vmem:[%s3360_s12 + $0xc] sm:$0xf] %vm4459_vm4, %v3009_v38  ;;  %v2510_v23 = vadd.f32 %v2509_v48, %v2508_v11  ;;  %v2567_v29 = vsel %vm1138_vm7, %v2549_v57, 0.0  ;;  %vm4473_vm15 = vcmask 24576  }
 0x1ec   : > { %v2563_v22 = vsel %vm1138_vm7, %v2547_v53, 0.0  ;;  %2665 = vst.msk [vmem:[%s3360_s12 + $0x4] sm:$0xf] %vm4460_vm14, %v3007_v9 }
 0x1ed   : > { %v2512_v0 = vadd.f32 %v2511_v55, %v2510_v23  ;;  %v2564_v36 = vadd.f32 %v2563_v22, %v2562_v42 }
 0x1ef   : > { %v2566_v61 = vadd.f32 %v2565_v41, %v2564_v36  ;;  %v2514_v15 = vadd.f32 %v2513_v43, %v2512_v0 }
 0x1f1   : > { %v2568_v12 = vadd.f32 %v2567_v29, %v2566_v61 }
 0x20a   : > { %v3092_v21 = vpop.f32.mrb[4].mxu0 }
 0x20b   : > { %v3012_v1 = vpack.c.bf16 %v3092_v21, %v3092_v21  ;;  %v2461_v62 = vpop.f32.mrb[5].mxu0  ;;  %v2552_v24 = vmul.f32 %v3092_v21, %v3092_v21  ;;  %v2519_v25 = vsel %vm1138_vm7, %v3092_v21, 0.0 }
 0x20c   : > { %v2515_v20 = vsel %vm1138_vm7, %v2461_v62, 0.0  ;;  %v2550_v16 = vmul.f32 %v2461_v62, %v2461_v62  ;;  %v3010_v18 = vpack.c.bf16 %v2461_v62, %v2461_v62  ;;  %v3093_v54 = vpop.f32.mrb[6].mxu0 }
 0x20d   : > { %2670 = vst.msk [vmem:[%s3360_s12 + $0x18] sm:$0xf] %vm4461_vm6, %v3012_v1  ;;  %v2516_v14 = vadd.f32 %v2515_v20, %v2514_v15  ;;  %v2464_v5 = vpop.f32.mrb[7].mxu0  ;;  %v3013_v45 = vpack.c.bf16 %v3093_v54, %v3093_v54  ;;  %v2553_v7 = vmul.f32 %v3093_v54, %v3093_v54  ;;  %v2573_v46 = vsel %vm1138_vm7, %v2552_v24, 0.0 }
 0x20e   : > { %v2569_v19 = vsel %vm1138_vm7, %v2550_v16, 0.0  ;;  %2668 = vst.msk [vmem:[%s3360_s12 + $0x10] sm:$0xf] %vm4462_vm3, %v3010_v18  ;;  %v2517_v39 = vsel %vm1138_vm7, %v2464_v5, 0.0  ;;  %v2551_v60 = vmul.f32 %v2464_v5, %v2464_v5  ;;  %v3011_v58 = vpack.c.bf16 %v2464_v5, %v2464_v5 }
 0x20f   : > { %v2570_v17 = vadd.f32 %v2569_v19, %v2568_v12  ;;  %v2518_v56 = vadd.f32 %v2517_v39, %v2516_v14  ;;  %2671 = vst.msk [vmem:[%s3360_s12 + $0x1c] sm:$0xf] %vm4463_vm0, %v3013_v45  ;;  %v2521_v27 = vsel %vm1138_vm7, %v3093_v54, 0.0  ;;  %v2575_v6 = vsel %vm1138_vm7, %v2553_v7, 0.0 }
 0x210   : > { %v2571_v4 = vsel %vm1138_vm7, %v2551_v60, 0.0  ;;  %2669 = vst.msk [vmem:[%s3360_s12 + $0x14] sm:$0xf] %vm4464_vm2, %v3011_v58 }
 0x211   : > { %v2520_v63 = vadd.f32 %v2519_v25, %v2518_v56  ;;  %v2572_v33 = vadd.f32 %v2571_v4, %v2570_v17 }
 0x213   : > { %v2574_v44 = vadd.f32 %v2573_v46, %v2572_v33  ;;  %v2522_v3 = vadd.f32 %v2521_v27, %v2520_v63 }
 0x215   : > { %v2576_v34 = vadd.f32 %v2575_v6, %v2574_v44 }
 0x22a   : > { %v3096_v35 = vpop.f32.mrb[0].mxu1 }
 0x22b   : > { %v3016_v37 = vpack.c.bf16 %v3096_v35, %v3096_v35  ;;  %v2477_v31 = vpop.f32.mrb[1].mxu1  ;;  %v2556_v52 = vmul.f32 %v3096_v35, %v3096_v35  ;;  %v2527_v38 = vsel %vm1138_vm7, %v3096_v35, 0.0 }
 0x22c   : > { %v2523_v51 = vsel %vm1138_vm7, %v2477_v31, 0.0  ;;  %v2554_v2 = vmul.f32 %v2477_v31, %v2477_v31  ;;  %v3014_v40 = vpack.c.bf16 %v2477_v31, %v2477_v31  ;;  %v3097_v47 = vpop.f32.mrb[2].mxu1 }
 0x22d   : > { %2674 = vst.msk [vmem:[%s3360_s12 + $0x28] sm:$0xf] %vm4465_vm10, %v3016_v37  ;;  %v2524_v10 = vadd.f32 %v2523_v51, %v2522_v3  ;;  %v2480_v59 = vpop.f32.mrb[3].mxu1  ;;  %v3017_v30 = vpack.c.bf16 %v3097_v47, %v3097_v47  ;;  %v2557_v13 = vmul.f32 %v3097_v47, %v3097_v47  ;;  %v2581_v9 = vsel %vm1138_vm7, %v2556_v52, 0.0 }
 0x22e   : > { %v2577_v50 = vsel %vm1138_vm7, %v2554_v2, 0.0  ;;  %2672 = vst.msk [vmem:[%s3360_s12 + $0x20] sm:$0xf] %vm4466_vm5, %v3014_v40  ;;  %v2525_v49 = vsel %vm1138_vm7, %v2480_v59, 0.0  ;;  %v2555_v28 = vmul.f32 %v2480_v59, %v2480_v59  ;;  %v3015_v8 = vpack.c.bf16 %v2480_v59, %v2480_v59 }
 0x22f   : > { %v2578_v32 = vadd.f32 %v2577_v50, %v2576_v34  ;;  %v2526_v26 = vadd.f32 %v2525_v49, %v2524_v10  ;;  %2675 = vst.msk [vmem:[%s3360_s12 + $0x2c] sm:$0xf] %vm4467_vm8, %v3017_v30  ;;  %v2529_v23 = vsel %vm1138_vm7, %v3097_v47, 0.0  ;;  %v2583_v57 = vsel %vm1138_vm7, %v2557_v13, 0.0 }
 0x230   : > { %v2579_v11 = vsel %vm1138_vm7, %v2555_v28, 0.0  ;;  %2673 = vst.msk [vmem:[%s3360_s12 + $0x24] sm:$0xf] %vm4468_vm12, %v3015_v8 }
 0x231   : > { %v2528_v48 = vadd.f32 %v2527_v38, %v2526_v26  ;;  %v2580_v53 = vadd.f32 %v2579_v11, %v2578_v32 }
 0x233   : > { %v2582_v55 = vadd.f32 %v2581_v9, %v2580_v53  ;;  %v2530_v42 = vadd.f32 %v2529_v23, %v2528_v48 }
 0x235   : > { %v2584_v22 = vadd.f32 %v2583_v57, %v2582_v55 }
 0x249   : > { %v3100_v0 = vpop.f32.mrb[4].mxu1 }
 0x24a   : > { %v3020_v36 = vpack.c.bf16 %v3100_v0, %v3100_v0  ;;  %v2493_v41 = vpop.f32.mrb[5].mxu1  ;;  %v2560_v12 = vmul.f32 %v3100_v0, %v3100_v0  ;;  %v2535_v5 = vsel %vm1138_vm7, %v3100_v0, 0.0 }
 0x24b   : > { %v2531_v43 = vsel %vm1138_vm7, %v2493_v41, 0.0  ;;  %v2558_v61 = vmul.f32 %v2493_v41, %v2493_v41  ;;  %v3018_v15 = vpack.c.bf16 %v2493_v41, %v2493_v41  ;;  %v3101_v29 = vpop.f32.mrb[6].mxu1 }
 0x24c   : > { %2678 = vst.msk [vmem:[%s3360_s12 + $0x38] sm:$0xf] %vm4469_vm9, %v3020_v36  ;;  %v2532_v21 = vadd.f32 %v2531_v43, %v2530_v42  ;;  %v2496_v1 = vpop.f32.mrb[7].mxu1  ;;  %v3021_v20 = vpack.c.bf16 %v3101_v29, %v3101_v29  ;;  %v2561_v19 = vmul.f32 %v3101_v29, %v3101_v29  ;;  %v2589_v17 = vsel %vm1138_vm7, %v2560_v12, 0.0 }
 0x24d   : > { %v2585_v62 = vsel %vm1138_vm7, %v2558_v61, 0.0  ;;  %2676 = vst.msk [vmem:[%s3360_s12 + $0x30] sm:$0xf] %vm4470_vm11, %v3018_v15  ;;  %v2533_v16 = vsel %vm1138_vm7, %v2496_v1, 0.0  ;;  %v2559_v18 = vmul.f32 %v2496_v1, %v2496_v1  ;;  %v3019_v14 = vpack.c.bf16 %v2496_v1, %v2496_v1 }
 0x24e   : > { %v2586_v54 = vadd.f32 %v2585_v62, %v2584_v22  ;;  %v2534_v24 = vadd.f32 %v2533_v16, %v2532_v21  ;;  %2679 = vst.msk [vmem:[%s3360_s12 + $0x3c] sm:$0xf] %vm4471_vm13, %v3021_v20  ;;  %v2537_v56 = vsel %vm1138_vm7, %v3101_v29, 0.0  ;;  %v2591_v7 = vsel %vm1138_vm7, %v2561_v19, 0.0 }
 0x24f   : > { %v2587_v45 = vsel %vm1138_vm7, %v2559_v18, 0.0  ;;  %2677 = vst.msk [vmem:[%s3360_s12 + $0x34] sm:$0xf] %vm4472_vm1, %v3019_v14  ;;  %vm4475_vm7 = vmmov %vm4473_vm15 }
 0x250   : > { %v2536_v39 = vadd.f32 %v2535_v5, %v2534_v24  ;;  %v2588_v60 = vadd.f32 %v2587_v45, %v2586_v54 }
 0x252   : > { %v2538_v58 = vadd.f32 %v2537_v56, %v2536_v39  ;;  %v2590_v25 = vadd.f32 %v2589_v17, %v2588_v60 }
 0x254   : > { %v2539_v4 = vrot.slane %v2538_v58, 4  ;;  %v2592_v63 = vadd.f32 %v2591_v7, %v2590_v25 }
 0x256   : > { %v2540_v33 = vadd.f32 %v2539_v4, %v2538_v58  ;;  %v2593_v46 = vrot.slane %v2592_v63, 4 }
 0x258   : > { %v2541_v27 = vrot.slane %v2540_v33, 2  ;;  %v2594_v44 = vadd.f32 %v2593_v46, %v2592_v63 }
 0x25a   : > { %v2542_v3 = vadd.f32 %v2541_v27, %v2540_v33  ;;  %v2595_v6 = vrot.slane %v2594_v44, 2 }
 0x25c   : > { %v2543_v34 = vrot.slane %v2542_v3, 1  ;;  %v2596_v35 = vadd.f32 %v2595_v6, %v2594_v44 }
 0x25e   : > { %v2544_v37 = vadd.f32 %v2543_v34, %v2542_v3  ;;  %v2597_v31 = vrot.slane %v2596_v35, 1 }
 0x260   : > { %2545 = vst.msk [vmem:[%s4474_s8] sm:$0x1] %vm4473_vm15, %v2544_v37  ;;  %v2598_v51 = vadd.f32 %v2597_v31, %v2596_v35 }
 0x262   : > { %2599 = vst.msk [vmem:[%s309_s14] sm:$0x1] %vm4475_vm7, %v2598_v51 }
 0x263 PF: > { %s17_s25 = sadd.s32 1, %s3228_s25   ;;  %s4476_s21 = smov %s3220_s23 }
 0x264   : > { %p14_p10 = scmp.ge.s32.totalorder %s17_s25, 6   ;;  %s4477_s22 = smov %s3224_s24 }
 0x265   : > { %s4478_s23 = smov %s4481_s26  ;;  %s4479_s24 = smov %s4485_s27 }
 0x266   :  { %16 = sbr.rel (!%p14_p10) target bundleno = 3 (0x3), region = 101 }

</bundles_post_ra>
